<compile_context>
chip_gen: v7x
topology: tpu7x:2x2x1
jax: 0.10.0
libtpu: 0.0.40
codegen_flags: <defaults>
</compile_context>

<pallas_src>
import math

import jax
import jax.numpy as jnp
from jax.experimental import pallas as pl
from jax.experimental.pallas import tpu as pltpu


def make_decoder_layer_kernel(n_head, compute_dtype=jnp.float32, eps=1e-5):
    approx_recip = compute_dtype != jnp.float32

    def kernel(dec_ref, enc_ref,
               wq1, bq1, wk1, bk1, wv1, bv1, wo1, bo1,      # self-attention
               wq2, bq2, wk2, bk2, wv2, bv2, wo2, bo2,      # cross-attention
               g1, be1, g2, be2,                            # LayerNorms
               w1T, b1, w2T, b2,                            # FFN
               out_ref):
        _, Lt, E = dec_ref.shape
        _, Ls, _ = enc_ref.shape
        H = n_head
        Dh = E // H
        cd = compute_dtype

        # Per-grid-step batch element (blocks are (1, L, E)).
        x = dec_ref[0].astype(cd)          # (Lt, E)
        m = enc_ref[0].astype(cd)          # (Ls, E)

        def mha(xq, xkv, wqT, bq, wkT, bk, wvT, bv, woT, bo):
            Lq = xq.shape[0]
            Lk = xkv.shape[0]
            # Full-width projections (K = E contraction).  The 1/sqrt(Dh)
            # scale is already folded into wqT / bq in the wrapper.
            q = jnp.dot(xq, wqT[...], preferred_element_type=jnp.float32) + bq[...]
            k = jnp.dot(xkv, wkT[...], preferred_element_type=jnp.float32) + bk[...]
            v = jnp.dot(xkv, wvT[...], preferred_element_type=jnp.float32) + bv[...]

            # One cast per tensor (hoisted; no per-head re-casts).
            q3 = q.reshape(Lq, H, Dh).astype(cd)
            k3 = k.reshape(Lk, H, Dh).astype(cd)
            v3 = v.reshape(Lk, H, Dh).astype(cd)

            # All heads in one batched einsum pair (head = batch dim).
            s = jnp.einsum('qhd,khd->hqk', q3, k3,
                           preferred_element_type=jnp.float32)      # (H, Lq, Lk)
            # softmax in f32
            s = s - jnp.max(s, axis=-1, keepdims=True)
            p = jnp.exp(s)
            p = p * pl.reciprocal(jnp.sum(p, axis=-1, keepdims=True),
                                  approx=approx_recip)
            ctx = jnp.einsum('hqk,khd->qhd', p.astype(cd), v3,
                             preferred_element_type=jnp.float32)    # (Lq, H, Dh)

            # Heads are contiguous on the last axis -> plain reshape, then a
            # single output projection with K = E.
            return jnp.dot(ctx.reshape(Lq, E).astype(cd), woT[...],
                           preferred_element_type=jnp.float32) + bo[...]

        def layer_norm(y, g, b):
            # Fused one-pass stats (sum and sum-of-squares), f32.
            s1 = jnp.sum(y, axis=-1, keepdims=True)
            s2 = jnp.sum(y * y, axis=-1, keepdims=True)
            mu = s1 * (1.0 / E)
            var = s2 * (1.0 / E) - mu * mu
            return (y - mu) * jax.lax.rsqrt(var + eps) * g + b

        # --- self attention -> dropout(identity) -> norm_1 ---
        h1 = mha(x, x, wq1, bq1, wk1, bk1, wv1, bv1, wo1, bo1)
        h1 = layer_norm(h1, g1[...], be1[...])

        # --- cross attention with encoder output ---
        h2 = mha(h1.astype(cd), m, wq2, bq2, wk2, bk2, wv2, bv2, wo2, bo2)

        # --- positionwise FFN (dropout identity) ---
        ff = jnp.maximum(
            jnp.dot(h2.astype(cd), w1T[...],
                    preferred_element_type=jnp.float32) + b1[...], 0.0)
        ff = jnp.dot(ff.astype(cd), w2T[...],
                     preferred_element_type=jnp.float32) + b2[...]

        # --- dropout(identity) -> norm_2 ---
        out = layer_norm(ff, g2[...], be2[...])
        out_ref[...] = out.reshape(1, Lt, E).astype(out_ref.dtype)

    return kernel


def decoder_layer_pallas(dec_lne, enc_lne, params, n_head,
                         compute_dtype=jnp.bfloat16):
    """dec_lne: (Lt, N, E), enc_lne: (Ls, N, E) — PyTorch MHA layout.

    compute_dtype is the dtype of the matmul *inputs* (weights + activations);
    accumulation, softmax and LayerNorm statistics are always f32.  bf16 is
    the default (halves weight DMA / VMEM, doubles MXU rate on v6e/v7x);
    pass jnp.float32 for strict numerical parity with the f32 reference.
    """
    dec = jnp.transpose(dec_lne, (1, 0, 2))   # (N, Lt, E)
    enc = jnp.transpose(enc_lne, (1, 0, 2))   # (N, Ls, E)
    N, Lt, E = dec.shape
    _, Ls, _ = enc.shape
    Dh = E // n_head
    scale = 1.0 / math.sqrt(Dh)
    cd = compute_dtype

    # Split / transpose attention weights once in the wrapper (constants, so
    # this is free); fold the query scale into the Q weight & bias so the
    # kernel never multiplies activations by it.
    def split_attn(wqkv, bqkv, wo, bo):
        return [
            (wqkv[:E, :].T * scale).astype(cd),  bqkv[:, :E] * scale,
            wqkv[E:2 * E, :].T.astype(cd),       bqkv[:, E:2 * E],
            wqkv[2 * E:, :].T.astype(cd),        bqkv[:, 2 * E:],
            wo.T.astype(cd),                     bo,
        ]

    weights = (
        split_attn(params["wqkv1"], params["bqkv1"], params["wo1"], params["bo1"])
        + split_attn(params["wqkv2"], params["bqkv2"], params["wo2"], params["bo2"])
        + [params["g1"], params["be1"], params["g2"], params["be2"],
           params["w1"].T.astype(cd), params["b1"],
           params["w2"].T.astype(cd), params["b2"]]
    )

    # Grid over the batch dim; weights use constant index maps (resident in
    # VMEM across the grid), activations get one (1, L, E) block per step.
    in_specs = ([pl.BlockSpec((1, Lt, E), lambda b: (b, 0, 0)),
                 pl.BlockSpec((1, Ls, E), lambda b: (b, 0, 0))]
                + [pl.BlockSpec(w.shape, lambda b: (0, 0)) for w in weights])
    out_spec = pl.BlockSpec((1, Lt, E), lambda b: (b, 0, 0))

    # Rough cost estimate (helps XLA schedule neighbours around the call).
    d_ff = params["w1"].shape[0]

    def attn_flops(Lq, Lk):
        proj = 2 * Lq * E * E + 2 * (2 * Lk * E * E)   # Q + (K, V)
        attn = 2 * (2 * Lq * Lk * E)                   # scores + PV, all heads
        outp = 2 * Lq * E * E
        return proj + attn + outp

    flops = N * (attn_flops(Lt, Lt) + attn_flops(Lt, Ls)
                 + 2 * (2 * Lt * E * d_ff))
    transcendentals = N * (n_head * Lt * (Lt + Ls) + 2 * Lt)
    bytes_accessed = (4 * (dec.size + enc.size + N * Lt * E)
                      + int(sum(w.size * w.dtype.itemsize for w in weights)))

    out = pl.pallas_call(
        make_decoder_layer_kernel(n_head, compute_dtype=cd),
        out_shape=jax.ShapeDtypeStruct((N, Lt, E), jnp.float32),
        grid=(N,),
        in_specs=in_specs,
        out_specs=out_spec,
        compiler_params=pltpu.CompilerParams(
            dimension_semantics=("parallel",),          # v7x: 2 TCs split batches
            vmem_limit_bytes=64 * 1024 * 1024),
        cost_estimate=pl.CostEstimate(flops=int(flops),
                                      transcendentals=int(transcendentals),
                                      bytes_accessed=int(bytes_accessed)),
    )(dec, enc, *weights)
    return jnp.transpose(out, (1, 0, 2))      # back to (Lt, N, E)


def decoder_layer_ref(dec_lne, enc_lne, p, n_head, eps=1e-5):
    """Pure-JAX reference mirroring PyTorch DecoderLayer (inference)."""
    with jax.default_matmul_precision("highest"):
        def per_batch(x, m):
            E = x.shape[-1]
            Dh = E // n_head

            def mha(xq, xkv, wqkv, bqkv, wo, bo):
                q = xq @ wqkv[:E].T + bqkv[:, :E]
                k = xkv @ wqkv[E:2 * E].T + bqkv[:, E:2 * E]
                v = xkv @ wqkv[2 * E:].T + bqkv[:, 2 * E:]
                q = q / jnp.sqrt(float(Dh))
                outs = []
                for h in range(n_head):
                    sl = slice(h * Dh, (h + 1) * Dh)
                    s = q[:, sl] @ k[:, sl].T
                    a = jax.nn.softmax(s, axis=-1)
                    outs.append(a @ v[:, sl])
                return jnp.concatenate(outs, -1) @ wo.T + bo

            def ln(y, g, b):
                mu = y.mean(-1, keepdims=True)
                var = ((y - mu) ** 2).mean(-1, keepdims=True)
                return (y - mu) / jnp.sqrt(var + eps) * g + b

            h1 = ln(mha(x, x, p["wqkv1"], p["bqkv1"], p["wo1"], p["bo1"]),
                    p["g1"], p["be1"])
            h2 = mha(h1, m, p["wqkv2"], p["bqkv2"], p["wo2"], p["bo2"])
            ff = jnp.maximum(h2 @ p["w1"].T + p["b1"], 0.0) @ p["w2"].T + p["b2"]
            return ln(ff, p["g2"], p["be2"])

        dec = jnp.transpose(dec_lne, (1, 0, 2))
        enc = jnp.transpose(enc_lne, (1, 0, 2))
        out = jax.vmap(per_batch)(dec, enc)
        return jnp.transpose(out, (1, 0, 2))


def init_params(key, d_model, d_ff):
    ks = jax.random.split(key, 16)
    s = 0.1
    f32 = jnp.float32
    return {
        "wqkv1": jax.random.normal(ks[0], (3 * d_model, d_model), f32) * s,
        "bqkv1": jax.random.normal(ks[1], (1, 3 * d_model), f32) * s,
        "wo1":   jax.random.normal(ks[2], (d_model, d_model), f32) * s,
        "bo1":   jax.random.normal(ks[3], (1, d_model), f32) * s,
        "wqkv2": jax.random.normal(ks[4], (3 * d_model, d_model), f32) * s,
        "bqkv2": jax.random.normal(ks[5], (1, 3 * d_model), f32) * s,
        "wo2":   jax.random.normal(ks[6], (d_model, d_model), f32) * s,
        "bo2":   jax.random.normal(ks[7], (1, d_model), f32) * s,
        "g1":    1.0 + jax.random.normal(ks[8], (1, d_model), f32) * 0.01,
        "be1":   jax.random.normal(ks[9], (1, d_model), f32) * 0.01,
        "g2":    1.0 + jax.random.normal(ks[10], (1, d_model), f32) * 0.01,
        "be2":   jax.random.normal(ks[11], (1, d_model), f32) * 0.01,
        "w1":    jax.random.normal(ks[12], (d_ff, d_model), f32) * s,
        "b1":    jax.random.normal(ks[13], (1, d_ff), f32) * s,
        "w2":    jax.random.normal(ks[14], (d_model, d_ff), f32) * s,
        "b2":    jax.random.normal(ks[15], (1, d_model), f32) * s,
    }


if __name__ == "__main__":
    # Lane-dense demo sizes (E and d_ff multiples of 128), still small.
    d_model, d_ff, n_head = 128, 256, 4
    Lt, Ls, N = 8, 12, 2

    key = jax.random.PRNGKey(0)
    k1, k2, k3 = jax.random.split(key, 3)
    dec_input = jax.random.normal(k1, (Lt, N, d_model), jnp.float32)
    enc_output = jax.random.normal(k2, (Ls, N, d_model), jnp.float32)
    params = init_params(k3, d_model, d_ff)

    ref = decoder_layer_ref(dec_input, enc_output, params, n_head)

    # Strict f32 path.
    out = decoder_layer_pallas(dec_input, enc_output, params, n_head,
                               compute_dtype=jnp.float32)
    out = jax.block_until_ready(out)
    assert out.shape == (Lt, N, d_model)
    assert jnp.allclose(out, ref, atol=1e-3, rtol=1e-3), "f32 mismatch vs reference"

    # Default high-throughput bf16 matmul-input path (f32 accumulation /
    # softmax / LayerNorm stats): looser tolerance.
    out_bf16 = decoder_layer_pallas(dec_input, enc_output, params, n_head)
    out_bf16 = jax.block_until_ready(out_bf16)
    assert jnp.allclose(out_bf16, ref, atol=1e-1, rtol=1e-1), "bf16 mismatch vs reference"

    print("KERNEL_OK")
</pallas_src>

<mosaic_0001>
module attributes {stable_mosaic.version = 11 : i64} {
  func.func @kernel(%arg0: i32, %arg1: memref<1x8x128xf32, #tpu.memory_space<vmem>>, %arg2: memref<1x12x128xf32, #tpu.memory_space<vmem>>, %arg3: memref<128x128xf32, #tpu.memory_space<vmem>>, %arg4: memref<1x128xf32, #tpu.memory_space<vmem>>, %arg5: memref<128x128xf32, #tpu.memory_space<vmem>>, %arg6: memref<1x128xf32, #tpu.memory_space<vmem>>, %arg7: memref<128x128xf32, #tpu.memory_space<vmem>>, %arg8: memref<1x128xf32, #tpu.memory_space<vmem>>, %arg9: memref<128x128xf32, #tpu.memory_space<vmem>>, %arg10: memref<1x128xf32, #tpu.memory_space<vmem>>, %arg11: memref<128x128xf32, #tpu.memory_space<vmem>>, %arg12: memref<1x128xf32, #tpu.memory_space<vmem>>, %arg13: memref<128x128xf32, #tpu.memory_space<vmem>>, %arg14: memref<1x128xf32, #tpu.memory_space<vmem>>, %arg15: memref<128x128xf32, #tpu.memory_space<vmem>>, %arg16: memref<1x128xf32, #tpu.memory_space<vmem>>, %arg17: memref<128x128xf32, #tpu.memory_space<vmem>>, %arg18: memref<1x128xf32, #tpu.memory_space<vmem>>, %arg19: memref<1x128xf32, #tpu.memory_space<vmem>>, %arg20: memref<1x128xf32, #tpu.memory_space<vmem>>, %arg21: memref<1x128xf32, #tpu.memory_space<vmem>>, %arg22: memref<1x128xf32, #tpu.memory_space<vmem>>, %arg23: memref<128x256xf32, #tpu.memory_space<vmem>>, %arg24: memref<1x256xf32, #tpu.memory_space<vmem>>, %arg25: memref<256x128xf32, #tpu.memory_space<vmem>>, %arg26: memref<1x128xf32, #tpu.memory_space<vmem>>, %arg27: memref<1x8x128xf32, #tpu.memory_space<vmem>>) attributes {dimension_semantics = [#tpu.dimension_semantics<parallel>], iteration_bounds = array<i64: 2>, scalar_prefetch = 0 : i64, scratch_operands = 0 : i64, tpu.core_type = #tpu.core_type<tc>, window_params = [{transform_indices = @transform_0, window_bounds = array<i64: 1, 8, 128>}, {transform_indices = @transform_1, window_bounds = array<i64: 1, 12, 128>}, {pipeline_mode = #tpu.pipeline_mode<synchronous>, transform_indices = @transform_2, window_bounds = array<i64: 128, 128>}, {pipeline_mode = #tpu.pipeline_mode<synchronous>, transform_indices = @transform_3, window_bounds = array<i64: 1, 128>}, {pipeline_mode = #tpu.pipeline_mode<synchronous>, transform_indices = @transform_4, window_bounds = array<i64: 128, 128>}, {pipeline_mode = #tpu.pipeline_mode<synchronous>, transform_indices = @transform_5, window_bounds = array<i64: 1, 128>}, {pipeline_mode = #tpu.pipeline_mode<synchronous>, transform_indices = @transform_6, window_bounds = array<i64: 128, 128>}, {pipeline_mode = #tpu.pipeline_mode<synchronous>, transform_indices = @transform_7, window_bounds = array<i64: 1, 128>}, {pipeline_mode = #tpu.pipeline_mode<synchronous>, transform_indices = @transform_8, window_bounds = array<i64: 128, 128>}, {pipeline_mode = #tpu.pipeline_mode<synchronous>, transform_indices = @transform_9, window_bounds = array<i64: 1, 128>}, {pipeline_mode = #tpu.pipeline_mode<synchronous>, transform_indices = @transform_10, window_bounds = array<i64: 128, 128>}, {pipeline_mode = #tpu.pipeline_mode<synchronous>, transform_indices = @transform_11, window_bounds = array<i64: 1, 128>}, {pipeline_mode = #tpu.pipeline_mode<synchronous>, transform_indices = @transform_12, window_bounds = array<i64: 128, 128>}, {pipeline_mode = #tpu.pipeline_mode<synchronous>, transform_indices = @transform_13, window_bounds = array<i64: 1, 128>}, {pipeline_mode = #tpu.pipeline_mode<synchronous>, transform_indices = @transform_14, window_bounds = array<i64: 128, 128>}, {pipeline_mode = #tpu.pipeline_mode<synchronous>, transform_indices = @transform_15, window_bounds = array<i64: 1, 128>}, {pipeline_mode = #tpu.pipeline_mode<synchronous>, transform_indices = @transform_16, window_bounds = array<i64: 128, 128>}, {pipeline_mode = #tpu.pipeline_mode<synchronous>, transform_indices = @transform_17, window_bounds = array<i64: 1, 128>}, {pipeline_mode = #tpu.pipeline_mode<synchronous>, transform_indices = @transform_18, window_bounds = array<i64: 1, 128>}, {pipeline_mode = #tpu.pipeline_mode<synchronous>, transform_indices = @transform_19, window_bounds = array<i64: 1, 128>}, {pipeline_mode = #tpu.pipeline_mode<synchronous>, transform_indices = @transform_20, window_bounds = array<i64: 1, 128>}, {pipeline_mode = #tpu.pipeline_mode<synchronous>, transform_indices = @transform_21, window_bounds = array<i64: 1, 128>}, {pipeline_mode = #tpu.pipeline_mode<synchronous>, transform_indices = @transform_22, window_bounds = array<i64: 128, 256>}, {pipeline_mode = #tpu.pipeline_mode<synchronous>, transform_indices = @transform_23, window_bounds = array<i64: 1, 256>}, {pipeline_mode = #tpu.pipeline_mode<synchronous>, transform_indices = @transform_24, window_bounds = array<i64: 256, 128>}, {pipeline_mode = #tpu.pipeline_mode<synchronous>, transform_indices = @transform_25, window_bounds = array<i64: 1, 128>}, {transform_indices = @transform_26, window_bounds = array<i64: 1, 8, 128>}]} {
    %c0 = arith.constant 0 : index
    %c0_0 = arith.constant 0 : index
    %c0_1 = arith.constant 0 : index
    %0 = vector.load %arg1[%c0, %c0_0, %c0_1] : memref<1x8x128xf32, #tpu.memory_space<vmem>>, vector<1x8x128xf32>
    %1 = vector.shape_cast %0 : vector<1x8x128xf32> to vector<8x128xf32>
    %c0_2 = arith.constant 0 : index
    %c0_3 = arith.constant 0 : index
    %c0_4 = arith.constant 0 : index
    %2 = vector.load %arg2[%c0_2, %c0_3, %c0_4] : memref<1x12x128xf32, #tpu.memory_space<vmem>>, vector<1x12x128xf32>
    %3 = vector.shape_cast %2 : vector<1x12x128xf32> to vector<12x128xf32>
    %c0_5 = arith.constant 0 : index
    %c0_6 = arith.constant 0 : index
    %4 = vector.load %arg3[%c0_5, %c0_6] : memref<128x128xf32, #tpu.memory_space<vmem>>, vector<128x128xf32>
    %cst = arith.constant dense<0.000000e+00> : vector<8x128xf32>
    %5 = tpu.matmul %1, %4, %cst {dimension_numbers = #tpu.dot_dimension_numbers<[1], [0], [0], [1], [0, 0, 1, 1], [], []>} : vector<8x128xf32>, vector<128x128xf32>, vector<8x128xf32> -> vector<8x128xf32>
    %c0_7 = arith.constant 0 : index
    %c0_8 = arith.constant 0 : index
    %6 = vector.load %arg4[%c0_7, %c0_8] : memref<1x128xf32, #tpu.memory_space<vmem>>, vector<1x128xf32>
    %7 = vector.broadcast %6 : vector<1x128xf32> to vector<8x128xf32>
    %8 = arith.addf %5, %7 : vector<8x128xf32>
    %c0_9 = arith.constant 0 : index
    %c0_10 = arith.constant 0 : index
    %9 = vector.load %arg5[%c0_9, %c0_10] : memref<128x128xf32, #tpu.memory_space<vmem>>, vector<128x128xf32>
    %cst_11 = arith.constant dense<0.000000e+00> : vector<8x128xf32>
    %10 = tpu.matmul %1, %9, %cst_11 {dimension_numbers = #tpu.dot_dimension_numbers<[1], [0], [0], [1], [0, 0, 1, 1], [], []>} : vector<8x128xf32>, vector<128x128xf32>, vector<8x128xf32> -> vector<8x128xf32>
    %c0_12 = arith.constant 0 : index
    %c0_13 = arith.constant 0 : index
    %11 = vector.load %arg6[%c0_12, %c0_13] : memref<1x128xf32, #tpu.memory_space<vmem>>, vector<1x128xf32>
    %12 = vector.broadcast %11 : vector<1x128xf32> to vector<8x128xf32>
    %13 = arith.addf %10, %12 : vector<8x128xf32>
    %c0_14 = arith.constant 0 : index
    %c0_15 = arith.constant 0 : index
    %14 = vector.load %arg7[%c0_14, %c0_15] : memref<128x128xf32, #tpu.memory_space<vmem>>, vector<128x128xf32>
    %cst_16 = arith.constant dense<0.000000e+00> : vector<8x128xf32>
    %15 = tpu.matmul %1, %14, %cst_16 {dimension_numbers = #tpu.dot_dimension_numbers<[1], [0], [0], [1], [0, 0, 1, 1], [], []>} : vector<8x128xf32>, vector<128x128xf32>, vector<8x128xf32> -> vector<8x128xf32>
    %c0_17 = arith.constant 0 : index
    %c0_18 = arith.constant 0 : index
    %16 = vector.load %arg8[%c0_17, %c0_18] : memref<1x128xf32, #tpu.memory_space<vmem>>, vector<1x128xf32>
    %17 = vector.broadcast %16 : vector<1x128xf32> to vector<8x128xf32>
    %18 = arith.addf %15, %17 : vector<8x128xf32>
    %19 = vector.shape_cast %8 : vector<8x128xf32> to vector<8x4x32xf32>
    %20 = vector.shape_cast %13 : vector<8x128xf32> to vector<8x4x32xf32>
    %21 = vector.shape_cast %18 : vector<8x128xf32> to vector<8x4x32xf32>
    "tpu.trace_start"() <{level = 10 : i32, message = "qhd,khd->hqk"}> : () -> ()
    %cst_19 = arith.constant dense<0.000000e+00> : vector<4x8x8xf32>
    %22 = tpu.matmul %19, %20, %cst_19 {dimension_numbers = #tpu.dot_dimension_numbers<[2], [2], [0], [0], [0, 1, 0, 0, 1, 0], [1], [1]>} : vector<8x4x32xf32>, vector<8x4x32xf32>, vector<4x8x8xf32> -> vector<4x8x8xf32>
    "tpu.trace_stop"() : () -> ()
    %cst_20 = arith.constant dense<0xFF800000> : vector<4x8xf32>
    %23 = vector.multi_reduction <maximumf>, %22, %cst_20 [2] : vector<4x8x8xf32> to vector<4x8xf32>
    %24 = vector.shape_cast %23 : vector<4x8xf32> to vector<4x8x1xf32>
    %25 = vector.broadcast %24 : vector<4x8x1xf32> to vector<4x8x8xf32>
    %26 = arith.subf %22, %25 : vector<4x8x8xf32>
    %27 = math.exp %26 : vector<4x8x8xf32>
    %cst_21 = arith.constant dense<0.000000e+00> : vector<4x8xf32>
    %28 = vector.multi_reduction <add>, %27, %cst_21 [2] : vector<4x8x8xf32> to vector<4x8xf32>
    %29 = vector.shape_cast %28 : vector<4x8xf32> to vector<4x8x1xf32>
    %30 = tpu.reciprocal %29 : vector<4x8x1xf32> -> vector<4x8x1xf32>
    %31 = vector.broadcast %30 : vector<4x8x1xf32> to vector<4x8x8xf32>
    %32 = arith.mulf %27, %31 : vector<4x8x8xf32>
    "tpu.trace_start"() <{level = 10 : i32, message = "hqk,khd->qhd"}> : () -> ()
    %cst_22 = arith.constant dense<0.000000e+00> : vector<4x32x8xf32>
    %33 = tpu.matmul %21, %32, %cst_22 {dimension_numbers = #tpu.dot_dimension_numbers<[0], [2], [2], [1], [0, 1, 0, 2, 1, 1], [1], [0]>} : vector<8x4x32xf32>, vector<4x8x8xf32>, vector<4x32x8xf32> -> vector<4x32x8xf32>
    %34 = tpu.transpose %33, [2, 0, 1] : vector<4x32x8xf32> -> vector<8x4x32xf32>
    "tpu.trace_stop"() : () -> ()
    %35 = vector.shape_cast %34 : vector<8x4x32xf32> to vector<8x128xf32>
    %c0_23 = arith.constant 0 : index
    %c0_24 = arith.constant 0 : index
    %36 = vector.load %arg9[%c0_23, %c0_24] : memref<128x128xf32, #tpu.memory_space<vmem>>, vector<128x128xf32>
    %cst_25 = arith.constant dense<0.000000e+00> : vector<8x128xf32>
    %37 = tpu.matmul %35, %36, %cst_25 {dimension_numbers = #tpu.dot_dimension_numbers<[1], [0], [0], [1], [0, 0, 1, 1], [], []>} : vector<8x128xf32>, vector<128x128xf32>, vector<8x128xf32> -> vector<8x128xf32>
    %c0_26 = arith.constant 0 : index
    %c0_27 = arith.constant 0 : index
    %38 = vector.load %arg10[%c0_26, %c0_27] : memref<1x128xf32, #tpu.memory_space<vmem>>, vector<1x128xf32>
    %39 = vector.broadcast %38 : vector<1x128xf32> to vector<8x128xf32>
    %40 = arith.addf %37, %39 : vector<8x128xf32>
    %c0_28 = arith.constant 0 : index
    %c0_29 = arith.constant 0 : index
    %41 = vector.load %arg19[%c0_28, %c0_29] : memref<1x128xf32, #tpu.memory_space<vmem>>, vector<1x128xf32>
    %c0_30 = arith.constant 0 : index
    %c0_31 = arith.constant 0 : index
    %42 = vector.load %arg20[%c0_30, %c0_31] : memref<1x128xf32, #tpu.memory_space<vmem>>, vector<1x128xf32>
    %cst_32 = arith.constant dense<0.000000e+00> : vector<8xf32>
    %43 = vector.multi_reduction <add>, %40, %cst_32 [1] : vector<8x128xf32> to vector<8xf32>
    %44 = vector.shape_cast %43 : vector<8xf32> to vector<8x1xf32>
    %45 = arith.mulf %40, %40 : vector<8x128xf32>
    %cst_33 = arith.constant dense<0.000000e+00> : vector<8xf32>
    %46 = vector.multi_reduction <add>, %45, %cst_33 [1] : vector<8x128xf32> to vector<8xf32>
    %47 = vector.shape_cast %46 : vector<8xf32> to vector<8x1xf32>
    %cst_34 = arith.constant 7.812500e-03 : f32
    %48 = vector.broadcast %cst_34 : f32 to vector<8x1xf32>
    %49 = arith.mulf %44, %48 : vector<8x1xf32>
    %cst_35 = arith.constant 7.812500e-03 : f32
    %50 = vector.broadcast %cst_35 : f32 to vector<8x1xf32>
    %51 = arith.mulf %47, %50 : vector<8x1xf32>
    %52 = arith.mulf %49, %49 : vector<8x1xf32>
    %53 = arith.subf %51, %52 : vector<8x1xf32>
    %54 = vector.broadcast %49 : vector<8x1xf32> to vector<8x128xf32>
    %55 = arith.subf %40, %54 : vector<8x128xf32>
    %cst_36 = arith.constant 9.99999974E-6 : f32
    %56 = vector.broadcast %cst_36 : f32 to vector<8x1xf32>
    %57 = arith.addf %53, %56 : vector<8x1xf32>
    %58 = math.rsqrt %57 : vector<8x1xf32>
    %59 = vector.broadcast %58 : vector<8x1xf32> to vector<8x128xf32>
    %60 = arith.mulf %55, %59 : vector<8x128xf32>
    %61 = vector.broadcast %41 : vector<1x128xf32> to vector<8x128xf32>
    %62 = arith.mulf %60, %61 : vector<8x128xf32>
    %63 = vector.broadcast %42 : vector<1x128xf32> to vector<8x128xf32>
    %64 = arith.addf %62, %63 : vector<8x128xf32>
    %c0_37 = arith.constant 0 : index
    %c0_38 = arith.constant 0 : index
    %65 = vector.load %arg11[%c0_37, %c0_38] : memref<128x128xf32, #tpu.memory_space<vmem>>, vector<128x128xf32>
    %cst_39 = arith.constant dense<0.000000e+00> : vector<8x128xf32>
    %66 = tpu.matmul %64, %65, %cst_39 {dimension_numbers = #tpu.dot_dimension_numbers<[1], [0], [0], [1], [0, 0, 1, 1], [], []>} : vector<8x128xf32>, vector<128x128xf32>, vector<8x128xf32> -> vector<8x128xf32>
    %c0_40 = arith.constant 0 : index
    %c0_41 = arith.constant 0 : index
    %67 = vector.load %arg12[%c0_40, %c0_41] : memref<1x128xf32, #tpu.memory_space<vmem>>, vector<1x128xf32>
    %68 = vector.broadcast %67 : vector<1x128xf32> to vector<8x128xf32>
    %69 = arith.addf %66, %68 : vector<8x128xf32>
    %c0_42 = arith.constant 0 : index
    %c0_43 = arith.constant 0 : index
    %70 = vector.load %arg13[%c0_42, %c0_43] : memref<128x128xf32, #tpu.memory_space<vmem>>, vector<128x128xf32>
    %cst_44 = arith.constant dense<0.000000e+00> : vector<12x128xf32>
    %71 = tpu.matmul %3, %70, %cst_44 {dimension_numbers = #tpu.dot_dimension_numbers<[1], [0], [0], [1], [0, 0, 1, 1], [], []>} : vector<12x128xf32>, vector<128x128xf32>, vector<12x128xf32> -> vector<12x128xf32>
    %c0_45 = arith.constant 0 : index
    %c0_46 = arith.constant 0 : index
    %72 = vector.load %arg14[%c0_45, %c0_46] : memref<1x128xf32, #tpu.memory_space<vmem>>, vector<1x128xf32>
    %73 = vector.broadcast %72 : vector<1x128xf32> to vector<12x128xf32>
    %74 = arith.addf %71, %73 : vector<12x128xf32>
    %c0_47 = arith.constant 0 : index
    %c0_48 = arith.constant 0 : index
    %75 = vector.load %arg15[%c0_47, %c0_48] : memref<128x128xf32, #tpu.memory_space<vmem>>, vector<128x128xf32>
    %cst_49 = arith.constant dense<0.000000e+00> : vector<12x128xf32>
    %76 = tpu.matmul %3, %75, %cst_49 {dimension_numbers = #tpu.dot_dimension_numbers<[1], [0], [0], [1], [0, 0, 1, 1], [], []>} : vector<12x128xf32>, vector<128x128xf32>, vector<12x128xf32> -> vector<12x128xf32>
    %c0_50 = arith.constant 0 : index
    %c0_51 = arith.constant 0 : index
    %77 = vector.load %arg16[%c0_50, %c0_51] : memref<1x128xf32, #tpu.memory_space<vmem>>, vector<1x128xf32>
    %78 = vector.broadcast %77 : vector<1x128xf32> to vector<12x128xf32>
    %79 = arith.addf %76, %78 : vector<12x128xf32>
    %80 = vector.shape_cast %69 : vector<8x128xf32> to vector<8x4x32xf32>
    %81 = vector.shape_cast %74 : vector<12x128xf32> to vector<12x4x32xf32>
    %82 = vector.shape_cast %79 : vector<12x128xf32> to vector<12x4x32xf32>
    "tpu.trace_start"() <{level = 10 : i32, message = "qhd,khd->hqk"}> : () -> ()
    %cst_52 = arith.constant dense<0.000000e+00> : vector<4x8x12xf32>
    %83 = tpu.matmul %80, %81, %cst_52 {dimension_numbers = #tpu.dot_dimension_numbers<[2], [2], [0], [0], [0, 1, 0, 0, 1, 0], [1], [1]>} : vector<8x4x32xf32>, vector<12x4x32xf32>, vector<4x8x12xf32> -> vector<4x8x12xf32>
    "tpu.trace_stop"() : () -> ()
    %cst_53 = arith.constant dense<0xFF800000> : vector<4x8xf32>
    %84 = vector.multi_reduction <maximumf>, %83, %cst_53 [2] : vector<4x8x12xf32> to vector<4x8xf32>
    %85 = vector.shape_cast %84 : vector<4x8xf32> to vector<4x8x1xf32>
    %86 = vector.broadcast %85 : vector<4x8x1xf32> to vector<4x8x12xf32>
    %87 = arith.subf %83, %86 : vector<4x8x12xf32>
    %88 = math.exp %87 : vector<4x8x12xf32>
    %cst_54 = arith.constant dense<0.000000e+00> : vector<4x8xf32>
    %89 = vector.multi_reduction <add>, %88, %cst_54 [2] : vector<4x8x12xf32> to vector<4x8xf32>
    %90 = vector.shape_cast %89 : vector<4x8xf32> to vector<4x8x1xf32>
    %91 = tpu.reciprocal %90 : vector<4x8x1xf32> -> vector<4x8x1xf32>
    %92 = vector.broadcast %91 : vector<4x8x1xf32> to vector<4x8x12xf32>
    %93 = arith.mulf %88, %92 : vector<4x8x12xf32>
    "tpu.trace_start"() <{level = 10 : i32, message = "hqk,khd->qhd"}> : () -> ()
    %cst_55 = arith.constant dense<0.000000e+00> : vector<4x32x8xf32>
    %94 = tpu.matmul %82, %93, %cst_55 {dimension_numbers = #tpu.dot_dimension_numbers<[0], [2], [2], [1], [0, 1, 0, 2, 1, 1], [1], [0]>} : vector<12x4x32xf32>, vector<4x8x12xf32>, vector<4x32x8xf32> -> vector<4x32x8xf32>
    %95 = tpu.transpose %94, [2, 0, 1] : vector<4x32x8xf32> -> vector<8x4x32xf32>
    "tpu.trace_stop"() : () -> ()
    %96 = vector.shape_cast %95 : vector<8x4x32xf32> to vector<8x128xf32>
    %c0_56 = arith.constant 0 : index
    %c0_57 = arith.constant 0 : index
    %97 = vector.load %arg17[%c0_56, %c0_57] : memref<128x128xf32, #tpu.memory_space<vmem>>, vector<128x128xf32>
    %cst_58 = arith.constant dense<0.000000e+00> : vector<8x128xf32>
    %98 = tpu.matmul %96, %97, %cst_58 {dimension_numbers = #tpu.dot_dimension_numbers<[1], [0], [0], [1], [0, 0, 1, 1], [], []>} : vector<8x128xf32>, vector<128x128xf32>, vector<8x128xf32> -> vector<8x128xf32>
    %c0_59 = arith.constant 0 : index
    %c0_60 = arith.constant 0 : index
    %99 = vector.load %arg18[%c0_59, %c0_60] : memref<1x128xf32, #tpu.memory_space<vmem>>, vector<1x128xf32>
    %100 = vector.broadcast %99 : vector<1x128xf32> to vector<8x128xf32>
    %101 = arith.addf %98, %100 : vector<8x128xf32>
    %c0_61 = arith.constant 0 : index
    %c0_62 = arith.constant 0 : index
    %102 = vector.load %arg23[%c0_61, %c0_62] : memref<128x256xf32, #tpu.memory_space<vmem>>, vector<128x256xf32>
    %cst_63 = arith.constant dense<0.000000e+00> : vector<8x256xf32>
    %103 = tpu.matmul %101, %102, %cst_63 {dimension_numbers = #tpu.dot_dimension_numbers<[1], [0], [0], [1], [0, 0, 1, 1], [], []>} : vector<8x128xf32>, vector<128x256xf32>, vector<8x256xf32> -> vector<8x256xf32>
    %c0_64 = arith.constant 0 : index
    %c0_65 = arith.constant 0 : index
    %104 = vector.load %arg24[%c0_64, %c0_65] : memref<1x256xf32, #tpu.memory_space<vmem>>, vector<1x256xf32>
    %105 = vector.broadcast %104 : vector<1x256xf32> to vector<8x256xf32>
    %106 = arith.addf %103, %105 : vector<8x256xf32>
    %cst_66 = arith.constant 0.000000e+00 : f32
    %107 = vector.broadcast %cst_66 : f32 to vector<8x256xf32>
    %108 = arith.maximumf %106, %107 : vector<8x256xf32>
    %c0_67 = arith.constant 0 : index
    %c0_68 = arith.constant 0 : index
    %109 = vector.load %arg25[%c0_67, %c0_68] : memref<256x128xf32, #tpu.memory_space<vmem>>, vector<256x128xf32>
    %cst_69 = arith.constant dense<0.000000e+00> : vector<8x128xf32>
    %110 = tpu.matmul %108, %109, %cst_69 {dimension_numbers = #tpu.dot_dimension_numbers<[1], [0], [0], [1], [0, 0, 1, 1], [], []>} : vector<8x256xf32>, vector<256x128xf32>, vector<8x128xf32> -> vector<8x128xf32>
    %c0_70 = arith.constant 0 : index
    %c0_71 = arith.constant 0 : index
    %111 = vector.load %arg26[%c0_70, %c0_71] : memref<1x128xf32, #tpu.memory_space<vmem>>, vector<1x128xf32>
    %112 = vector.broadcast %111 : vector<1x128xf32> to vector<8x128xf32>
    %113 = arith.addf %110, %112 : vector<8x128xf32>
    %c0_72 = arith.constant 0 : index
    %c0_73 = arith.constant 0 : index
    %114 = vector.load %arg21[%c0_72, %c0_73] : memref<1x128xf32, #tpu.memory_space<vmem>>, vector<1x128xf32>
    %c0_74 = arith.constant 0 : index
    %c0_75 = arith.constant 0 : index
    %115 = vector.load %arg22[%c0_74, %c0_75] : memref<1x128xf32, #tpu.memory_space<vmem>>, vector<1x128xf32>
    %cst_76 = arith.constant dense<0.000000e+00> : vector<8xf32>
    %116 = vector.multi_reduction <add>, %113, %cst_76 [1] : vector<8x128xf32> to vector<8xf32>
    %117 = vector.shape_cast %116 : vector<8xf32> to vector<8x1xf32>
    %118 = arith.mulf %113, %113 : vector<8x128xf32>
    %cst_77 = arith.constant dense<0.000000e+00> : vector<8xf32>
    %119 = vector.multi_reduction <add>, %118, %cst_77 [1] : vector<8x128xf32> to vector<8xf32>
    %120 = vector.shape_cast %119 : vector<8xf32> to vector<8x1xf32>
    %cst_78 = arith.constant 7.812500e-03 : f32
    %121 = vector.broadcast %cst_78 : f32 to vector<8x1xf32>
    %122 = arith.mulf %117, %121 : vector<8x1xf32>
    %cst_79 = arith.constant 7.812500e-03 : f32
    %123 = vector.broadcast %cst_79 : f32 to vector<8x1xf32>
    %124 = arith.mulf %120, %123 : vector<8x1xf32>
    %125 = arith.mulf %122, %122 : vector<8x1xf32>
    %126 = arith.subf %124, %125 : vector<8x1xf32>
    %127 = vector.broadcast %122 : vector<8x1xf32> to vector<8x128xf32>
    %128 = arith.subf %113, %127 : vector<8x128xf32>
    %cst_80 = arith.constant 9.99999974E-6 : f32
    %129 = vector.broadcast %cst_80 : f32 to vector<8x1xf32>
    %130 = arith.addf %126, %129 : vector<8x1xf32>
    %131 = math.rsqrt %130 : vector<8x1xf32>
    %132 = vector.broadcast %131 : vector<8x1xf32> to vector<8x128xf32>
    %133 = arith.mulf %128, %132 : vector<8x128xf32>
    %134 = vector.broadcast %114 : vector<1x128xf32> to vector<8x128xf32>
    %135 = arith.mulf %133, %134 : vector<8x128xf32>
    %136 = vector.broadcast %115 : vector<1x128xf32> to vector<8x128xf32>
    %137 = arith.addf %135, %136 : vector<8x128xf32>
    %138 = vector.shape_cast %137 : vector<8x128xf32> to vector<1x8x128xf32>
    %c0_81 = arith.constant 0 : index
    %c0_82 = arith.constant 0 : index
    %c0_83 = arith.constant 0 : index
    %139 = vector.load %arg27[%c0_81, %c0_82, %c0_83] : memref<1x8x128xf32, #tpu.memory_space<vmem>>, vector<1x8x128xf32>
    tpu.vector_store %arg27[%c0_81, %c0_82, %c0_83], %138 {strides = array<i32>} : memref<1x8x128xf32, #tpu.memory_space<vmem>>, vector<1x8x128xf32>,
    return
  }
  func.func @transform_0(%arg0: i32) -> (i32, i32, i32) {
    %c0_i32 = arith.constant 0 : i32
    %c0_i32_0 = arith.constant 0 : i32
    %c0_i32_1 = arith.constant 0 : i32
    return %arg0, %c0_i32, %c0_i32_0 : i32, i32, i32
  }
  func.func @transform_1(%arg0: i32) -> (i32, i32, i32) {
    %c0_i32 = arith.constant 0 : i32
    %c0_i32_0 = arith.constant 0 : i32
    %c0_i32_1 = arith.constant 0 : i32
    return %arg0, %c0_i32, %c0_i32_0 : i32, i32, i32
  }
  func.func @transform_2(%arg0: i32) -> (i32, i32) {
    %c0_i32 = arith.constant 0 : i32
    %c0_i32_0 = arith.constant 0 : i32
    %c0_i32_1 = arith.constant 0 : i32
    return %c0_i32, %c0_i32_0 : i32, i32
  }
  func.func @transform_3(%arg0: i32) -> (i32, i32) {
    %c0_i32 = arith.constant 0 : i32
    %c0_i32_0 = arith.constant 0 : i32
    %c0_i32_1 = arith.constant 0 : i32
    return %c0_i32, %c0_i32_0 : i32, i32
  }
  func.func @transform_4(%arg0: i32) -> (i32, i32) {
    %c0_i32 = arith.constant 0 : i32
    %c0_i32_0 = arith.constant 0 : i32
    %c0_i32_1 = arith.constant 0 : i32
    return %c0_i32, %c0_i32_0 : i32, i32
  }
  func.func @transform_5(%arg0: i32) -> (i32, i32) {
    %c0_i32 = arith.constant 0 : i32
    %c0_i32_0 = arith.constant 0 : i32
    %c0_i32_1 = arith.constant 0 : i32
    return %c0_i32, %c0_i32_0 : i32, i32
  }
  func.func @transform_6(%arg0: i32) -> (i32, i32) {
    %c0_i32 = arith.constant 0 : i32
    %c0_i32_0 = arith.constant 0 : i32
    %c0_i32_1 = arith.constant 0 : i32
    return %c0_i32, %c0_i32_0 : i32, i32
  }
  func.func @transform_7(%arg0: i32) -> (i32, i32) {
    %c0_i32 = arith.constant 0 : i32
    %c0_i32_0 = arith.constant 0 : i32
    %c0_i32_1 = arith.constant 0 : i32
    return %c0_i32, %c0_i32_0 : i32, i32
  }
  func.func @transform_8(%arg0: i32) -> (i32, i32) {
    %c0_i32 = arith.constant 0 : i32
    %c0_i32_0 = arith.constant 0 : i32
    %c0_i32_1 = arith.constant 0 : i32
    return %c0_i32, %c0_i32_0 : i32, i32
  }
  func.func @transform_9(%arg0: i32) -> (i32, i32) {
    %c0_i32 = arith.constant 0 : i32
    %c0_i32_0 = arith.constant 0 : i32
    %c0_i32_1 = arith.constant 0 : i32
    return %c0_i32, %c0_i32_0 : i32, i32
  }
  func.func @transform_10(%arg0: i32) -> (i32, i32) {
    %c0_i32 = arith.constant 0 : i32
    %c0_i32_0 = arith.constant 0 : i32
    %c0_i32_1 = arith.constant 0 : i32
    return %c0_i32, %c0_i32_0 : i32, i32
  }
  func.func @transform_11(%arg0: i32) -> (i32, i32) {
    %c0_i32 = arith.constant 0 : i32
    %c0_i32_0 = arith.constant 0 : i32
    %c0_i32_1 = arith.constant 0 : i32
    return %c0_i32, %c0_i32_0 : i32, i32
  }
  func.func @transform_12(%arg0: i32) -> (i32, i32) {
    %c0_i32 = arith.constant 0 : i32
    %c0_i32_0 = arith.constant 0 : i32
    %c0_i32_1 = arith.constant 0 : i32
    return %c0_i32, %c0_i32_0 : i32, i32
  }
  func.func @transform_13(%arg0: i32) -> (i32, i32) {
    %c0_i32 = arith.constant 0 : i32
    %c0_i32_0 = arith.constant 0 : i32
    %c0_i32_1 = arith.constant 0 : i32
    return %c0_i32, %c0_i32_0 : i32, i32
  }
  func.func @transform_14(%arg0: i32) -> (i32, i32) {
    %c0_i32 = arith.constant 0 : i32
    %c0_i32_0 = arith.constant 0 : i32
    %c0_i32_1 = arith.constant 0 : i32
    return %c0_i32, %c0_i32_0 : i32, i32
  }
  func.func @transform_15(%arg0: i32) -> (i32, i32) {
    %c0_i32 = arith.constant 0 : i32
    %c0_i32_0 = arith.constant 0 : i32
    %c0_i32_1 = arith.constant 0 : i32
    return %c0_i32, %c0_i32_0 : i32, i32
  }
  func.func @transform_16(%arg0: i32) -> (i32, i32) {
    %c0_i32 = arith.constant 0 : i32
    %c0_i32_0 = arith.constant 0 : i32
    %c0_i32_1 = arith.constant 0 : i32
    return %c0_i32, %c0_i32_0 : i32, i32
  }
  func.func @transform_17(%arg0: i32) -> (i32, i32) {
    %c0_i32 = arith.constant 0 : i32
    %c0_i32_0 = arith.constant 0 : i32
    %c0_i32_1 = arith.constant 0 : i32
    return %c0_i32, %c0_i32_0 : i32, i32
  }
  func.func @transform_18(%arg0: i32) -> (i32, i32) {
    %c0_i32 = arith.constant 0 : i32
    %c0_i32_0 = arith.constant 0 : i32
    %c0_i32_1 = arith.constant 0 : i32
    return %c0_i32, %c0_i32_0 : i32, i32
  }
  func.func @transform_19(%arg0: i32) -> (i32, i32) {
    %c0_i32 = arith.constant 0 : i32
    %c0_i32_0 = arith.constant 0 : i32
    %c0_i32_1 = arith.constant 0 : i32
    return %c0_i32, %c0_i32_0 : i32, i32
  }
  func.func @transform_20(%arg0: i32) -> (i32, i32) {
    %c0_i32 = arith.constant 0 : i32
    %c0_i32_0 = arith.constant 0 : i32
    %c0_i32_1 = arith.constant 0 : i32
    return %c0_i32, %c0_i32_0 : i32, i32
  }
  func.func @transform_21(%arg0: i32) -> (i32, i32) {
    %c0_i32 = arith.constant 0 : i32
    %c0_i32_0 = arith.constant 0 : i32
    %c0_i32_1 = arith.constant 0 : i32
    return %c0_i32, %c0_i32_0 : i32, i32
  }
  func.func @transform_22(%arg0: i32) -> (i32, i32) {
    %c0_i32 = arith.constant 0 : i32
    %c0_i32_0 = arith.constant 0 : i32
    %c0_i32_1 = arith.constant 0 : i32
    return %c0_i32, %c0_i32_0 : i32, i32
  }
  func.func @transform_23(%arg0: i32) -> (i32, i32) {
    %c0_i32 = arith.constant 0 : i32
    %c0_i32_0 = arith.constant 0 : i32
    %c0_i32_1 = arith.constant 0 : i32
    return %c0_i32, %c0_i32_0 : i32, i32
  }
  func.func @transform_24(%arg0: i32) -> (i32, i32) {
    %c0_i32 = arith.constant 0 : i32
    %c0_i32_0 = arith.constant 0 : i32
    %c0_i32_1 = arith.constant 0 : i32
    return %c0_i32, %c0_i32_0 : i32, i32
  }
  func.func @transform_25(%arg0: i32) -> (i32, i32) {
    %c0_i32 = arith.constant 0 : i32
    %c0_i32_0 = arith.constant 0 : i32
    %c0_i32_1 = arith.constant 0 : i32
    return %c0_i32, %c0_i32_0 : i32, i32
  }
  func.func @transform_26(%arg0: i32) -> (i32, i32, i32) {
    %c0_i32 = arith.constant 0 : i32
    %c0_i32_0 = arith.constant 0 : i32
    %c0_i32_1 = arith.constant 0 : i32
    return %arg0, %c0_i32, %c0_i32_0 : i32, i32, i32
  }
}

</mosaic_0001>

<bundles_post_ra>
// kernel: tpu_custom_call.1
= control target key start
LH: loop header
LB: loop body
LE: loop exit
PB: predicated region body
PF: predicated region fallthrough
CT: control target
= control target key end

     0   :  { %s8797_s0 = inlined_call_operand.hbm [shape: f32[2,8,128], index: 0, kind: input, shape index: {}]   ;;  %s8798_s1 = inlined_call_operand.hbm [shape: f32[2,12,128], index: 1, kind: input, shape index: {}]   ;;  %s8799_s2 = inlined_call_operand.hbm [shape: f32[128,128], index: 2, kind: input, shape index: {}]   ;;  %s8800_s3 = inlined_call_operand.hbm [shape: f32[1,128], index: 3, kind: input, shape index: {}]   ;;  %s8801_s4 = inlined_call_operand.hbm [shape: f32[128,128], index: 4, kind: input, shape index: {}]   ;;  %s8802_s5 = inlined_call_operand.hbm [shape: f32[1,128], index: 5, kind: input, shape index: {}]   ;;  %s8803_s6 = inlined_call_operand.hbm [shape: f32[128,128], index: 6, kind: input, shape index: {}]   ;;  %s8804_s7 = inlined_call_operand.hbm [shape: f32[1,128], index: 7, kind: input, shape index: {}]   ;;  %s8805_s8 = inlined_call_operand.hbm [shape: f32[128,128], index: 8, kind: input, shape index: {}]   ;;  %s8806_s9 = inlined_call_operand.hbm [shape: f32[1,128], index: 9, kind: input, shape index: {}]   ;;  %s8807_s10 = inlined_call_operand.hbm [shape: f32[128,128], index: 10, kind: input, shape index: {}]   ;;  %s8808_s11 = inlined_call_operand.hbm [shape: f32[1,128], index: 11, kind: input, shape index: {}]   ;;  %s8809_s12 = inlined_call_operand.hbm [shape: f32[128,128], index: 12, kind: input, shape index: {}]   ;;  %s8810_s13 = inlined_call_operand.hbm [shape: f32[1,128], index: 13, kind: input, shape index: {}]   ;;  %s8811_s14 = inlined_call_operand.hbm [shape: f32[128,128], index: 14, kind: input, shape index: {}]   ;;  %s8812_s15 = inlined_call_operand.hbm [shape: f32[1,128], index: 15, kind: input, shape index: {}]   ;;  %s8813_s16 = inlined_call_operand.hbm [shape: f32[128,128], index: 16, kind: input, shape index: {}]   ;;  %s8814_s17 = inlined_call_operand.hbm [shape: f32[1,128], index: 17, kind: input, shape index: {}]   ;;  %s8815_s18 = inlined_call_operand.hbm [shape: f32[1,128], index: 18, kind: input, shape index: {}]   ;;  %s8816_s19 = inlined_call_operand.hbm [shape: f32[1,128], index: 19, kind: input, shape index: {}]   ;;  %s8817_s20 = inlined_call_operand.hbm [shape: f32[1,128], index: 20, kind: input, shape index: {}]   ;;  %s8818_s21 = inlined_call_operand.hbm [shape: f32[1,128], index: 21, kind: input, shape index: {}]   ;;  %s8819_s22 = inlined_call_operand.hbm [shape: f32[128,256], index: 22, kind: input, shape index: {}]   ;;  %s8820_s23 = inlined_call_operand.hbm [shape: f32[1,256], index: 23, kind: input, shape index: {}]   ;;  %s8821_s24 = inlined_call_operand.hbm [shape: f32[256,128], index: 24, kind: input, shape index: {}]   ;;  %s8822_s25 = inlined_call_operand.hbm [shape: f32[1,128], index: 25, kind: input, shape index: {}]   ;;  %s8823_s26 = inlined_call_operand.hbm [shape: f32[2,8,128], index: 26, kind: output, shape index: {}]  }
   0x1   :  { %8863 = sst [smem:[#allocation66_spill]] %s8797_s0 }
   0x2   :  { %8864 = sst [smem:[#allocation67_spill]] %s8798_s1 }
   0x3   :  { %8865 = sst [smem:[#allocation68_spill]] %s8799_s2 }
   0x4   :  { %8866 = sst [smem:[#allocation69_spill]] %s8800_s3 }
   0x5   :  { %8867 = sst [smem:[#allocation70_spill]] %s8801_s4 }
   0x6   :  { %8868 = sst [smem:[#allocation71_spill]] %s8802_s5 }
   0x7   :  { %8869 = sst [smem:[#allocation72_spill]] %s8803_s6 }
   0x8   :  { %8870 = sst [smem:[#allocation73_spill]] %s8804_s7 }
   0x9   :  { %8871 = sst [smem:[#allocation74_spill]] %s8805_s8 }
   0xa   :  { %8872 = sst [smem:[#allocation75_spill]] %s8806_s9 }
   0xb   :  { %8873 = sst [smem:[#allocation76_spill]] %s8807_s10 }
   0xc   :  { %8874 = sst [smem:[#allocation77_spill]] %s8808_s11 }
   0xd   :  { %8875 = sst [smem:[#allocation78_spill]] %s8809_s12 }
   0xe   :  { %8876 = sst [smem:[#allocation79_spill]] %s8810_s13 }
   0xf   :  { %8877 = sst [smem:[#allocation80_spill]] %s8811_s14 }
  0x10   :  { %8878 = sst [smem:[#allocation81_spill]] %s8812_s15 }
  0x11   :  { %8879 = sst [smem:[#allocation82_spill]] %s8813_s16 }
  0x12   :  { %8880 = sst [smem:[#allocation83_spill]] %s8814_s17 }
  0x13   :  { %8881 = sst [smem:[#allocation84_spill]] %s8815_s18 }
  0x14   :  { %8882 = sst [smem:[#allocation85_spill]] %s8816_s19 }
  0x15   :  { %8883 = sst [smem:[#allocation86_spill]] %s8819_s22 }
  0x16   :  { %8884 = sst [smem:[#allocation87_spill]] %s8821_s24 }
  0x17   :  { %8885 = sst [smem:[#allocation88_spill]] %s8822_s25 }
  0x18   :  { %8886 = sst [smem:[#allocation89_spill]] %s8823_s26 }
  0x19   :  { %31 = vsyncpa [#allocation3], 0 }
  0x1a   :  { %33 = vsyncpa [#allocation3 + $0x1], 0 }
  0x1b   :  { %34 = vsyncpa [#allocation6], 0 }
  0x1c   :  { %36 = vsyncpa [#allocation6 + $0x1], 0 }
  0x1d   :  { %37 = vsyncpa [#allocation9], 0 }
  0x1e   :  { %38 = vsyncpa [#allocation12], 0 }
  0x1f   :  { %39 = vsyncpa [#allocation15], 0 }
  0x20   :  { %40 = vsyncpa [#allocation18], 0 }
  0x21   :  { %41 = vsyncpa [#allocation21], 0 }
  0x22   :  { %42 = vsyncpa [#allocation24], 0 }
  0x23   :  { %43 = vsyncpa [#allocation27], 0 }
  0x24   :  { %44 = vsyncpa [#allocation30], 0 }
  0x25   :  { %45 = vsyncpa [#allocation33], 0 }
  0x26   :  { %46 = vsyncpa [#allocation36], 0 }
  0x27   :  { %47 = vsyncpa [#allocation39], 0 }
  0x28   :  { %48 = vsyncpa [#allocation42], 0 }
  0x29   :  { %49 = vsyncpa [#allocation4], 0 }
  0x2a   :  { %51 = vsyncpa [#allocation4 + $0x1], 0  ;;  %s7747_s27 = smov 0   ;;  %s7749_s3 = smov 0  }
  0x2b   :  { %s7751_s7 = smov 0   ;;  %s7753_s28 = smov 0  }
  0x2c LB: > { %8887 = sst [smem:[#allocation60_spill]] %s7559_s27  ;;  %s7573_s8 = smov [#allocation7]   ;;  %s7571_s28 = sphi %s7753_s28, %s8284_s28   ;;  %s7567_s7 = sphi %s7751_s7, %s8295_s7   ;;  %s7563_s3 = sphi %s7749_s3, %s8974_s3   ;;  %s7559_s27 = sphi %s7747_s27, %s8973_s27  }
  0x2d   : > { %8888 = sst [smem:[#allocation61_spill]] %s7563_s3  ;;  %s656_s4 = sshll.u32 %s7573_s8, 4  ;;  %s7773_s4 = int_to_ptr.vmem [resolvable:$true] %s656_s4 }
  0x2e   : > { %8889 = sst [smem:[#allocation62_spill]] %s7567_s7  ;;  %s7768_s29 = sadd.s32 4294967295, %s7571_s28  }
  0x2f   : > { %8890 = sst [smem:[#allocation63_spill]] %s7571_s28  ;;  %p5158_p0 = scmp.ge.s32.totalorder %s7571_s28, 1 }
  0x30   : > { %8891 = sst [smem:[#allocation64_spill]] %s7768_s29  ;;  %p8851_p1 = scmp.eq.s32.totalorder %s7768_s29, 0 }
  0x31   : > { %p644_p2 = scmp.lt.s32.totalorder %s7571_s28, 3  ;;  %s7574_s9 = smov [#allocation8]  }
  0x32   : > { %s670_s30 = sshll.u32 %s7574_s9, 4  ;;  %s7575_s5 = smov [#allocation11]   ;;  %s7788_s30 = int_to_ptr.vmem [resolvable:$true] %s670_s30 }
  0x33   : > { %p7775_p3 = pnand %p5158_p0, %p644_p2  ;;  %s694_s10 = sshll.u32 %s7575_s5, 4  ;;  %s7790_s10 = int_to_ptr.vmem [resolvable:$true] %s694_s10 }
  0x34   : > { %s8895_s8 = sld [smem:[#allocation68_spill]] }
  0x35   : > { %s8892_s0 = scalar_select %p7775_p3, 1, 0 }
  0x36   : > { %p6394_p5 = pneg %p7775_p3 }
  0x37   : > { %8893 = sst [smem:[#allocation65_spill]] %s8892_s0 }
  0x38   : > { %p7784_p6 = pnand %p6394_p5, %p8851_p1 }
  0x3a   : > { %s6717_s26 = scalar_lea.hbm %s8895_s8, 2048  ;;  %p7800_p8 = pneg %p7784_p6 }
  0x3b   : > { %p6718_p7 = scmp.ne.s32.totalorder %s8895_s8, %s6717_s26  ;;  %p6724_p11 = scmp.lt.u32.totalorder %s6717_s26, %s8895_s8 }
  0x3d   : > { %p6720_p9 = pnand %p7800_p8, %p6718_p7 }
  0x3f   : > { %p6721_p10 = pneg %p6720_p9 }
  0x41   : > { %p6726_p12 = pnand %p6724_p11, %p6721_p10 }
  0x43   : > { %6729 = shalt.err (!%p6726_p12)
}
  0x44   : > { %s6730_s27 = scalar_lea.vmem %s7773_s4, 2048  ;;  %p6738_p5 = scmp.lt.s32.totalorder %s7773_s4, %s7773_s4 }
  0x45   : > { %p6731_p13 = scmp.ne.s32.totalorder %s7773_s4, %s6730_s27  ;;  %p6739_p4 = scmp.lt.s32.totalorder %s6730_s27, %s6730_s27 }
  0x47   : > { %p6733_p0 = pnand %p6731_p13, %p7800_p8  ;;  %p6740_p7 = por %p6739_p4, %p6738_p5 }
  0x49   : > { %p6734_p2 = pneg %p6733_p0 }
  0x4b   : > { %p6741_p9 = pnand %p6740_p7, %p6734_p2 }
  0x4d   : > { %6744 = shalt.err (!%p6741_p9)
}
  0x4e   : > { %s8847_s0 = smov 128   ;;  %s8849_s26 = smov 8  }
  0x4f   : > { %6397 = dma.hbm_to_vmem [thread:$0]  (!%p7784_p6), %s8895_s8, 2048, %s7773_s4, [#allocation6], %s8847_s0, %s8847_s0, %s8849_s26  }
  0x50   : > { %s8897_s3 = sld [smem:[#allocation69_spill]] }
  0x56   : > { %s8898_s25 = smov %s8897_s3  ;;  %s6745_s27 = scalar_lea.hbm %s8897_s3, 16 }
  0x57   : > { %p6746_p4 = scmp.ne.s32.totalorder %s8898_s25, %s6745_s27  ;;  %p6752_p12 = scmp.lt.u32.totalorder %s6745_s27, %s8898_s25 }
  0x59   : > { %p6748_p10 = pnand %p6746_p4, %p7800_p8 }
  0x5b   : > { %p6749_p11 = pneg %p6748_p10 }
  0x5d   : > { %p6754_p13 = pnand %p6752_p12, %p6749_p11 }
  0x5f   : > { %6757 = shalt.err (!%p6754_p13)
}
  0x60   : > { %s6758_s4 = scalar_lea.vmem %s7788_s30, 16  ;;  %s6765_s3 = scalar_lea.vmem %s7788_s30, 32 }
  0x61   : > { %p6759_p0 = scmp.ne.s32.totalorder %s7788_s30, %s6758_s4  ;;  %p6766_p7 = scmp.lt.s32.totalorder %s7788_s30, %s7788_s30 }
  0x62   : > { %p6767_p9 = scmp.lt.s32.totalorder %s6765_s3, %s6758_s4 }
  0x63   : > { %p6761_p2 = pnand %p6759_p0, %p7800_p8 }
  0x64   : > { %p6768_p4 = por %p6767_p9, %p6766_p7 }
  0x65   : > { %p6762_p5 = pneg %p6761_p2 }
  0x67   : > { %p6769_p10 = pnand %p6768_p4, %p6762_p5 }
  0x69   : > { %6772 = shalt.err (!%p6769_p10)
}
  0x6a   : > { %6400 = dma.hbm_to_vmem [thread:$0]  (!%p7784_p6), %s8898_s25, 16, %s7788_s30, [#allocation9]  }
  0x6b   : > { %s8899_s29 = sld [smem:[#allocation71_spill]] }
  0x71   : > { %s6773_s6 = scalar_lea.hbm %s8899_s29, 16 }
  0x72   : > { %p6774_p11 = scmp.ne.s32.totalorder %s8899_s29, %s6773_s6  ;;  %p6780_p0 = scmp.lt.u32.totalorder %s6773_s6, %s8899_s29 }
  0x74   : > { %p6776_p12 = pnand %p6774_p11, %p7800_p8 }
  0x76   : > { %p6777_p13 = pneg %p6776_p12 }
  0x78   : > { %p6782_p2 = pnand %p6780_p0, %p6777_p13 }
  0x7a   : > { %6785 = shalt.err (!%p6782_p2)
}
  0x7b   : > { %s6786_s30 = scalar_lea.vmem %s7790_s10, 16  ;;  %s6793_s3 = scalar_lea.vmem %s7790_s10, 32 }
  0x7c   : > { %p6787_p5 = scmp.ne.s32.totalorder %s7790_s10, %s6786_s30  ;;  %p6794_p4 = scmp.lt.s32.totalorder %s7790_s10, %s7790_s10 }
  0x7d   : > { %p6795_p10 = scmp.lt.s32.totalorder %s6793_s3, %s6786_s30 }
  0x7e   : > { %p6789_p7 = pnand %p6787_p5, %p7800_p8 }
  0x7f   : > { %p6796_p11 = por %p6795_p10, %p6794_p4 }
  0x80   : > { %p6790_p9 = pneg %p6789_p7 }
  0x82   : > { %p6797_p12 = pnand %p6796_p11, %p6790_p9 }
  0x84   : > { %6800 = shalt.err (!%p6797_p12)
}
  0x85   : > { %6406 = dma.hbm_to_vmem [thread:$0]  (!%p7784_p6), %s8899_s29, 16, %s7790_s10, [#allocation12]  }
  0x86   : > { %s7578_s7 = smov [#allocation14]   ;;  %s7579_s6 = smov [#allocation17]  }
  0x87   : > { %s718_s28 = sshll.u32 %s7578_s7, 4  ;;  %s742_s1 = sshll.u32 %s7579_s6, 4  ;;  %s719_s28 = int_to_ptr.vmem [resolvable:$true] %s718_s28  ;;  %s743_s1 = int_to_ptr.vmem [resolvable:$true] %s742_s1 }
  0x88   : > { %s8900_s4 = sld [smem:[#allocation73_spill]] }
  0x8e   : > { %s6801_s30 = scalar_lea.hbm %s8900_s4, 16 }
  0x8f   : > { %p6802_p13 = scmp.ne.s32.totalorder %s8900_s4, %s6801_s30  ;;  %p6808_p5 = scmp.lt.u32.totalorder %s6801_s30, %s8900_s4 }
  0x91   : > { %p6804_p0 = pnand %p6802_p13, %p7800_p8 }
  0x93   : > { %p6805_p2 = pneg %p6804_p0 }
  0x95   : > { %p6810_p7 = pnand %p6808_p5, %p6805_p2 }
  0x97   : > { %6813 = shalt.err (!%p6810_p7)
}
  0x98   : > { %s6814_s10 = scalar_lea.vmem %s719_s28, 16  ;;  %s6821_s24 = scalar_lea.vmem %s719_s28, 32 }
  0x99   : > { %p6815_p9 = scmp.ne.s32.totalorder %s719_s28, %s6814_s10  ;;  %p6822_p11 = scmp.lt.s32.totalorder %s719_s28, %s719_s28 }
  0x9a   : > { %p6823_p12 = scmp.lt.s32.totalorder %s6821_s24, %s6814_s10 }
  0x9b   : > { %p6817_p4 = pnand %p6815_p9, %p7800_p8 }
  0x9c   : > { %p6824_p1 = por %p6823_p12, %p6822_p11 }
  0x9d   : > { %p6818_p10 = pneg %p6817_p4 }
  0x9f   : > { %p6825_p3 = pnand %p6824_p1, %p6818_p10 }
  0xa1   : > { %6828 = shalt.err (!%p6825_p3)
}
  0xa2   : > { %6412 = dma.hbm_to_vmem [thread:$0]  (!%p7784_p6), %s8900_s4, 16, %s719_s28, [#allocation15]  }
  0xa3   : > { %s8901_s5 = sld [smem:[#allocation75_spill]] }
  0xa9   : > { %s6829_s27 = scalar_lea.hbm %s8901_s5, 16 }
  0xaa   : > { %p6830_p13 = scmp.ne.s32.totalorder %s8901_s5, %s6829_s27  ;;  %p6836_p3 = scmp.lt.u32.totalorder %s6829_s27, %s8901_s5 }
  0xac   : > { %p6832_p0 = pnand %p6830_p13, %p7800_p8 }
  0xae   : > { %p6833_p1 = pneg %p6832_p0 }
  0xb0   : > { %p6838_p2 = pnand %p6836_p3, %p6833_p1 }
  0xb2   : > { %6841 = shalt.err (!%p6838_p2)
}
  0xb3   : > { %s6842_s24 = scalar_lea.vmem %s743_s1, 16  ;;  %s6849_s28 = scalar_lea.vmem %s743_s1, 32 }
  0xb4   : > { %p6843_p5 = scmp.ne.s32.totalorder %s743_s1, %s6842_s24  ;;  %p6850_p4 = scmp.lt.s32.totalorder %s743_s1, %s743_s1 }
  0xb5   : > { %p6851_p10 = scmp.lt.s32.totalorder %s6849_s28, %s6842_s24 }
  0xb6   : > { %p6845_p7 = pnand %p6843_p5, %p7800_p8 }
  0xb7   : > { %p6852_p11 = por %p6851_p10, %p6850_p4 }
  0xb8   : > { %p6846_p9 = pneg %p6845_p7 }
  0xba   : > { %p6853_p12 = pnand %p6852_p11, %p6846_p9 }
  0xbc   : > { %6856 = shalt.err (!%p6853_p12)
}
  0xbd   : > { %6418 = dma.hbm_to_vmem [thread:$0]  (!%p7784_p6), %s8901_s5, 16, %s743_s1, [#allocation18]  }
  0xbe   : > { %s7580_s26 = smov [#allocation20]   ;;  %s7581_s27 = smov [#allocation23]  }
  0xbf   : > { %s766_s6 = sshll.u32 %s7580_s26, 4  ;;  %s790_s30 = sshll.u32 %s7581_s27, 4  ;;  %s767_s6 = int_to_ptr.vmem [resolvable:$true] %s766_s6  ;;  %s791_s30 = int_to_ptr.vmem [resolvable:$true] %s790_s30 }
  0xc0   : > { %s8902_s11 = sld [smem:[#allocation77_spill]] }
  0xc6   : > { %s6857_s10 = scalar_lea.hbm %s8902_s11, 16 }
  0xc7   : > { %p6858_p13 = scmp.ne.s32.totalorder %s8902_s11, %s6857_s10  ;;  %p6864_p3 = scmp.lt.u32.totalorder %s6857_s10, %s8902_s11 }
  0xc9   : > { %p6860_p0 = pnand %p6858_p13, %p7800_p8 }
  0xcb   : > { %p6861_p1 = pneg %p6860_p0 }
  0xcd   : > { %p6866_p2 = pnand %p6864_p3, %p6861_p1 }
  0xcf   : > { %6869 = shalt.err (!%p6866_p2)
}
  0xd0   : > { %s6870_s1 = scalar_lea.vmem %s767_s6, 16  ;;  %s6877_s7 = scalar_lea.vmem %s767_s6, 32 }
  0xd1   : > { %p6871_p5 = scmp.ne.s32.totalorder %s767_s6, %s6870_s1  ;;  %p6878_p4 = scmp.lt.s32.totalorder %s767_s6, %s767_s6 }
  0xd2   : > { %p6879_p10 = scmp.lt.s32.totalorder %s6877_s7, %s6870_s1 }
  0xd3   : > { %p6873_p7 = pnand %p6871_p5, %p7800_p8 }
  0xd4   : > { %p6880_p11 = por %p6879_p10, %p6878_p4 }
  0xd5   : > { %p6874_p9 = pneg %p6873_p7 }
  0xd7   : > { %p6881_p12 = pnand %p6880_p11, %p6874_p9 }
  0xd9   : > { %6884 = shalt.err (!%p6881_p12)
}
  0xda   : > { %6424 = dma.hbm_to_vmem [thread:$0]  (!%p7784_p6), %s8902_s11, 16, %s767_s6, [#allocation21]  }
  0xdb   : > { %s8903_s13 = sld [smem:[#allocation79_spill]] }
  0xe1   : > { %s6885_s22 = scalar_lea.hbm %s8903_s13, 16 }
  0xe2   : > { %p6886_p13 = scmp.ne.s32.totalorder %s8903_s13, %s6885_s22  ;;  %p6892_p3 = scmp.lt.u32.totalorder %s6885_s22, %s8903_s13 }
  0xe4   : > { %p6888_p0 = pnand %p6886_p13, %p7800_p8 }
  0xe6   : > { %p6889_p1 = pneg %p6888_p0 }
  0xe8   : > { %p6894_p2 = pnand %p6892_p3, %p6889_p1 }
  0xea   : > { %6897 = shalt.err (!%p6894_p2)
}
  0xeb   : > { %s6898_s1 = scalar_lea.vmem %s791_s30, 16  ;;  %s6905_s6 = scalar_lea.vmem %s791_s30, 32 }
  0xec   : > { %p6899_p5 = scmp.ne.s32.totalorder %s791_s30, %s6898_s1  ;;  %p6906_p4 = scmp.lt.s32.totalorder %s791_s30, %s791_s30 }
  0xed   : > { %p6907_p10 = scmp.lt.s32.totalorder %s6905_s6, %s6898_s1 }
  0xee   : > { %p6901_p7 = pnand %p6899_p5, %p7800_p8 }
  0xef   : > { %p6908_p11 = por %p6907_p10, %p6906_p4 }
  0xf0   : > { %p6902_p9 = pneg %p6901_p7 }
  0xf2   : > { %p6909_p12 = pnand %p6908_p11, %p6902_p9 }
  0xf4   : > { %6912 = shalt.err (!%p6909_p12)
}
  0xf5   : > { %6430 = dma.hbm_to_vmem [thread:$0]  (!%p7784_p6), %s8903_s13, 16, %s791_s30, [#allocation24]  }
  0xf6   : > { %s7582_s27 = smov [#allocation26]   ;;  %s7583_s3 = smov [#allocation29]  }
  0xf7   : > { %s814_s4 = sshll.u32 %s7582_s27, 4  ;;  %s838_s22 = sshll.u32 %s7583_s3, 4  ;;  %s815_s4 = int_to_ptr.vmem [resolvable:$true] %s814_s4  ;;  %s839_s22 = int_to_ptr.vmem [resolvable:$true] %s838_s22 }
  0xf8   : > { %s8904_s15 = sld [smem:[#allocation81_spill]] }
  0xfe   : > { %s6913_s28 = scalar_lea.hbm %s8904_s15, 16 }
  0xff   : > { %p6914_p13 = scmp.ne.s32.totalorder %s8904_s15, %s6913_s28  ;;  %p6920_p3 = scmp.lt.u32.totalorder %s6913_s28, %s8904_s15 }
 0x101   : > { %p6916_p0 = pnand %p6914_p13, %p7800_p8 }
 0x103   : > { %p6917_p1 = pneg %p6916_p0 }
 0x105   : > { %p6922_p2 = pnand %p6920_p3, %p6917_p1 }
 0x107   : > { %6925 = shalt.err (!%p6922_p2)
}
 0x108   : > { %s6926_s30 = scalar_lea.vmem %s815_s4, 16  ;;  %s6933_s26 = scalar_lea.vmem %s815_s4, 32 }
 0x109   : > { %p6927_p5 = scmp.ne.s32.totalorder %s815_s4, %s6926_s30  ;;  %p6934_p4 = scmp.lt.s32.totalorder %s815_s4, %s815_s4 }
 0x10a   : > { %p6935_p10 = scmp.lt.s32.totalorder %s6933_s26, %s6926_s30 }
 0x10b   : > { %p6929_p7 = pnand %p6927_p5, %p7800_p8 }
 0x10c   : > { %p6936_p11 = por %p6935_p10, %p6934_p4 }
 0x10d   : > { %p6930_p9 = pneg %p6929_p7 }
 0x10f   : > { %p6937_p12 = pnand %p6936_p11, %p6930_p9 }
 0x111   : > { %6940 = shalt.err (!%p6937_p12)
}
 0x112   : > { %6436 = dma.hbm_to_vmem [thread:$0]  (!%p7784_p6), %s8904_s15, 16, %s815_s4, [#allocation27]  }
 0x113   : > { %s8905_s17 = sld [smem:[#allocation83_spill]] }
 0x119   : > { %s6941_s28 = scalar_lea.hbm %s8905_s17, 16 }
 0x11a   : > { %p6942_p13 = scmp.ne.s32.totalorder %s8905_s17, %s6941_s28  ;;  %p6948_p3 = scmp.lt.u32.totalorder %s6941_s28, %s8905_s17 }
 0x11c   : > { %p6944_p0 = pnand %p6942_p13, %p7800_p8 }
 0x11e   : > { %p6945_p1 = pneg %p6944_p0 }
 0x120   : > { %p6950_p2 = pnand %p6948_p3, %p6945_p1 }
 0x122   : > { %6953 = shalt.err (!%p6950_p2)
}
 0x123   : > { %s6954_s30 = scalar_lea.vmem %s839_s22, 16  ;;  %s6961_s4 = scalar_lea.vmem %s839_s22, 32 }
 0x124   : > { %p6955_p5 = scmp.ne.s32.totalorder %s839_s22, %s6954_s30  ;;  %p6962_p4 = scmp.lt.s32.totalorder %s839_s22, %s839_s22 }
 0x125   : > { %p6963_p10 = scmp.lt.s32.totalorder %s6961_s4, %s6954_s30 }
 0x126   : > { %p6957_p7 = pnand %p6955_p5, %p7800_p8 }
 0x127   : > { %p6964_p11 = por %p6963_p10, %p6962_p4 }
 0x128   : > { %p6958_p9 = pneg %p6957_p7 }
 0x12a   : > { %p6965_p12 = pnand %p6964_p11, %p6958_p9 }
 0x12c   : > { %6968 = shalt.err (!%p6965_p12)
}
 0x12d   : > { %6442 = dma.hbm_to_vmem [thread:$0]  (!%p7784_p6), %s8905_s17, 16, %s839_s22, [#allocation30]  }
 0x12e   : > { %s7584_s3 = smov [#allocation32]   ;;  %s7585_s24 = smov [#allocation35]  }
 0x12f   : > { %s860_s10 = sshll.u32 %s7584_s3, 4  ;;  %s882_s28 = sshll.u32 %s7585_s24, 4  ;;  %s861_s10 = int_to_ptr.vmem [resolvable:$true] %s860_s10  ;;  %s883_s28 = int_to_ptr.vmem [resolvable:$true] %s882_s28 }
 0x130   : > { %s8906_s19 = sld [smem:[#allocation85_spill]] }
 0x136   : > { %s6969_s6 = scalar_lea.hbm %s8906_s19, 16 }
 0x137   : > { %p6970_p13 = scmp.ne.s32.totalorder %s8906_s19, %s6969_s6  ;;  %p6976_p3 = scmp.lt.u32.totalorder %s6969_s6, %s8906_s19 }
 0x139   : > { %p6972_p0 = pnand %p6970_p13, %p7800_p8 }
 0x13b   : > { %p6973_p1 = pneg %p6972_p0 }
 0x13d   : > { %p6978_p2 = pnand %p6976_p3, %p6973_p1 }
 0x13f   : > { %6981 = shalt.err (!%p6978_p2)
}
 0x140   : > { %s6982_s22 = scalar_lea.vmem %s861_s10, 16  ;;  %s6989_s27 = scalar_lea.vmem %s861_s10, 32 }
 0x141   : > { %p6983_p5 = scmp.ne.s32.totalorder %s861_s10, %s6982_s22  ;;  %p6990_p4 = scmp.lt.s32.totalorder %s861_s10, %s861_s10 }
 0x142   : > { %p6991_p10 = scmp.lt.s32.totalorder %s6989_s27, %s6982_s22 }
 0x143   : > { %p6985_p7 = pnand %p6983_p5, %p7800_p8 }
 0x144   : > { %p6992_p11 = por %p6991_p10, %p6990_p4 }
 0x145   : > { %p6986_p9 = pneg %p6985_p7 }
 0x147   : > { %p6993_p12 = pnand %p6992_p11, %p6986_p9 }
 0x149   : > { %6996 = shalt.err (!%p6993_p12)
}
 0x14a   : > { %6448 = dma.hbm_to_vmem [thread:$0]  (!%p7784_p6), %s8906_s19, 16, %s861_s10, [#allocation33]  }
 0x14b   : > { %s6997_s6 = scalar_lea.hbm %s8818_s21, 16 }
 0x14c   : > { %p6998_p13 = scmp.ne.s32.totalorder %s8818_s21, %s6997_s6  ;;  %p7004_p3 = scmp.lt.u32.totalorder %s6997_s6, %s8818_s21 }
 0x14e   : > { %p7000_p0 = pnand %p6998_p13, %p7800_p8 }
 0x150   : > { %p7001_p1 = pneg %p7000_p0 }
 0x152   : > { %p7006_p2 = pnand %p7004_p3, %p7001_p1 }
 0x154   : > { %7009 = shalt.err (!%p7006_p2)
}
 0x155   : > { %s7010_s22 = scalar_lea.vmem %s883_s28, 16  ;;  %s7017_s10 = scalar_lea.vmem %s883_s28, 32 }
 0x156   : > { %p7011_p5 = scmp.ne.s32.totalorder %s883_s28, %s7010_s22  ;;  %p7018_p4 = scmp.lt.s32.totalorder %s883_s28, %s883_s28 }
 0x157   : > { %p7019_p10 = scmp.lt.s32.totalorder %s7017_s10, %s7010_s22 }
 0x158   : > { %p7013_p7 = pnand %p7011_p5, %p7800_p8 }
 0x159   : > { %p7020_p11 = por %p7019_p10, %p7018_p4 }
 0x15a   : > { %p7014_p9 = pneg %p7013_p7 }
 0x15c   : > { %p7021_p12 = pnand %p7020_p11, %p7014_p9 }
 0x15e   : > { %7024 = shalt.err (!%p7021_p12)
}
 0x15f   : > { %6454 = dma.hbm_to_vmem [thread:$0]  (!%p7784_p6), %s8818_s21, 16, %s883_s28, [#allocation36]  }
 0x160   : > { %s7586_s24 = smov [#allocation38]   ;;  %s7587_s1 = smov [#allocation10]  }
 0x161   : > { %s906_s0 = sshll.u32 %s7586_s24, 4  ;;  %s680_s6 = sshll.u32 %s7587_s1, 4  ;;  %s907_s0 = int_to_ptr.vmem [resolvable:$true] %s906_s0  ;;  %s681_s6 = int_to_ptr.vmem [resolvable:$true] %s680_s6 }
 0x162   : > { %s7025_s4 = scalar_lea.hbm %s8820_s23, 32 }
 0x163   : > { %p7026_p13 = scmp.ne.s32.totalorder %s8820_s23, %s7025_s4  ;;  %p7032_p3 = scmp.lt.u32.totalorder %s7025_s4, %s8820_s23 }
 0x165   : > { %p7028_p0 = pnand %p7026_p13, %p7800_p8 }
 0x167   : > { %p7029_p1 = pneg %p7028_p0 }
 0x169   : > { %p7034_p2 = pnand %p7032_p3, %p7029_p1 }
 0x16b   : > { %7037 = shalt.err (!%p7034_p2)
}
 0x16c   : > { %s7038_s28 = scalar_lea.vmem %s907_s0, 32  ;;  %p7046_p4 = scmp.lt.s32.totalorder %s907_s0, %s907_s0 }
 0x16d   : > { %p7039_p5 = scmp.ne.s32.totalorder %s907_s0, %s7038_s28  ;;  %p7047_p10 = scmp.lt.s32.totalorder %s7038_s28, %s7038_s28 }
 0x16f   : > { %p7041_p7 = pnand %p7039_p5, %p7800_p8  ;;  %p7048_p11 = por %p7047_p10, %p7046_p4 }
 0x171   : > { %p7042_p9 = pneg %p7041_p7 }
 0x173   : > { %p7049_p12 = pnand %p7048_p11, %p7042_p9 }
 0x175   : > { %7052 = shalt.err (!%p7049_p12)
}
 0x176   : > { %6460 = dma.hbm_to_vmem [thread:$0]  (!%p7784_p6), %s8820_s23, 32, %s907_s0, [#allocation39]  }
 0x177   : > { %s8907_s30 = sld [smem:[#allocation70_spill]] }
 0x17d   : > { %s7053_s4 = scalar_lea.hbm %s8907_s30, 2048 }
 0x17e   : > { %p7054_p13 = scmp.ne.s32.totalorder %s8907_s30, %s7053_s4  ;;  %p7060_p3 = scmp.lt.u32.totalorder %s7053_s4, %s8907_s30 }
 0x180   : > { %p7056_p0 = pnand %p7054_p13, %p7800_p8 }
 0x182   : > { %p7057_p1 = pneg %p7056_p0 }
 0x184   : > { %p7062_p2 = pnand %p7060_p3, %p7057_p1 }
 0x186   : > { %7065 = shalt.err (!%p7062_p2)
}
 0x187   : > { %s7066_s28 = scalar_lea.vmem %s681_s6, 2048  ;;  %p7074_p4 = scmp.lt.s32.totalorder %s681_s6, %s681_s6 }
 0x188   : > { %p7067_p5 = scmp.ne.s32.totalorder %s681_s6, %s7066_s28  ;;  %p7075_p10 = scmp.lt.s32.totalorder %s7066_s28, %s7066_s28 }
 0x18a   : > { %p7069_p7 = pnand %p7067_p5, %p7800_p8  ;;  %p7076_p11 = por %p7075_p10, %p7074_p4 }
 0x18c   : > { %p7070_p9 = pneg %p7069_p7 }
 0x18e   : > { %p7077_p12 = pnand %p7076_p11, %p7070_p9 }
 0x190   : > { %7080 = shalt.err (!%p7077_p12)
}
 0x191   : > { %s8908_s0 = smov 8   ;;  %s8909_s3 = smov 128  }
 0x192   : > { %6403 = dma.hbm_to_vmem [thread:$0]  (!%p7784_p6), %s8907_s30, 2048, %s681_s6, [#allocation9], %s8909_s3, %s8909_s3, %s8908_s0  }
 0x193   : > { %s7588_s7 = smov [#allocation13]   ;;  %s7589_s26 = smov [#allocation16]  }
 0x194   : > { %s704_s4 = sshll.u32 %s7588_s7, 4  ;;  %s728_s22 = sshll.u32 %s7589_s26, 4  ;;  %s705_s4 = int_to_ptr.vmem [resolvable:$true] %s704_s4  ;;  %s729_s22 = int_to_ptr.vmem [resolvable:$true] %s728_s22 }
 0x195   : > { %s8910_s28 = sld [smem:[#allocation72_spill]] }
 0x19b   : > { %s8911_s5 = smov %s8910_s28  ;;  %s7081_s8 = scalar_lea.hbm %s8910_s28, 2048 }
 0x19c   : > { %p7082_p13 = scmp.ne.s32.totalorder %s8911_s5, %s7081_s8  ;;  %p7088_p3 = scmp.lt.u32.totalorder %s7081_s8, %s8911_s5 }
 0x19e   : > { %p7084_p0 = pnand %p7082_p13, %p7800_p8 }
 0x1a0   : > { %p7085_p1 = pneg %p7084_p0 }
 0x1a2   : > { %p7090_p2 = pnand %p7088_p3, %p7085_p1 }
 0x1a4   : > { %7093 = shalt.err (!%p7090_p2)
}
 0x1a5   : > { %s7094_s6 = scalar_lea.vmem %s705_s4, 2048  ;;  %p7102_p4 = scmp.lt.s32.totalorder %s705_s4, %s705_s4 }
 0x1a6   : > { %p7095_p5 = scmp.ne.s32.totalorder %s705_s4, %s7094_s6  ;;  %p7103_p10 = scmp.lt.s32.totalorder %s7094_s6, %s7094_s6 }
 0x1a8   : > { %p7097_p7 = pnand %p7095_p5, %p7800_p8  ;;  %p7104_p11 = por %p7103_p10, %p7102_p4 }
 0x1aa   : > { %p7098_p9 = pneg %p7097_p7 }
 0x1ac   : > { %p7105_p12 = pnand %p7104_p11, %p7098_p9 }
 0x1ae   : > { %7108 = shalt.err (!%p7105_p12)
}
 0x1af   : > { %6409 = dma.hbm_to_vmem [thread:$0]  (!%p7784_p6), %s8911_s5, 2048, %s705_s4, [#allocation12], %s8909_s3, %s8909_s3, %s8908_s0  }
 0x1b0   : > { %s8912_s1 = sld [smem:[#allocation74_spill]] }
 0x1b6   : > { %s7109_s7 = scalar_lea.hbm %s8912_s1, 2048 }
 0x1b7   : > { %p7110_p13 = scmp.ne.s32.totalorder %s8912_s1, %s7109_s7  ;;  %p7116_p3 = scmp.lt.u32.totalorder %s7109_s7, %s8912_s1 }
 0x1b9   : > { %p7112_p0 = pnand %p7110_p13, %p7800_p8 }
 0x1bb   : > { %p7113_p1 = pneg %p7112_p0 }
 0x1bd   : > { %p7118_p2 = pnand %p7116_p3, %p7113_p1 }
 0x1bf   : > { %7121 = shalt.err (!%p7118_p2)
}
 0x1c0   : > { %s7122_s24 = scalar_lea.vmem %s729_s22, 2048  ;;  %p7130_p4 = scmp.lt.s32.totalorder %s729_s22, %s729_s22 }
 0x1c1   : > { %p7123_p5 = scmp.ne.s32.totalorder %s729_s22, %s7122_s24  ;;  %p7131_p10 = scmp.lt.s32.totalorder %s7122_s24, %s7122_s24 }
 0x1c3   : > { %p7125_p7 = pnand %p7123_p5, %p7800_p8  ;;  %p7132_p11 = por %p7131_p10, %p7130_p4 }
 0x1c5   : > { %p7126_p9 = pneg %p7125_p7 }
 0x1c7   : > { %p7133_p12 = pnand %p7132_p11, %p7126_p9 }
 0x1c9   : > { %7136 = shalt.err (!%p7133_p12)
}
 0x1ca   : > { %6415 = dma.hbm_to_vmem [thread:$0]  (!%p7784_p6), %s8912_s1, 2048, %s729_s22, [#allocation15], %s8909_s3, %s8909_s3, %s8908_s0  }
 0x1cb   : > { %s7590_s11 = smov [#allocation19]   ;;  %s7591_s15 = smov [#allocation22]  }
 0x1cc   : > { %s752_s13 = sshll.u32 %s7590_s11, 4  ;;  %s776_s8 = sshll.u32 %s7591_s15, 4  ;;  %s753_s13 = int_to_ptr.vmem [resolvable:$true] %s752_s13  ;;  %s777_s8 = int_to_ptr.vmem [resolvable:$true] %s776_s8 }
 0x1cd   : > { %s8913_s10 = sld [smem:[#allocation76_spill]] }
 0x1d3   : > { %s7137_s27 = scalar_lea.hbm %s8913_s10, 2048 }
 0x1d4   : > { %p7138_p13 = scmp.ne.s32.totalorder %s8913_s10, %s7137_s27  ;;  %p7144_p3 = scmp.lt.u32.totalorder %s7137_s27, %s8913_s10 }
 0x1d6   : > { %p7140_p0 = pnand %p7138_p13, %p7800_p8 }
 0x1d8   : > { %p7141_p1 = pneg %p7140_p0 }
 0x1da   : > { %p7146_p2 = pnand %p7144_p3, %p7141_p1 }
 0x1dc   : > { %7149 = shalt.err (!%p7146_p2)
}
 0x1dd   : > { %s7150_s22 = scalar_lea.vmem %s753_s13, 2048  ;;  %p7158_p4 = scmp.lt.s32.totalorder %s753_s13, %s753_s13 }
 0x1de   : > { %p7151_p5 = scmp.ne.s32.totalorder %s753_s13, %s7150_s22  ;;  %p7159_p10 = scmp.lt.s32.totalorder %s7150_s22, %s7150_s22 }
 0x1e0   : > { %p7153_p7 = pnand %p7151_p5, %p7800_p8  ;;  %p7160_p11 = por %p7159_p10, %p7158_p4 }
 0x1e2   : > { %p7154_p9 = pneg %p7153_p7 }
 0x1e4   : > { %p7161_p12 = pnand %p7160_p11, %p7154_p9 }
 0x1e6   : > { %7164 = shalt.err (!%p7161_p12)
}
 0x1e7   : > { %6421 = dma.hbm_to_vmem [thread:$0]  (!%p7784_p6), %s8913_s10, 2048, %s753_s13, [#allocation18], %s8909_s3, %s8909_s3, %s8908_s0  }
 0x1e8   : > { %s8914_s12 = sld [smem:[#allocation78_spill]] }
 0x1ee   : > { %s7165_s7 = scalar_lea.hbm %s8914_s12, 2048 }
 0x1ef   : > { %p7166_p13 = scmp.ne.s32.totalorder %s8914_s12, %s7165_s7  ;;  %p7172_p3 = scmp.lt.u32.totalorder %s7165_s7, %s8914_s12 }
 0x1f1   : > { %p7168_p0 = pnand %p7166_p13, %p7800_p8 }
 0x1f3   : > { %p7169_p1 = pneg %p7168_p0 }
 0x1f5   : > { %p7174_p2 = pnand %p7172_p3, %p7169_p1 }
 0x1f7   : > { %7177 = shalt.err (!%p7174_p2)
}
 0x1f8   : > { %s7178_s4 = scalar_lea.vmem %s777_s8, 2048  ;;  %p7186_p4 = scmp.lt.s32.totalorder %s777_s8, %s777_s8 }
 0x1f9   : > { %p7179_p5 = scmp.ne.s32.totalorder %s777_s8, %s7178_s4  ;;  %p7187_p10 = scmp.lt.s32.totalorder %s7178_s4, %s7178_s4 }
 0x1fb   : > { %p7181_p7 = pnand %p7179_p5, %p7800_p8  ;;  %p7188_p11 = por %p7187_p10, %p7186_p4 }
 0x1fd   : > { %p7182_p9 = pneg %p7181_p7 }
 0x1ff   : > { %p7189_p12 = pnand %p7188_p11, %p7182_p9 }
 0x201   : > { %7192 = shalt.err (!%p7189_p12)
}
 0x202   : > { %6427 = dma.hbm_to_vmem [thread:$0]  (!%p7784_p6), %s8914_s12, 2048, %s777_s8, [#allocation21], %s8909_s3, %s8909_s3, %s8908_s0  }
 0x203   : > { %s7592_s5 = smov [#allocation25]   ;;  %s7593_s11 = smov [#allocation28]  }
 0x204   : > { %s800_s6 = sshll.u32 %s7592_s5, 4  ;;  %s824_s15 = sshll.u32 %s7593_s11, 4  ;;  %s801_s6 = int_to_ptr.vmem [resolvable:$true] %s800_s6  ;;  %s825_s15 = int_to_ptr.vmem [resolvable:$true] %s824_s15 }
 0x205   : > { %s8915_s14 = sld [smem:[#allocation80_spill]] }
 0x20b   : > { %s7193_s27 = scalar_lea.hbm %s8915_s14, 2048 }
 0x20c   : > { %p7194_p13 = scmp.ne.s32.totalorder %s8915_s14, %s7193_s27  ;;  %p7200_p3 = scmp.lt.u32.totalorder %s7193_s27, %s8915_s14 }
 0x20e   : > { %p7196_p0 = pnand %p7194_p13, %p7800_p8 }
 0x210   : > { %p7197_p1 = pneg %p7196_p0 }
 0x212   : > { %p7202_p2 = pnand %p7200_p3, %p7197_p1 }
 0x214   : > { %7205 = shalt.err (!%p7202_p2)
}
 0x215   : > { %s7206_s8 = scalar_lea.vmem %s801_s6, 2048  ;;  %p7214_p4 = scmp.lt.s32.totalorder %s801_s6, %s801_s6 }
 0x216   : > { %p7207_p5 = scmp.ne.s32.totalorder %s801_s6, %s7206_s8  ;;  %p7215_p10 = scmp.lt.s32.totalorder %s7206_s8, %s7206_s8 }
 0x218   : > { %p7209_p7 = pnand %p7207_p5, %p7800_p8  ;;  %p7216_p11 = por %p7215_p10, %p7214_p4 }
 0x21a   : > { %p7210_p9 = pneg %p7209_p7 }
 0x21c   : > { %p7217_p12 = pnand %p7216_p11, %p7210_p9 }
 0x21e   : > { %7220 = shalt.err (!%p7217_p12)
}
 0x21f   : > { %6433 = dma.hbm_to_vmem [thread:$0]  (!%p7784_p6), %s8915_s14, 2048, %s801_s6, [#allocation24], %s8909_s3, %s8909_s3, %s8908_s0  }
 0x220   : > { %s8916_s16 = sld [smem:[#allocation82_spill]] }
 0x226   : > { %s7221_s26 = scalar_lea.hbm %s8916_s16, 2048 }
 0x227   : > { %p7222_p13 = scmp.ne.s32.totalorder %s8916_s16, %s7221_s26  ;;  %p7228_p3 = scmp.lt.u32.totalorder %s7221_s26, %s8916_s16 }
 0x229   : > { %p7224_p0 = pnand %p7222_p13, %p7800_p8 }
 0x22b   : > { %p7225_p1 = pneg %p7224_p0 }
 0x22d   : > { %p7230_p2 = pnand %p7228_p3, %p7225_p1 }
 0x22f   : > { %7233 = shalt.err (!%p7230_p2)
}
 0x230   : > { %s7234_s13 = scalar_lea.vmem %s825_s15, 2048  ;;  %p7242_p4 = scmp.lt.s32.totalorder %s825_s15, %s825_s15 }
 0x231   : > { %p7235_p5 = scmp.ne.s32.totalorder %s825_s15, %s7234_s13  ;;  %p7243_p10 = scmp.lt.s32.totalorder %s7234_s13, %s7234_s13 }
 0x233   : > { %p7237_p7 = pnand %p7235_p5, %p7800_p8  ;;  %p7244_p11 = por %p7243_p10, %p7242_p4 }
 0x235   : > { %p7238_p9 = pneg %p7237_p7 }
 0x237   : > { %p7245_p12 = pnand %p7244_p11, %p7238_p9 }
 0x239   : > { %7248 = shalt.err (!%p7245_p12)
}
 0x23a   : > { %6439 = dma.hbm_to_vmem [thread:$0]  (!%p7784_p6), %s8916_s16, 2048, %s825_s15, [#allocation27], %s8909_s3, %s8909_s3, %s8908_s0  }
 0x23b   : > { %s7594_s22 = smov [#allocation31]   ;;  %s7595_s11 = smov [#allocation34]  }
 0x23c   : > { %s849_s5 = sshll.u32 %s7594_s22, 4  ;;  %s871_s7 = sshll.u32 %s7595_s11, 4  ;;  %s850_s5 = int_to_ptr.vmem [resolvable:$true] %s849_s5  ;;  %s872_s7 = int_to_ptr.vmem [resolvable:$true] %s871_s7 }
 0x23d   : > { %s8917_s18 = sld [smem:[#allocation84_spill]] }
 0x243   : > { %s7249_s28 = scalar_lea.hbm %s8917_s18, 16 }
 0x244   : > { %p7250_p13 = scmp.ne.s32.totalorder %s8917_s18, %s7249_s28  ;;  %p7256_p3 = scmp.lt.u32.totalorder %s7249_s28, %s8917_s18 }
 0x246   : > { %p7252_p0 = pnand %p7250_p13, %p7800_p8 }
 0x248   : > { %p7253_p1 = pneg %p7252_p0 }
 0x24a   : > { %p7258_p2 = pnand %p7256_p3, %p7253_p1 }
 0x24c   : > { %7261 = shalt.err (!%p7258_p2)
}
 0x24d   : > { %s7262_s15 = scalar_lea.vmem %s850_s5, 16  ;;  %s7269_s8 = scalar_lea.vmem %s850_s5, 32 }
 0x24e   : > { %p7263_p5 = scmp.ne.s32.totalorder %s850_s5, %s7262_s15  ;;  %p7270_p4 = scmp.lt.s32.totalorder %s850_s5, %s850_s5 }
 0x24f   : > { %p7271_p10 = scmp.lt.s32.totalorder %s7269_s8, %s7262_s15 }
 0x250   : > { %p7265_p7 = pnand %p7263_p5, %p7800_p8 }
 0x251   : > { %p7272_p11 = por %p7271_p10, %p7270_p4 }
 0x252   : > { %p7266_p9 = pneg %p7265_p7 }
 0x254   : > { %p7273_p12 = pnand %p7272_p11, %p7266_p9 }
 0x256   : > { %7276 = shalt.err (!%p7273_p12)
}
 0x257   : > { %6445 = dma.hbm_to_vmem [thread:$0]  (!%p7784_p6), %s8917_s18, 16, %s850_s5, [#allocation30]  }
 0x258   : > { %s7277_s28 = scalar_lea.hbm %s8817_s20, 16 }
 0x259   : > { %p7278_p13 = scmp.ne.s32.totalorder %s8817_s20, %s7277_s28  ;;  %p7284_p3 = scmp.lt.u32.totalorder %s7277_s28, %s8817_s20 }
 0x25b   : > { %p7280_p0 = pnand %p7278_p13, %p7800_p8 }
 0x25d   : > { %p7281_p1 = pneg %p7280_p0 }
 0x25f   : > { %p7286_p2 = pnand %p7284_p3, %p7281_p1 }
 0x261   : > { %7289 = shalt.err (!%p7286_p2)
}
 0x262   : > { %s7290_s15 = scalar_lea.vmem %s872_s7, 16  ;;  %s7297_s5 = scalar_lea.vmem %s872_s7, 32 }
 0x263   : > { %p7291_p5 = scmp.ne.s32.totalorder %s872_s7, %s7290_s15  ;;  %p7298_p4 = scmp.lt.s32.totalorder %s872_s7, %s872_s7 }
 0x264   : > { %p7299_p10 = scmp.lt.s32.totalorder %s7297_s5, %s7290_s15 }
 0x265   : > { %p7293_p7 = pnand %p7291_p5, %p7800_p8 }
 0x266   : > { %p7300_p11 = por %p7299_p10, %p7298_p4 }
 0x267   : > { %p7294_p9 = pneg %p7293_p7 }
 0x269   : > { %p7301_p12 = pnand %p7300_p11, %p7294_p9 }
 0x26b   : > { %7304 = shalt.err (!%p7301_p12)
}
 0x26c   : > { %6451 = dma.hbm_to_vmem [thread:$0]  (!%p7784_p6), %s8817_s20, 16, %s872_s7, [#allocation33]  }
 0x26d   : > { %s7596_s11 = smov [#allocation37]   ;;  %s8918_s24 = sld [smem:[#allocation86_spill]] }
 0x26e   : > { %s892_s26 = sshll.u32 %s7596_s11, 4  ;;  %s893_s26 = int_to_ptr.vmem [resolvable:$true] %s892_s26 }
 0x273   : > { %s7305_s4 = scalar_lea.hbm %s8918_s24, 4096 }
 0x274   : > { %p7306_p13 = scmp.ne.s32.totalorder %s8918_s24, %s7305_s4  ;;  %p7312_p3 = scmp.lt.u32.totalorder %s7305_s4, %s8918_s24 }
 0x276   : > { %p7308_p0 = pnand %p7306_p13, %p7800_p8 }
 0x278   : > { %p7309_p1 = pneg %p7308_p0 }
 0x27a   : > { %p7314_p2 = pnand %p7312_p3, %p7309_p1 }
 0x27c   : > { %7317 = shalt.err (!%p7314_p2)
}
 0x27d   : > { %s7318_s7 = scalar_lea.vmem %s893_s26, 4096  ;;  %p7326_p4 = scmp.lt.s32.totalorder %s893_s26, %s893_s26 }
 0x27e   : > { %p7319_p5 = scmp.ne.s32.totalorder %s893_s26, %s7318_s7  ;;  %p7327_p10 = scmp.lt.s32.totalorder %s7318_s7, %s7318_s7 }
 0x280   : > { %p7321_p7 = pnand %p7319_p5, %p7800_p8  ;;  %p7328_p11 = por %p7327_p10, %p7326_p4 }
 0x282   : > { %p7322_p9 = pneg %p7321_p7 }
 0x284   : > { %p7329_p12 = pnand %p7328_p11, %p7322_p9 }
 0x286   : > { %7332 = shalt.err (!%p7329_p12)
}
 0x287   : > { %s7597_s8 = smov 256   ;;  %s7598_s22 = smov 16  }
 0x288   : > { %6457 = dma.hbm_to_vmem [thread:$0]  (!%p7784_p6), %s8918_s24, 4096, %s893_s26, [#allocation36], %s7597_s8, %s7597_s8, %s7598_s22  }
 0x289   : > { %s7599_s28 = smov [#allocation40]   ;;  %s7600_s13 = smov [#allocation41]  }
 0x28a   : > { %s916_s4 = sshll.u32 %s7599_s28, 4  ;;  %s930_s6 = sshll.u32 %s7600_s13, 4  ;;  %s917_s4 = int_to_ptr.vmem [resolvable:$true] %s916_s4  ;;  %s8235_s6 = int_to_ptr.vmem [resolvable:$true] %s930_s6 }
 0x28b   : > { %s8919_s7 = sld [smem:[#allocation87_spill]] }
 0x291   : > { %s8920_s1 = smov %s8919_s7  ;;  %s7333_s10 = scalar_lea.hbm %s8919_s7, 4096 }
 0x292   : > { %p7334_p13 = scmp.ne.s32.totalorder %s8920_s1, %s7333_s10  ;;  %p7340_p3 = scmp.lt.u32.totalorder %s7333_s10, %s8920_s1 }
 0x294   : > { %p7336_p0 = pnand %p7334_p13, %p7800_p8 }
 0x296   : > { %p7337_p1 = pneg %p7336_p0 }
 0x298   : > { %p7342_p2 = pnand %p7340_p3, %p7337_p1 }
 0x29a   : > { %7345 = shalt.err (!%p7342_p2)
}
 0x29b   : > { %s7346_s8 = scalar_lea.vmem %s917_s4, 4096  ;;  %p7354_p4 = scmp.lt.s32.totalorder %s917_s4, %s917_s4 }
 0x29c   : > { %p7347_p5 = scmp.ne.s32.totalorder %s917_s4, %s7346_s8  ;;  %p7355_p10 = scmp.lt.s32.totalorder %s7346_s8, %s7346_s8 }
 0x29e   : > { %p7349_p7 = pnand %p7347_p5, %p7800_p8  ;;  %p7356_p11 = por %p7355_p10, %p7354_p4 }
 0x2a0   : > { %p7350_p9 = pneg %p7349_p7 }
 0x2a2   : > { %p7357_p12 = pnand %p7356_p11, %p7350_p9 }
 0x2a4   : > { %7360 = shalt.err (!%p7357_p12)
}
 0x2a5   : > { %6463 = dma.hbm_to_vmem [thread:$0]  (!%p7784_p6), %s8920_s1, 4096, %s917_s4, [#allocation39], %s8909_s3, %s8909_s3, %s8908_s0  }
 0x2a6   : > { %s8921_s27 = sld [smem:[#allocation88_spill]] }
 0x2ac   : > { %s8922_s13 = smov %s8921_s27  ;;  %s7361_s28 = scalar_lea.hbm %s8921_s27, 16 }
 0x2ad   : > { %p7362_p13 = scmp.ne.s32.totalorder %s8922_s13, %s7361_s28  ;;  %p7368_p3 = scmp.lt.u32.totalorder %s7361_s28, %s8922_s13 }
 0x2af   : > { %p7364_p0 = pnand %p7362_p13, %p7800_p8 }
 0x2b1   : > { %p7365_p1 = pneg %p7364_p0 }
 0x2b3   : > { %p7370_p2 = pnand %p7368_p3, %p7365_p1 }
 0x2b5   : > { %7373 = shalt.err (!%p7370_p2)
}
 0x2b6   : > { %s7374_s4 = scalar_lea.vmem %s8235_s6, 16  ;;  %s7381_s26 = scalar_lea.vmem %s8235_s6, 32 }
 0x2b7   : > { %p7375_p5 = scmp.ne.s32.totalorder %s8235_s6, %s7374_s4  ;;  %p7382_p4 = scmp.lt.s32.totalorder %s8235_s6, %s8235_s6 }
 0x2b8   : > { %p7383_p10 = scmp.lt.s32.totalorder %s7381_s26, %s7374_s4 }
 0x2b9   : > { %p7377_p7 = pnand %p7375_p5, %p7800_p8 }
 0x2ba   : > { %p7384_p11 = por %p7383_p10, %p7382_p4 }
 0x2bb   : > { %p7378_p9 = pneg %p7377_p7 }
 0x2bd   : > { %p7385_p12 = pnand %p7384_p11, %p7378_p9 }
 0x2bf   : > { %7388 = shalt.err (!%p7385_p12)
}
 0x2c0   : > { %s8923_s14 = sld [smem:[#allocation63_spill]]  ;;  %s8924_s10 = sld [smem:[#allocation62_spill]] }
 0x2c1   : > { %s8925_s9 = sld [smem:[#allocation61_spill]]  ;;  %s8926_s22 = sld [smem:[#allocation60_spill]] }
 0x2c2   : > { %s8927_s27 = sld [smem:[#allocation64_spill]] }
 0x2c3   : > { %6466 = dma.hbm_to_vmem [thread:$0]  (!%p7784_p6), %s8922_s13, 16, %s8235_s6, [#allocation42]  }
 0x2c6   : > { %s5157_s2 = sadd.s32 4294967294, %s8923_s14   ;;  %s8284_s28 = sadd.s32 1, %s8923_s14  }
 0x2c7   : > { %s61_s15 = ssub.s32 %s8923_s14, %s8284_s28  ;;  %s64_s5 = sadd.s32 1, %s8924_s10 }
 0x2c8   : > { %p62_p8 = scmp.eq.s32.totalorder %s61_s15, 0  ;;  %p71_p13 = scmp.ne.s32.totalorder %s8924_s10, %s8925_s9 }
 0x2c9   : > { %p72_p0 = scmp.eq.s32.totalorder %s8923_s14, 0  ;;  %p77_p1 = scmp.ne.s32.totalorder %s8925_s9, %s8926_s22 }
 0x2ca   : > { %s8295_s7 = scalar_select %p62_p8, %s8924_s10, %s64_s5  }
 0x2cb   : > { %p8297_p3 = por %p72_p0, %p71_p13  ;;  %p8929_p2 = scmp.eq.s32.totalorder %s8927_s27, 0 }
 0x2cc   : > { %p631_p5 = scmp.eq.s32.totalorder %s8927_s27, 1  ;;  %p637_p7 = scmp.eq.s32.totalorder %s5157_s2, 1 }
 0x2cd   : > { %p8303_p6 = por %p8929_p2, %p77_p1  ;;  %p6502_p9 = scmp.lt.s32.totalorder %s8923_s14, 2 }
 0x2ce   : > { %s8310_s4 = sand.u32 1, %s8924_s10   ;;  %p8312_p4 = por %p631_p5, %p71_p13 }
 0x2cf   : > { %p8316_p10 = por %p637_p7, %p77_p1  ;;  %s5184_s12 = sshll.u32 %s8310_s4, 3 }
 0x2d0   : > { %s8931_s26 = scalar_select %p8312_p4, 1, 0 }
 0x2d1   : > { %s8932_s8 = scalar_select %p8316_p10, 1, 0 }
 0x2d2   : > { %s5185_s9 = sshll.u32 %s8923_s14, 7  ;;  %s8933_s27 = sld [smem:[#allocation66_spill]] }
 0x2d3   : > { %s945_s10 = scalar_lea.vmem [#allocation2], %s5184_s12  ;;  %p8331_p11 = pnand %p6502_p9, %p8297_p3 }
 0x2d4   : > { %s952_s1 = sshll.u32 %s945_s10, 4  ;;  %s5186_s16 = sshll.u32 %s8310_s4, 4  ;;  %s8327_s1 = int_to_ptr.vmem [resolvable:$true] %s952_s1 }
 0x2d5   : > { %s942_s22 = scalar_lea.sflag [#allocation3], %s8310_s4  ;;  %p7391_p8 = pneg %p8331_p11 }
 0x2d8   : > { %s8934_s5 = smov %s8933_s27  ;;  %s8325_s2 = scalar_lea.hbm %s8933_s27, %s5185_s9 }
 0x2d9   : > { %s7389_s9 = scalar_lea.hbm %s8325_s2, 128  ;;  %s7394_s11 = scalar_lea.hbm %s8934_s5, 256 }
 0x2da   : > { %p7390_p12 = scmp.ne.s32.totalorder %s8325_s2, %s7389_s9  ;;  %p7395_p1 = scmp.lt.u32.totalorder %s8325_s2, %s8934_s5 }
 0x2db   : > { %p7396_p3 = scmp.lt.u32.totalorder %s7394_s11, %s7389_s9  ;;  %p7398_p5 = scmp.lt.u32.totalorder %s7389_s9, %s8325_s2 }
 0x2dc   : > { %p7392_p13 = pnand %p7391_p8, %p7390_p12 }
 0x2dd   : > { %p7397_p2 = por %p7396_p3, %p7395_p1 }
 0x2de   : > { %p7393_p0 = pneg %p7392_p13 }
 0x2df   : > { %p7399_p7 = por %p7398_p5, %p7397_p2 }
 0x2e1   : > { %p7400_p9 = pnand %p7399_p7, %p7393_p0 }
 0x2e3   : > { %7403 = shalt.err (!%p7400_p9)
}
 0x2e4   : > { %s7404_s17 = scalar_lea.vmem %s8327_s1, 128  ;;  %s7601_s12 = smov [#allocation2]  }
 0x2e5   : > { %p7405_p12 = scmp.ne.s32.totalorder %s8327_s1, %s7404_s17  ;;  %s7409_s15 = sshll.u32 %s7601_s12, 4  ;;  %s7410_s15 = int_to_ptr.vmem [resolvable:$false] %s7409_s15 }
 0x2e6   : > { %s7411_s27 = scalar_lea.vmem %s7410_s15, 256  ;;  %p7412_p4 = scmp.lt.s32.totalorder %s8327_s1, %s7410_s15 }
 0x2e7   : > { %p7407_p13 = pnand %p7405_p12, %p7391_p8  ;;  %p7413_p1 = scmp.lt.s32.totalorder %s7411_s27, %s7404_s17 }
 0x2e9   : > { %p7408_p10 = pneg %p7407_p13  ;;  %p7414_p3 = por %p7413_p1, %p7412_p4 }
 0x2eb   : > { %p7415_p2 = pnand %p7414_p3, %p7408_p10 }
 0x2ed   : > { %7418 = shalt.err (!%p7415_p2)
}
 0x2ee   : > { %6470 = dma.hbm_to_vmem [thread:$0]  (!%p8331_p11), %s8325_s2, 128, %s8327_s1, %s942_s22  }
 0x2ef   : > { %s963_s9 = scalar_lea.vmem [#allocation5], %s5186_s16  ;;  %s5286_s10 = sshll.u32 %s8923_s14, 8 }
 0x2f0   : > { %s970_s11 = sshll.u32 %s963_s9, 4  ;;  %s8936_s15 = sld [smem:[#allocation67_spill]]  ;;  %s8365_s11 = int_to_ptr.vmem [resolvable:$true] %s970_s11 }
 0x2f1   : > { %s8937_s5 = sand.u32 1, %s8923_s14  }
 0x2f2   : > { %s8375_s18 = scalar_lea.sflag [#allocation6], %s8937_s5 }
 0x2f6   : > { %s8371_s27 = scalar_lea.hbm %s8936_s15, %s5286_s10  ;;  %s7424_s4 = scalar_lea.hbm %s8936_s15, 512 }
 0x2f7   : > { %s7419_s19 = scalar_lea.hbm %s8371_s27, 256  ;;  %p7425_p5 = scmp.lt.u32.totalorder %s8371_s27, %s8936_s15 }
 0x2f8   : > { %p7420_p4 = scmp.ne.s32.totalorder %s8371_s27, %s7419_s19  ;;  %p7426_p7 = scmp.lt.u32.totalorder %s7424_s4, %s7419_s19 }
 0x2f9   : > { %p7428_p12 = scmp.lt.u32.totalorder %s7419_s19, %s8371_s27 }
 0x2fa   : > { %p7422_p10 = pnand %p7420_p4, %p7391_p8  ;;  %p7427_p9 = por %p7426_p7, %p7425_p5 }
 0x2fc   : > { %p7423_p0 = pneg %p7422_p10  ;;  %p7429_p13 = por %p7428_p12, %p7427_p9 }
 0x2fe   : > { %p7430_p1 = pnand %p7429_p13, %p7423_p0 }
 0x300   : > { %7433 = shalt.err (!%p7430_p1)
}
 0x301   : > { %s7434_s14 = scalar_lea.vmem %s8365_s11, 256  ;;  %s7602_s5 = smov [#allocation5]  }
 0x302   : > { %p7435_p3 = scmp.ne.s32.totalorder %s8365_s11, %s7434_s14  ;;  %s7439_s9 = sshll.u32 %s7602_s5, 4  ;;  %s7440_s9 = int_to_ptr.vmem [resolvable:$false] %s7439_s9 }
 0x303   : > { %s7441_s10 = scalar_lea.vmem %s7440_s9, 512  ;;  %p7442_p10 = scmp.lt.s32.totalorder %s8365_s11, %s7440_s9 }
 0x304   : > { %p7437_p2 = pnand %p7435_p3, %p7391_p8  ;;  %p7443_p5 = scmp.lt.s32.totalorder %s7441_s10, %s7434_s14 }
 0x306   : > { %p7438_p4 = pneg %p7437_p2  ;;  %p7444_p7 = por %p7443_p5, %p7442_p10 }
 0x308   : > { %p7445_p9 = pnand %p7444_p7, %p7438_p4 }
 0x30a   : > { %7448 = shalt.err (!%p7445_p9)
}
 0x30b   : > { %6473 = dma.hbm_to_vmem [thread:$0]  (!%p8331_p11), %s8371_s27, 256, %s8365_s11, %s8375_s18, %s8909_s3, %s8909_s3, %s8908_s0  }
 0x30c   : > { %s8938_s19 = sld [smem:[#allocation65_spill]] }
 0x312   : > { %p8939_p8 = scmp.ne.s32.totalorder %s8938_s19, 0 }
 0x313   : > { %s8940_s12 = sld [smem:[#allocation61_spill]] (!%p8939_p8) }
 0x314   : > { %982 = sbr.rel (%p8939_p8) target bundleno = 5175 (0x1437), region = 124 }
 0x319   : > { %s8407_s17 = sand.u32 (!%p8939_p8), 1, %s8940_s12  }
 0x31a   : > { %s5190_s16 = sshll.u32 (!%p8939_p8), %s8407_s17, 3  ;;  %s985_s1 = scalar_lea.sflag (!%p8939_p8), [#allocation3], %s8407_s17 }
 0x31b   : > { %s8413_s13 = scalar_lea.vmem [#allocation2], %s5190_s16 }
 0x31c   : > { %7494 = dma.done.wait (%p8303_p6), %s985_s1, 128  }
 0x31d   : > { %7496 = vsyncadd (%p8303_p6), %s985_s1, 4294967168  ;;  %s8941_s18 = sld [smem:[#allocation64_spill]]  ;;  %s5191_s3 = sshll.u32 %s8407_s17, 4 }
 0x31e   : > { %s8421_s27 = scalar_lea.vmem [#allocation5], %s5191_s3 }
 0x323   : > { %s993_s0 = sand.u32 1, %s8941_s18  }
 0x324   : > { %s994_s11 = scalar_lea.sflag [#allocation6], %s993_s0 }
 0x325   : > { %7498 = dma.done.wait (%p8303_p6), %s994_s11, 256  }
 0x326   : > { %7500 = vsyncadd (%p8303_p6), %s994_s11, 4294967040  ;;  %p8942_p11 = scmp.eq.s32.totalorder %s8941_s18, 0 }
 0x328   : > { %7502 = dma.done.wait (%p8942_p11), [#allocation6], 2048   ;;  %p8943_p0 = pmov %p8942_p11 }
 0x32a   : > { %7504 = vsyncadd (%p8943_p0), [#allocation6], 4294965248  ;;  %p8944_p12 = pmov %p8943_p0 }
 0x32b   : > { %p8945_p13 = pmov %p8943_p0 }
 0x32c   : > { %7506 = dma.done.wait (%p8944_p12), [#allocation9], 2064  }
 0x32d   : > { %7508 = vsyncadd (%p8945_p13), [#allocation9], 4294965232  ;;  %p8946_p1 = pmov %p8943_p0 }
 0x32e   : > { %p8947_p3 = pmov %p8943_p0 }
 0x32f   : > { %7510 = dma.done.wait (%p8946_p1), [#allocation12], 2064  }
 0x330   : > { %7512 = vsyncadd (%p8947_p3), [#allocation12], 4294965232  ;;  %p8948_p6 = pmov %p8943_p0 }
 0x331   : > { %p8949_p2 = pmov %p8943_p0 }
 0x332   : > { %7514 = dma.done.wait (%p8948_p6), [#allocation15], 2064  }
 0x333   : > { %7516 = vsyncadd (%p8949_p2), [#allocation15], 4294965232  ;;  %p8950_p4 = pmov %p8943_p0 }
 0x334   : > { %p8951_p10 = pmov %p8943_p0 }
 0x335   : > { %7518 = dma.done.wait (%p8950_p4), [#allocation18], 2064  }
 0x336   : > { %7520 = vsyncadd (%p8951_p10), [#allocation18], 4294965232  ;;  %p8952_p5 = pmov %p8943_p0 }
 0x337   : > { %p8953_p7 = pmov %p8943_p0 }
 0x338   : > { %7522 = dma.done.wait (%p8952_p5), [#allocation21], 2064  }
 0x339   : > { %7524 = vsyncadd (%p8953_p7), [#allocation21], 4294965232  ;;  %p8954_p9 = pmov %p8943_p0 }
 0x33a   : > { %p8955_p8 = pmov %p8943_p0 }
 0x33b   : > { %7526 = dma.done.wait (%p8954_p9), [#allocation24], 2064  }
 0x33c   : > { %7528 = vsyncadd (%p8955_p8), [#allocation24], 4294965232  ;;  %p8956_p11 = pmov %p8943_p0 }
 0x33e   : > { %7530 = dma.done.wait (%p8956_p11), [#allocation27], 2064  }
 0x33f   : > { %7532 = vsyncadd (%p8943_p0), [#allocation27], 4294965232  ;;  %p8957_p12 = pmov %p8943_p0 }
 0x340   : > { %p8958_p13 = pmov %p8943_p0 }
 0x341   : > { %7534 = dma.done.wait (%p8957_p12), [#allocation30], 32  }
 0x342   : > { %7536 = vsyncadd (%p8958_p13), [#allocation30], 4294967264  ;;  %p8959_p1 = pmov %p8943_p0 }
 0x343   : > { %p8960_p3 = pmov %p8943_p0 }
 0x344   : > { %7538 = dma.done.wait (%p8959_p1), [#allocation33], 32  }
 0x345   : > { %7540 = vsyncadd (%p8960_p3), [#allocation33], 4294967264  ;;  %p8961_p6 = pmov %p8943_p0 }
 0x346   : > { %p8962_p2 = pmov %p8943_p0 }
 0x347   : > { %7542 = dma.done.wait (%p8961_p6), [#allocation36], 4112  }
 0x348   : > { %7544 = vsyncadd (%p8962_p2), [#allocation36], 4294963184  ;;  %p8963_p4 = pmov %p8943_p0 }
 0x349   : > { %p8964_p10 = pmov %p8943_p0 }
 0x34a   : > { %7546 = dma.done.wait (%p8963_p4), [#allocation39], 4128  }
 0x34b   : > { %7548 = vsyncadd (%p8964_p10), [#allocation39], 4294963168  ;;  %p8965_p5 = pmov %p8943_p0 }
 0x34c   : > { %p8966_p7 = pmov %p8943_p0 }
 0x34d   : > { %7550 = dma.done.wait (%p8965_p5), [#allocation42], 16  }
 0x34e   : > { %7552 = vsyncadd (%p8966_p7), [#allocation42], 4294967280  ;;  %v7603_v0 = vmov 0.0|0.0   ;;  %vm7604_vm0 = vmmov 0   ;;  %v7605_v1 = vmov 0.0   ;;  %v1263_v2 = vld [vmem:[#allocation10] sm:$0xff] }
 0x34f   : > { %5996 = vmatprep.subr.bf16.mxu1 %v7603_v0  ;;  %5607 = vmatprep.mubr.msk.f32.mxu1 %vm7604_vm0, %v7605_v1  ;;  %v1264_v3 = vld [vmem:[#allocation10 + $0x8] sm:$0xff]  ;;  %v1265_v4 = vld [vmem:[#allocation10 + $0x10] sm:$0xff]  ;;  %v1266_v6 = vld [vmem:[#allocation10 + $0x18] sm:$0xff]  ;;  %s7606_s6 = smov 32   ;;  %s7607_s4 = smov 96   ;;  %vm1604_vm1 = vcmask 261120  }
 0x350   : > { %5972 = vmatprep.subr.bf16.mxu0 %v7603_v0  ;;  %5572 = vmatprep.mubr.msk.f32.mxu0 %vm7604_vm0, %v7605_v1  ;;  %v5997_v5 = vpack.c.bf16 %v1264_v3, %v1263_v2  ;;  %v6000_v7 = vpack.c.bf16 %v1266_v6, %v1265_v4  ;;  %v1267_v8 = vld [vmem:[#allocation10 + $0x20] sm:$0xff]  ;;  %v1268_v9 = vld [vmem:[#allocation10 + $0x28] sm:$0xff]  ;;  %v1173_v13 = vld [vmem:[#allocation7 + $0x18] sm:$0xff]  ;;  %s7608_s2 = smov 64   ;;  %vm1893_vm2 = vcmask 64512   ;;  %vm2743_vm3 = vcmask 523264  }
 0x351   : > { %v1170_v10 = vld [vmem:[#allocation7] sm:$0xff]  ;;  %v1171_v11 = vld [vmem:[#allocation7 + $0x8] sm:$0xff]  ;;  %v1172_v12 = vld [vmem:[#allocation7 + $0x10] sm:$0xff]  ;;  %v6003_v14 = vpack.c.bf16 %v1268_v9, %v1267_v8  ;;  %vm2745_vm4 = vcmask 785408   ;;  %vm3621_vm5 = vcmask 97280   ;;  %s5283_s22 = sshll.u32 %s8941_s18, 7 }
 0x352   : > { %5998 = vmatpush3.bf16.msra.mxu1 %v5997_v5  ;;  %v5973_v15 = vpack.c.bf16 %v1171_v11, %v1170_v10  ;;  %v1269_v16 = vld [vmem:[#allocation10 + $0x30] sm:$0xff]  ;;  %v1270_v17 = vld [vmem:[#allocation10 + $0x38] sm:$0xff]  ;;  %v5976_v18 = vpack.c.bf16 %v1173_v13, %v1172_v12  ;;  %v1175_v20 = vld [vmem:[#allocation7 + $0x28] sm:$0xff]  ;;  %s1166_s14 = scalar_lea.vmem [#allocation43], %s5190_s16  ;;  %s8967_s19 = sld [smem:[#allocation89_spill]] }
 0x353   : > { %5999 = vmatprep.subr.bf16.mxu1 %v7603_v0  ;;  %v1174_v19 = vld [vmem:[#allocation7 + $0x20] sm:$0xff]  ;;  %v6006_v21 = vpack.c.bf16 %v1270_v17, %v1269_v16  ;;  %v1272_v23 = vld [vmem:[#allocation10 + $0x48] sm:$0xff]  ;;  %v1177_v26 = vld [vmem:[#allocation7 + $0x38] sm:$0xff]  ;;  %s4836_s5 = sshll.u32 %s1166_s14, 4  ;;  %s4823_s1 = scalar_lea.sflag [#allocation4], %s8407_s17  ;;  %s8755_s5 = int_to_ptr.vmem [resolvable:$true] %s4836_s5 }
 0x354   : > { %5974 = vmatpush3.bf16.msra.mxu0 %v5973_v15  ;;  %v1271_v22 = vld [vmem:[#allocation10 + $0x40] sm:$0xff]  ;;  %v5979_v24 = vpack.c.bf16 %v1175_v20, %v1174_v19  ;;  %v1176_v25 = vld [vmem:[#allocation7 + $0x30] sm:$0xff]  ;;  %v1274_v29 = vld [vmem:[#allocation10 + $0x58] sm:$0xff]  ;;  %p8968_p8 = scmp.ne.s32.totalorder %s8931_s26, 0  ;;  %s7611_s16 = smov [#allocation43]  }
 0x355   : > { %5975 = vmatprep.subr.bf16.mxu0 %v7603_v0  ;;  %v6009_v27 = vpack.c.bf16 %v1272_v23, %v1271_v22  ;;  %v1273_v28 = vld [vmem:[#allocation10 + $0x50] sm:$0xff]  ;;  %v5982_v30 = vpack.c.bf16 %v1177_v26, %v1176_v25  ;;  %v1178_v31 = vld [vmem:[#allocation7 + $0x40] sm:$0xff]  ;;  %v1179_v32 = vld [vmem:[#allocation7 + $0x48] sm:$0xff]  ;;  %s7453_s18 = sshll.u32 %s7611_s16, 4  ;;  %s7454_s18 = int_to_ptr.vmem [resolvable:$false] %s7453_s18 }
 0x356   : > { %6001 = vmatpush3.bf16.msra.mxu1 %v6000_v7  ;;  %v6012_v33 = vpack.c.bf16 %v1274_v29, %v1273_v28  ;;  %v1275_v34 = vld [vmem:[#allocation10 + $0x60] sm:$0xff]  ;;  %v1276_v35 = vld [vmem:[#allocation10 + $0x68] sm:$0xff]  ;;  %v5985_v36 = vpack.c.bf16 %v1179_v32, %v1178_v31  ;;  %v1181_v38 = vld [vmem:[#allocation7 + $0x58] sm:$0xff]  ;;  %s7455_s0 = scalar_lea.vmem %s7454_s18, 256  ;;  %p7456_p12 = scmp.lt.s32.totalorder %s8755_s5, %s7454_s18 }
 0x357   : > { %6002 = vmatprep.subr.bf16.mxu1 %v7603_v0  ;;  %v1180_v37 = vld [vmem:[#allocation7 + $0x50] sm:$0xff]  ;;  %v6015_v39 = vpack.c.bf16 %v1276_v35, %v1275_v34  ;;  %v1278_v41 = vld [vmem:[#allocation10 + $0x78] sm:$0xff]  ;;  %v1183_v44 = vld [vmem:[#allocation7 + $0x68] sm:$0xff] }
 0x358   : > { %5977 = vmatpush3.bf16.msra.mxu0 %v5976_v18  ;;  %v1277_v40 = vld [vmem:[#allocation10 + $0x70] sm:$0xff]  ;;  %v5988_v42 = vpack.c.bf16 %v1181_v38, %v1180_v37  ;;  %v1182_v43 = vld [vmem:[#allocation7 + $0x60] sm:$0xff]  ;;  %s8753_s12 = scalar_lea.hbm %s8967_s19, %s5283_s22 }
 0x359   : > { %5978 = vmatprep.subr.bf16.mxu0 %v7603_v0  ;;  %v6018_v45 = vpack.c.bf16 %v1278_v41, %v1277_v40  ;;  %v5991_v46 = vpack.c.bf16 %v1183_v44, %v1182_v43  ;;  %v1184_v47 = vld [vmem:[#allocation7 + $0x70] sm:$0xff]  ;;  %v1185_v48 = vld [vmem:[#allocation7 + $0x78] sm:$0xff]  ;;  %v5218_v51 = vld [vmem:[#allocation11] ss:$0 sm:$0xff] }
 0x35a   : > { %6004 = vmatpush3.bf16.msra.mxu1 %v6003_v14  ;;  %v8499_v49 = vld [vmem:[%s8413_s13] sm:$0xff]  ;;  %v5994_v50 = vpack.c.bf16 %v1185_v48, %v1184_v47  ;;  %v5217_v55 = vld [vmem:[#allocation8] ss:$0 sm:$0xff]  ;;  %v1356_v63 = vld [vmem:[#allocation13] sm:$0xff]  ;;  %s7449_s13 = scalar_lea.vmem %s8755_s5, 128 }
 0x35b   : > { %6005 = vmatprep.subr.bf16.mxu1 %v7603_v0  ;;  %v1357_v2 = vld [vmem:[#allocation13 + $0x8] sm:$0xff]  ;;  %v1358_v3 = vld [vmem:[#allocation13 + $0x10] sm:$0xff]  ;;  %v1359_v5 = vld [vmem:[#allocation13 + $0x18] sm:$0xff]  ;;  %p7450_p9 = scmp.ne.s32.totalorder %s8755_s5, %s7449_s13  ;;  %p7457_p13 = scmp.lt.s32.totalorder %s7455_s0, %s7449_s13 }
 0x35c   : > { %5980 = vmatpush3.bf16.msra.mxu0 %v5979_v24  ;;  %v6021_v4 = vpack.c.bf16 %v1357_v2, %v1356_v63  ;;  %v6024_v6 = vpack.c.bf16 %v1359_v5, %v1358_v3  ;;  %v1360_v7 = vld [vmem:[#allocation13 + $0x20] sm:$0xff]  ;;  %v1361_v8 = vld [vmem:[#allocation13 + $0x28] sm:$0xff]  ;;  %v1362_v10 = vld [vmem:[#allocation13 + $0x30] sm:$0xff] }
 0x35d   : > { %5981 = vmatprep.subr.bf16.mxu0 %v7603_v0  ;;  %v6027_v9 = vpack.c.bf16 %v1361_v8, %v1360_v7  ;;  %v1363_v11 = vld [vmem:[#allocation13 + $0x38] sm:$0xff]  ;;  %v1364_v13 = vld [vmem:[#allocation13 + $0x40] sm:$0xff]  ;;  %v1365_v14 = vld [vmem:[#allocation13 + $0x48] sm:$0xff]  ;;  %p7451_p11 = pnand %p7450_p9, %p8968_p8  ;;  %p7458_p1 = por %p7457_p13, %p7456_p12 }
 0x35e   : > { %6007 = vmatpush3.bf16.msra.mxu1 %v6006_v21  ;;  %v6030_v12 = vpack.c.bf16 %v1363_v11, %v1362_v10  ;;  %v6033_v15 = vpack.c.bf16 %v1365_v14, %v1364_v13  ;;  %v1366_v16 = vld [vmem:[#allocation13 + $0x50] sm:$0xff]  ;;  %v1367_v17 = vld [vmem:[#allocation13 + $0x58] sm:$0xff]  ;;  %v1368_v19 = vld [vmem:[#allocation13 + $0x60] sm:$0xff] }
 0x35f   : > { %6008 = vmatprep.subr.bf16.mxu1 %v7603_v0  ;;  %v6036_v18 = vpack.c.bf16 %v1367_v17, %v1366_v16  ;;  %v1369_v20 = vld [vmem:[#allocation13 + $0x68] sm:$0xff]  ;;  %v1370_v22 = vld [vmem:[#allocation13 + $0x70] sm:$0xff]  ;;  %v1371_v23 = vld [vmem:[#allocation13 + $0x78] sm:$0xff]  ;;  %p7452_p0 = pneg %p7451_p11 }
 0x360   : > { %5983 = vmatpush3.bf16.msra.mxu0 %v5982_v30  ;;  %v6039_v21 = vpack.c.bf16 %v1369_v20, %v1368_v19  ;;  %v6042_v24 = vpack.c.bf16 %v1371_v23, %v1370_v22  ;;  %v5219_v8 = vld [vmem:[#allocation14] ss:$0 sm:$0xff] }
 0x361   : > { %5984 = vmatprep.subr.bf16.mxu0 %v7603_v0  ;;  %p7459_p3 = pnand %p7458_p1, %p7452_p0 }
 0x362   : > { %6010 = vmatpush3.bf16.msra.mxu1 %v6009_v27 }
 0x363   : > { %6011 = vmatprep.subr.bf16.mxu1 %v7603_v0 }
 0x364   : > { %5986 = vmatpush3.bf16.msra.mxu0 %v5985_v36 }
 0x365   : > { %5987 = vmatprep.subr.bf16.mxu0 %v7603_v0 }
 0x366   : > { %6013 = vmatpush3.bf16.msra.mxu1 %v6012_v33 }
 0x367   : > { %6014 = vmatprep.subr.bf16.mxu1 %v7603_v0 }
 0x368   : > { %5989 = vmatpush3.bf16.msra.mxu0 %v5988_v42 }
 0x369   : > { %5990 = vmatprep.subr.bf16.mxu0 %v7603_v0 }
 0x36a   : > { %6016 = vmatpush3.bf16.msra.mxu1 %v6015_v39 }
 0x36b   : > { %6017 = vmatprep.subr.bf16.mxu1 %v7603_v0 }
 0x36c   : > { %5992 = vmatpush3.bf16.msra.mxu0 %v5991_v46 }
 0x36d   : > { %5993 = vmatprep.subr.bf16.mxu0 %v7603_v0 }
 0x36e   : > { %6019 = vmatpush3.bf16.msra.mxu1 %v6018_v45 }
 0x36f   : > { %6044 = vmatprep.subr.bf16.mxu1 %v7603_v0 }
 0x370   : > { %5995 = vmatpush3.bf16.msra.mxu0 %v5994_v50 }
 0x371   : > { %5608 = vmatmul.mubr.f32.vlgmr.msra.gmra.mrb[0].mxu1 %v8499_v49  ;;  %6020 = vmatprep.subr.bf16.mxu0 %v7603_v0 }
 0x372   : > { %5653 = vmatprep.mubr.msk.f32.mxu1 %vm7604_vm0, %v7605_v1 }
 0x373   : > { %5573 = vmatmul.mubr.f32.vlgmr.msra.gmra.mrb[0].mxu0 %v8499_v49 }
 0x374   : > { %5642 = vmatprep.mubr.msk.f32.mxu0 %vm7604_vm0, %v7605_v1  ;;  %6022 = vmatpush3.bf16.msra.mxu0 %v6021_v4 }
 0x375   : > { %6023 = vmatprep.subr.bf16.mxu0 %v7603_v0 }
 0x378   : > { %6025 = vmatpush3.bf16.msra.mxu0 %v6024_v6 }
 0x379   : > { %6026 = vmatprep.subr.bf16.mxu0 %v7603_v0 }
 0x37c   : > { %6028 = vmatpush3.bf16.msra.mxu0 %v6027_v9 }
 0x37d   : > { %6029 = vmatprep.subr.bf16.mxu0 %v7603_v0 }
 0x380   : > { %6031 = vmatpush3.bf16.msra.mxu0 %v6030_v12 }
 0x381   : > { %6032 = vmatprep.subr.bf16.mxu0 %v7603_v0 }
 0x384   : > { %6034 = vmatpush3.bf16.msra.mxu0 %v6033_v15 }
 0x385   : > { %6035 = vmatprep.subr.bf16.mxu0 %v7603_v0 }
 0x388   : > { %6037 = vmatpush3.bf16.msra.mxu0 %v6036_v18 }
 0x389   : > { %6038 = vmatprep.subr.bf16.mxu0 %v7603_v0 }
 0x38c   : > { %6040 = vmatpush3.bf16.msra.mxu0 %v6039_v21 }
 0x38d   : > { %6041 = vmatprep.subr.bf16.mxu0 %v7603_v0 }
 0x390   : > { %6043 = vmatpush3.bf16.msra.mxu0 %v6042_v24 }
 0x393   : > { %5643 = vmatmul.mubr.f32.vlgmr.msra.gmra.mrb[2].mxu0 %v8499_v49 }
 0x444   : > { %v1352_v52 = vpop.f32.mrb[0].mxu1 }
 0x445   : > { %v1353_v53 = vadd.f32 %v5218_v51, %v1352_v52  ;;  %v5609_v54 = vpop.f32.mrb[1].mxu1 }
 0x446   : > { %v1259_v56 = vpop.f32.mrb[0].mxu0 }
 0x447   : > { %1463 = vrot.lane.b32.xlu1 %v1353_v53, %s7606_s6  ;;  %1457 = vrot.lane.b32.xlu0 %v1353_v53, %s7607_s4  ;;  %v8513_v57 = vadd.f32 %v5217_v55, %v1259_v56  ;;  %v5574_v58 = vpop.f32.mrb[1].mxu0 }
 0x44b   : > { %1460 = vrot.lane.b32.xlu0 %v1353_v53, %s7608_s2  ;;  %1450 = vrot.lane.b32.xlu1 %v8513_v57, %s7607_s4 }
 0x44f   : > { %1452 = vrot.lane.b32.xlu1 %v8513_v57, %s7608_s2 }
 0x453   : > { %1454 = vrot.lane.b32.xlu1 %v8513_v57, %s7606_s6 }
 0x466   : > { %v1445_v56 = vpop.f32.mrb[2].mxu0 }
 0x467   : > { %v1446_v9 = vadd.f32 %v5219_v8, %v1445_v56 }
 0x4b9   : > { %v1458_v59 = vpop.permute.xlu0 %1457  ;;  %v1464_v62 = vpop.permute.xlu1 %1463 }
 0x4ba   : > { %v6596_v60 = vpack.i.bf16 %v1458_v59, %v1353_v53 }
 0x4bc   : > { %6597 = vxpose.xlu0.b32.start.end [1/1] (short) (narrow) %v6596_v60, 32 }
 0x4bd   : > { %v1461_v61 = vpop.permute.xlu0 %1460  ;;  %v1451_v25 = vpop.permute.xlu1 %1450 }
 0x4be   : > { %1540 = vxpose.xlu1.b32.start.end [1/1] (short) (narrow) %v1461_v61, 32 }
 0x4c1   : > { %v1453_v26 = vpop.permute.xlu1 %1452 }
 0x4c5   : > { %v1455_v29 = vpop.permute.xlu1 %1454 }
 0x4c9   : > { %1572 = vxpose.xlu0.b32.start.end [1/1] (short) (narrow) %v1464_v62, 32 }
 0x53c   : > { %v6598_v27 = vpop.trf.xlu0 }
 0x53d   : > { %v6599_v30 = vunpack.i.l.bf16 %v6598_v27  ;;  %v6602_v42 = vunpack.i.h.bf16 %v6598_v27 }
 0x53e   : > { %v1556_v34 = vpop.trf.xlu1 }
 0x540   : > { %v6603_v28 = vpop.trf.xlu0 }
 0x541   : > { %v6604_v31 = vunpack.i.l.bf16 %v6603_v28  ;;  %v6607_v39 = vunpack.i.h.bf16 %v6603_v28 }
 0x542   : > { %v1557_v38 = vpop.trf.xlu1 }
 0x543   : > { %v6045_v32 = vpack.c.bf16 %v6604_v31, %v6599_v30  ;;  %v6051_v44 = vpack.c.bf16 %v6607_v39, %v6602_v42  ;;  %v6057_v49 = vpack.c.bf16 %v1557_v38, %v1556_v34 }
 0x544   : > { %v6608_v33 = vpop.trf.xlu0 }
 0x545   : > { %6046 = vmatpush3.bf16.msra.mxu1 %v6045_v32  ;;  %v6609_v36 = vunpack.i.l.bf16 %v6608_v33  ;;  %v6612_v46 = vunpack.i.h.bf16 %v6608_v33 }
 0x546   : > { %6047 = vmatprep.subr.bf16.mxu1 %v7603_v0  ;;  %v1558_v45 = vpop.trf.xlu1 }
 0x548   : > { %v6613_v35 = vpop.trf.xlu0 }
 0x549   : > { %v6614_v37 = vunpack.i.l.bf16 %v6613_v35  ;;  %v6617_v43 = vunpack.i.h.bf16 %v6613_v35 }
 0x54a   : > { %v1559_v50 = vpop.trf.xlu1 }
 0x54b   : > { %v6048_v40 = vpack.c.bf16 %v6614_v37, %v6609_v36  ;;  %v6054_v48 = vpack.c.bf16 %v6617_v43, %v6612_v46  ;;  %v6060_v52 = vpack.c.bf16 %v1559_v50, %v1558_v45 }
 0x54c   : > { %v1588_v41 = vpop.trf.xlu0 }
 0x54d   : > { %6049 = vmatpush3.bf16.msra.mxu1 %v6048_v40 }
 0x54e   : > { %6050 = vmatprep.subr.bf16.mxu1 %v7603_v0 }
 0x550   : > { %5654 = vmatmul.mubr.msk.f32.vlgmr.msra.gmra.mrb[2].mxu1 %vm1604_vm1, %v8513_v57  ;;  %v1589_v47 = vpop.trf.xlu0  ;;  %v5644_v57 = vpop.f32.mrb[3].mxu0 }
 0x551   : > { %6052 = vmatpush3.bf16.msra.mxu1 %v6051_v44  ;;  %5664 = vmatprep.mubr.msk.f32.mxu1 %vm7604_vm0, %v7605_v1  ;;  %v6063_v53 = vpack.c.bf16 %v1589_v47, %v1588_v41 }
 0x552   : > { %6053 = vmatprep.subr.bf16.mxu1 %v7603_v0 }
 0x554   : > { %v1590_v51 = vpop.trf.xlu0 }
 0x555   : > { %6055 = vmatpush3.bf16.msra.mxu1 %v6054_v48 }
 0x556   : > { %6056 = vmatprep.subr.bf16.mxu1 %v7603_v0 }
 0x558   : > { %5665 = vmatmul.mubr.msk.f32.vlgmr.msra.gmra.mrb[4].mxu1 %vm1604_vm1, %v1451_v25  ;;  %v1591_v54 = vpop.trf.xlu0 }
 0x559   : > { %6058 = vmatpush3.bf16.msra.mxu1 %v6057_v49  ;;  %5675 = vmatprep.mubr.msk.f32.mxu1 %vm7604_vm0, %v7605_v1  ;;  %v6066_v55 = vpack.c.bf16 %v1591_v54, %v1590_v51 }
 0x55a   : > { %6059 = vmatprep.subr.bf16.mxu1 %v7603_v0 }
 0x55d   : > { %6061 = vmatpush3.bf16.msra.mxu1 %v6060_v52 }
 0x55e   : > { %6062 = vmatprep.subr.bf16.mxu1 %v7603_v0 }
 0x560   : > { %5676 = vmatmul.mubr.msk.f32.vlgmr.msra.gmra.mrb[6].mxu1 %vm1604_vm1, %v1453_v26 }
 0x561   : > { %6064 = vmatpush3.bf16.msra.mxu1 %v6063_v53  ;;  %5686 = vmatprep.mubr.msk.f32.mxu1 %vm7604_vm0, %v7605_v1 }
 0x562   : > { %6065 = vmatprep.subr.bf16.mxu1 %v7603_v0 }
 0x565   : > { %6067 = vmatpush3.bf16.msra.mxu1 %v6066_v55 }
 0x568   : > { %5687 = vmatmul.mubr.msk.f32.vlgmr.msra.gmra.mrb[8].mxu1 %vm1604_vm1, %v1455_v29 }
 0x623   : > { %v1673_v58 = vpop.f32.mrb[2].mxu1 }
 0x624   : > { %v5655_v59 = vpop.f32.mrb[3].mxu1  ;;  %v1894_v60 = vsel %vm1893_vm2, %v1673_v58, -inf }
 0x625   : > { %1895 = vmax.xlane.f32.xlu0 %v1894_v60 }
 0x62b   : > { %v1745_v61 = vpop.f32.mrb[4].mxu1 }
 0x62c   : > { %v5666_v62 = vpop.f32.mrb[5].mxu1  ;;  %v1897_v63 = vsel %vm1893_vm2, %v1745_v61, -inf }
 0x62d   : > { %1898 = vmax.xlane.f32.xlu1 %v1897_v63 }
 0x633   : > { %v1817_v2 = vpop.f32.mrb[6].mxu1 }
 0x634   : > { %v5677_v3 = vpop.f32.mrb[7].mxu1  ;;  %v1900_v4 = vsel %vm1893_vm2, %v1817_v2, -inf }
 0x635   : > { %1901 = vmax.xlane.f32.xlu0 %v1900_v4 }
 0x63b   : > { %v1889_v5 = vpop.f32.mrb[8].mxu1 }
 0x63c   : > { %v5688_v6 = vpop.f32.mrb[9].mxu1  ;;  %v1903_v7 = vsel %vm1893_vm2, %v1889_v5, -inf }
 0x63d   : > { %1904 = vmax.xlane.f32.xlu1 %v1903_v7 }
 0x64e   : > { %1467 = vrot.lane.b32.xlu1 %v1446_v9, %s7607_s4 }
 0x652   : > { %1473 = vrot.lane.b32.xlu1 %v1446_v9, %s7606_s6 }
 0x6b2   : > { %v1896_v10 = vpop.xlane.xlu0 %1895 }
 0x6b3   : > { %v1906_v11 = vsub.f32 %v1673_v58, %v1896_v10 }
 0x6b5   : > { %v1910_v12 = vmul.f32 1.442695, %v1906_v11 }
 0x6b7   : > { %6681 = vpow2.f32 %v1910_v12 }
 0x6ba   : > { %v1899_v20 = vpop.xlane.xlu1 %1898 }
 0x6bb   : > { %v1907_v21 = vsub.f32 %v1745_v61, %v1899_v20 }
 0x6bd   : > { %v1912_v23 = vmul.f32 1.442695, %v1907_v21  ;;  %v2751_v21 = vld [vmem:[#allocation16 + $0x20] sm:$0xff] }
 0x6c1   : > { %v6682_v13 = vpop.eup %6681 }
 0x6c2   : > { %v1902_v14 = vpop.xlane.xlu0 %1901  ;;  %v1918_v15 = vsel %vm1893_vm2, %v6682_v13, 0.0 }
 0x6c3   : > { %v1908_v16 = vsub.f32 %v1817_v2, %v1902_v14  ;;  %1919 = vadd.xlane.f32.xlu0 %v1918_v15  ;;  %v2747_v15 = vld [vmem:[#allocation16] sm:$0xff] }
 0x6c5   : > { %v1914_v17 = vmul.f32 1.442695, %v1908_v16  ;;  %v2748_v16 = vld [vmem:[#allocation16 + $0x8] sm:$0xff] }
 0x6c7   : > { %6683 = vpow2.f32 %v1914_v17  ;;  %v2749_v17 = vld [vmem:[#allocation16 + $0x10] sm:$0xff] }
 0x6c8   : > { %6685 = vpow2.f32 %v1912_v23 }
 0x6ca   : > { %v1905_v22 = vpop.xlane.xlu1 %1904 }
 0x6cb   : > { %v1909_v24 = vsub.f32 %v1889_v5, %v1905_v22  ;;  %v2752_v22 = vld [vmem:[#allocation16 + $0x28] sm:$0xff] }
 0x6cc   : > { %v6075_v23 = vpack.c.bf16 %v2752_v22, %v2751_v21 }
 0x6cd   : > { %v1916_v25 = vmul.f32 1.442695, %v1909_v24  ;;  %v2753_v24 = vld [vmem:[#allocation16 + $0x30] sm:$0xff] }
 0x6ce   : > { %v1468_v30 = vpop.permute.xlu1 %1467 }
 0x6cf   : > { %6687 = vpow2.f32 %v1916_v25  ;;  %v2754_v25 = vld [vmem:[#allocation16 + $0x38] sm:$0xff] }
 0x6d1   : > { %v6684_v18 = vpop.eup %6683 }
 0x6d2   : > { %v1924_v19 = vsel %vm1893_vm2, %v6684_v18, 0.0  ;;  %v6686_v26 = vpop.eup %6685  ;;  %v1474_v31 = vpop.permute.xlu1 %1473 }
 0x6d3   : > { %1925 = vadd.xlane.f32.xlu1 %v1924_v19  ;;  %v1921_v27 = vsel %vm1893_vm2, %v6686_v26, 0.0  ;;  %v2750_v19 = vld [vmem:[#allocation16 + $0x18] sm:$0xff] }
 0x6d4   : > { %v6072_v20 = vpack.c.bf16 %v2750_v19, %v2749_v17 }
 0x6d9   : > { %1470 = vrot.lane.b32.xlu0 %v1446_v9, %s7608_s2  ;;  %v6688_v28 = vpop.eup %6687 }
 0x6da   : > { %v1927_v29 = vsel %vm1893_vm2, %v6688_v28, 0.0 }
 0x6f8   : > { %1922 = vadd.xlane.f32.xlu0 %v1921_v27  ;;  %v2755_v27 = vld [vmem:[#allocation16 + $0x40] sm:$0xff] }
 0x6fc   : > { %1928 = vadd.xlane.f32.xlu0 %v1927_v29 }
 0x706   : > { %1938 = vxpose.xlu1.b32.start.end [1/1] (short) (narrow) %v1446_v9, 32 }
 0x713   : > { %2034 = vxpose.xlu1.b32.start.end [1/1] (short) (narrow) %v1474_v31, 32  ;;  %v2758_v31 = vld [vmem:[#allocation16 + $0x58] sm:$0xff] }
 0x729   : > { %1970 = vxpose.xlu0.b32.start.end [1/1] (short) (narrow) %v1468_v30, 32  ;;  %v2757_v30 = vld [vmem:[#allocation16 + $0x50] sm:$0xff] }
 0x750   : > { %v1920_v32 = vpop.xlane.xlu0 %1919 }
 0x751   : > { %6689 = vrcp.f32 %v1920_v32  ;;  %v6084_v32 = vpack.c.bf16 %v2758_v31, %v2757_v30 }
 0x754   : > { %v1471_v33 = vpop.permute.xlu0 %1470 }
 0x755   : > { %2002 = vxpose.xlu0.b32.start.end [1/1] (short) (narrow) %v1471_v33, 32  ;;  %v2759_v33 = vld [vmem:[#allocation16 + $0x60] sm:$0xff] }
 0x75b   : > { %v6690_v34 = vpop.eup %6689 }
 0x75c   : > { %v1934_v35 = vmul.f32 %v6690_v34, %v6682_v13  ;;  %v2760_v34 = vld [vmem:[#allocation16 + $0x68] sm:$0xff] }
 0x75e   : > { %5689 = vmatprep.subr.msk.mxu1 %vm1893_vm2, %v1934_v35 }
 0x75f   : > { %5690 = vmatpush3.xpose.msk.msra.mxu1 %vm1893_vm2, %v1934_v35  ;;  %v6087_v35 = vpack.c.bf16 %v2760_v34, %v2759_v33  ;;  %v2964_v33 = vld [vmem:[#allocation22 + $0x10] sm:$0xff]  ;;  %v2965_v34 = vld [vmem:[#allocation22 + $0x18] sm:$0xff] }
 0x760   : > { %v1926_v36 = vpop.xlane.xlu1 %1925 }
 0x761   : > { %6691 = vrcp.f32 %v1926_v36 }
 0x76b   : > { %v6692_v37 = vpop.eup %6691 }
 0x76c   : > { %v1936_v38 = vmul.f32 %v6692_v37, %v6684_v18  ;;  %v6069_v18 = vpack.c.bf16 %v2748_v16, %v2747_v15  ;;  %v7609_v37 = vmov 1983009808   ;;  %v2962_v15 = vld [vmem:[#allocation22] sm:$0xff]  ;;  %v2963_v16 = vld [vmem:[#allocation22 + $0x8] sm:$0xff] }
 0x76d   : > { %v6116_v17 = vpack.c.bf16 %v2963_v16, %v2962_v15  ;;  %v2876_v15 = vld [vmem:[#allocation19 + $0x38] sm:$0xff] }
 0x76e   : > { %5705 = vmatprep.subr.msk.mxu0 %vm1893_vm2, %v1936_v38 }
 0x76f   : > { %5706 = vmatpush3.xpose.msk.msra.mxu0 %vm1893_vm2, %v1936_v38  ;;  %v2597_v38 = vunpack.c.l.s4 %v7609_v37  ;;  %v6120_v37 = vpack.c.bf16 %v2965_v34, %v2964_v33  ;;  %v2884_v33 = vld [vmem:[#allocation19 + $0x78] sm:$0xff] }
 0x770   : > { %6068 = vmatprep.subr.bf16.mxu0 %v7603_v0 }
 0x785   : > { %v1923_v39 = vpop.xlane.xlu0 %1922 }
 0x786   : > { %6693 = vrcp.f32 %v1923_v39  ;;  %v1954_v40 = vpop.trf.xlu1  ;;  %v2599_v39 = vlaneseq }
 0x787   : > { %5691 = vmatprep.mubr.msk.f32.mxu1 %vm1893_vm2, %v1954_v40 }
 0x789   : > { %v1929_v41 = vpop.xlane.xlu0 %1928 }
 0x78a   : > { %6695 = vrcp.f32 %v1929_v41  ;;  %v1955_v42 = vpop.trf.xlu1  ;;  %v7610_v41 = vmov 1934713408  }
 0x78b   : > { %5692 = vmatmul.mubr.msk.f32.vlgmr.msra.gmra.mrb[10].mxu1 %vm1893_vm2, %v1955_v42  ;;  %v2629_v42 = vunpack.c.l.s4 %v7610_v41  ;;  %v2967_v41 = vld [vmem:[#allocation22 + $0x28] sm:$0xff] }
 0x78e   : > { %v1956_v43 = vpop.trf.xlu1 }
 0x78f   : > { %5694 = vmatprep.mubr.msk.f32.mxu1 %vm1893_vm2, %v1956_v43  ;;  %v2598_v43 = vunpack.c.0.s8 %v2597_v38  ;;  %v8625_v38 = vld [vmem:[%s8421_s27] sm:$0xff] }
 0x790   : > { %v6694_v44 = vpop.eup %6693 }
 0x791   : > { %v1935_v45 = vmul.f32 %v6694_v44, %v6686_v26  ;;  %v6078_v26 = vpack.c.bf16 %v2754_v25, %v2753_v24  ;;  %v8595_v44 = vshrl.u32 %v2599_v39, 7 }
 0x792   : > { %v1957_v46 = vpop.trf.xlu1 }
 0x793   : > { %5697 = vmatprep.subr.msk.mxu1 %vm1893_vm2, %v1935_v45  ;;  %5695 = vmatmul.mubr.msk.f32.gmra.mrb[12].mxu1 %vm1893_vm2, %v1957_v46  ;;  %v2630_v46 = vunpack.c.0.s8 %v2629_v42 }
 0x794   : > { %v6696_v47 = vpop.eup %6695  ;;  %5698 = vmatpush3.xpose.msk.msra.mxu1 %vm1893_vm2, %v1935_v45 }
 0x795   : > { %v1937_v48 = vmul.f32 %v6696_v47, %v6688_v28  ;;  %v2756_v28 = vld [vmem:[#allocation16 + $0x48] sm:$0xff]  ;;  %v8598_v47 = vsub.s32 %v2598_v43, %v8595_v44  ;;  %v2968_v43 = vld [vmem:[#allocation22 + $0x30] sm:$0xff] }
 0x796   : > { %v2050_v50 = vpop.trf.xlu1  ;;  %v6081_v29 = vpack.c.bf16 %v2756_v28, %v2755_v27 }
 0x797   : > { %5713 = vmatprep.subr.msk.mxu1 %vm1893_vm2, %v1937_v48 }
 0x79a   : > { %v2051_v52 = vpop.trf.xlu1 }
 0x79e   : > { %v2052_v55 = vpop.trf.xlu1 }
 0x7a2   : > { %v2053_v56 = vpop.trf.xlu1 }
 0x7a9   : > { %v1986_v49 = vpop.trf.xlu0 }
 0x7aa   : > { %5699 = vmatprep.mubr.msk.f32.mxu1 %vm1893_vm2, %v1986_v49 }
 0x7ad   : > { %v1987_v51 = vpop.trf.xlu0 }
 0x7ae   : > { %5700 = vmatmul.mubr.msk.f32.vlgmr.msra.gmra.mrb[14].mxu1 %vm1893_vm2, %v1987_v51 }
 0x7af   : > { %5714 = vmatpush3.xpose.msk.msra.mxu1 %vm1893_vm2, %v1937_v48 }
 0x7b0   : > { %6092 = vmatprep.subr.bf16.mxu1 %v7603_v0 }
 0x7b1   : > { %v1988_v53 = vpop.trf.xlu0 }
 0x7b2   : > { %5702 = vmatprep.mubr.msk.f32.mxu1 %vm1893_vm2, %v1988_v53  ;;  %v8601_v53 = vsub.s32 %v2630_v46, %v8595_v44 }
 0x7b5   : > { %v1989_v54 = vpop.trf.xlu0 }
 0x7b6   : > { %5703 = vmatmul.mubr.msk.f32.gmra.mrb[16].mxu1 %vm1893_vm2, %v1989_v54 }
 0x7b7   : > { %5715 = vmatprep.mubr.msk.f32.mxu1 %vm1893_vm2, %v2050_v50 }
 0x7ba   : > { %5716 = vmatmul.mubr.msk.f32.vlgmr.msra.gmra.mrb[18].mxu1 %vm1893_vm2, %v2051_v52 }
 0x7bb   : > { %5718 = vmatprep.mubr.msk.f32.mxu1 %vm1893_vm2, %v2052_v55 }
 0x7be   : > { %5719 = vmatmul.mubr.msk.f32.gmra.mrb[20].mxu1 %vm1893_vm2, %v2053_v56 }
 0x7bf   : > { %5788 = vmatprep.mubr.msk.f32.mxu1 %vm7604_vm0, %v7605_v1 }
 0x7d5   : > { %v2018_v57 = vpop.trf.xlu0 }
 0x7d6   : > { %5707 = vmatprep.mubr.msk.f32.mxu0 %vm1893_vm2, %v2018_v57 }
 0x7d9   : > { %v2019_v58 = vpop.trf.xlu0 }
 0x7da   : > { %5708 = vmatmul.mubr.msk.f32.vlgmr.msra.gmra.mrb[4].mxu0 %vm1893_vm2, %v2019_v58 }
 0x7db   : > { %6070 = vmatpush3.bf16.msra.mxu0 %v6069_v18 }
 0x7dc   : > { %6071 = vmatprep.subr.bf16.mxu0 %v7603_v0 }
 0x7dd   : > { %v2020_v59 = vpop.trf.xlu0 }
 0x7de   : > { %5710 = vmatprep.mubr.msk.f32.mxu0 %vm1893_vm2, %v2020_v59 }
 0x7df   : > { %6073 = vmatpush3.bf16.msra.mxu0 %v6072_v20 }
 0x7e0   : > { %6074 = vmatprep.subr.bf16.mxu0 %v7603_v0 }
 0x7e1   : > { %v2021_v60 = vpop.trf.xlu0 }
 0x7e2   : > { %5711 = vmatmul.mubr.msk.f32.gmra.mrb[6].mxu0 %vm1893_vm2, %v2021_v60 }
 0x7e3   : > { %5753 = vmatprep.mubr.msk.f32.mxu0 %vm7604_vm0, %v7605_v1  ;;  %6076 = vmatpush3.bf16.msra.mxu0 %v6075_v23 }
 0x7e4   : > { %6077 = vmatprep.subr.bf16.mxu0 %v7603_v0 }
 0x7e7   : > { %6079 = vmatpush3.bf16.msra.mxu0 %v6078_v26 }
 0x7e8   : > { %6080 = vmatprep.subr.bf16.mxu0 %v7603_v0 }
 0x7eb   : > { %6082 = vmatpush3.bf16.msra.mxu0 %v6081_v29 }
 0x7ec   : > { %6083 = vmatprep.subr.bf16.mxu0 %v7603_v0 }
 0x7ef   : > { %6085 = vmatpush3.bf16.msra.mxu0 %v6084_v32 }
 0x7f0   : > { %6086 = vmatprep.subr.bf16.mxu0 %v7603_v0 }
 0x7f3   : > { %6088 = vmatpush3.bf16.msra.mxu0 %v6087_v35 }
 0x7f4   : > { %6089 = vmatprep.subr.bf16.mxu0 %v7603_v0 }
 0x85e   : > { %v5693_v61 = vpop.f32.mrb[10].mxu1 }
 0x85f   : > { %v2147_v62 = vpop.f32.mrb[11].mxu1 }
 0x860   : > { %2466 = vxpose.xlu0.b32.start [1/4] (short) (narrow) %v2147_v62, 8  ;;  %v2761_v62 = vld [vmem:[#allocation16 + $0x70] sm:$0xff] }
 0x864   : > { %2467 = vxpose.xlu0.b32.cont [2/4] (short) (narrow) %v5693_v61, 8 }
 0x866   : > { %v5696_v63 = vpop.f32.mrb[12].mxu1 }
 0x867   : > { %v2157_v2 = vpop.f32.mrb[13].mxu1 }
 0x868   : > { %2468 = vxpose.xlu0.b32.cont [3/4] (short) (narrow) %v2157_v2, 8 }
 0x86c   : > { %2469 = vxpose.xlu0.b32.end [4/4] (short) (narrow) %v5696_v63, 8  ;;  %v2762_v63 = vld [vmem:[#allocation16 + $0x78] sm:$0xff] }
 0x881   : > { %v5701_v3 = vpop.f32.mrb[14].mxu1 }
 0x882   : > { %v2247_v4 = vpop.f32.mrb[15].mxu1 }
 0x883   : > { %2498 = vxpose.xlu1.b32.start [1/4] (short) (narrow) %v2247_v4, 8 }
 0x887   : > { %2499 = vxpose.xlu1.b32.cont [2/4] (short) (narrow) %v5701_v3, 8 }
 0x889   : > { %v5704_v5 = vpop.f32.mrb[16].mxu1 }
 0x88a   : > { %v2257_v6 = vpop.f32.mrb[17].mxu1 }
 0x88b   : > { %2500 = vxpose.xlu1.b32.cont [3/4] (short) (narrow) %v2257_v6, 8  ;;  %v6090_v6 = vpack.c.bf16 %v2762_v63, %v2761_v62  ;;  %v2869_v62 = vld [vmem:[#allocation19] sm:$0xff]  ;;  %v2870_v63 = vld [vmem:[#allocation19 + $0x8] sm:$0xff] }
 0x88d   : > { %v5717_v7 = vpop.f32.mrb[18].mxu1  ;;  %6091 = vmatpush3.bf16.msra.mxu0 %v6090_v6  ;;  %v5246_v6 = vld [vmem:[#allocation17] ss:$0 sm:$0xff] }
 0x88e   : > { %v2447_v8 = vpop.f32.mrb[19].mxu1  ;;  %6117 = vmatprep.subr.bf16.mxu0 %v6116_v17 }
 0x88f   : > { %2501 = vxpose.xlu1.b32.end [4/4] (short) (narrow) %v5704_v5, 8 }
 0x891   : > { %v5720_v9 = vpop.f32.mrb[20].mxu1 }
 0x892   : > { %v2457_v10 = vpop.f32.mrb[21].mxu1 }
 0x893   : > { %2562 = vxpose.xlu1.b32.start [1/4] (short) (narrow) %v2447_v8, 8 }
 0x897   : > { %2563 = vxpose.xlu1.b32.cont [2/4] (short) (narrow) %v5717_v7, 8 }
 0x89b   : > { %2564 = vxpose.xlu1.b32.cont [3/4] (short) (narrow) %v2457_v10, 8 }
 0x89f   : > { %2565 = vxpose.xlu1.b32.end [4/4] (short) (narrow) %v5720_v9, 8 }
 0x8ad   : > { %v5709_v11 = vpop.f32.mrb[4].mxu0 }
 0x8ae   : > { %v2347_v12 = vpop.f32.mrb[5].mxu0 }
 0x8af   : > { %2530 = vxpose.xlu0.b32.start [1/4] (short) (narrow) %v2347_v12, 8 }
 0x8b3   : > { %2531 = vxpose.xlu0.b32.cont [2/4] (short) (narrow) %v5709_v11, 8 }
 0x8b5   : > { %v5712_v13 = vpop.f32.mrb[6].mxu0 }
 0x8b6   : > { %v2357_v14 = vpop.f32.mrb[7].mxu0 }
 0x8b7   : > { %2532 = vxpose.xlu0.b32.cont [3/4] (short) (narrow) %v2357_v14, 8 }
 0x8bb   : > { %2533 = vxpose.xlu0.b32.end [4/4] (short) (narrow) %v5712_v13, 8 }
 0x8e0   : > { %v2482_v40 = vpop.trf.xlu0 }
 0x903   : > { %v2514_v36 = vpop.trf.xlu1 }
 0x913   : > { %v2578_v45 = vpop.trf.xlu1 }
 0x914   : > { %v2610_v48 = vcombine.low %v2514_v36, %v2578_v45  ;;  %v2611_v49 = vcombine.high %v2514_v36, %v2578_v45  ;;  %v2969_v45 = vld [vmem:[#allocation22 + $0x38] sm:$0xff] }
 0x915   : > { %v6128_v46 = vpack.c.bf16 %v2969_v45, %v2968_v43 }
 0x916   : > { %v2618_v54 = vrot.slane %v2610_v48, %v8598_v47  ;;  %v2625_v55 = vrot.slane %v2611_v49, %v8598_v47  ;;  %v2970_v48 = vld [vmem:[#allocation22 + $0x40] sm:$0xff]  ;;  %v2971_v49 = vld [vmem:[#allocation22 + $0x48] sm:$0xff] }
 0x92f   : > { %v2546_v50 = vpop.trf.xlu0 }
 0x930   : > { %v2594_v51 = vcombine.low %v2482_v40, %v2546_v50  ;;  %v2595_v52 = vcombine.high %v2482_v40, %v2546_v50  ;;  %v2966_v40 = vld [vmem:[#allocation22 + $0x20] sm:$0xff]  ;;  %v6132_v50 = vpack.c.bf16 %v2971_v49, %v2970_v48 }
 0x931   : > { %v6124_v42 = vpack.c.bf16 %v2967_v41, %v2966_v40 }
 0x932   : > { %v2602_v56 = vrot.slane %v2594_v51, %v8598_v47  ;;  %v2609_v57 = vrot.slane %v2595_v52, %v8598_v47  ;;  %v2972_v51 = vld [vmem:[#allocation22 + $0x50] sm:$0xff]  ;;  %v2973_v52 = vld [vmem:[#allocation22 + $0x58] sm:$0xff] }
 0x934   : > { %v2626_v58 = vcombine.low %v2602_v56, %v2618_v54  ;;  %v2627_v59 = vcombine.high %v2602_v56, %v2618_v54  ;;  %v2642_v60 = vcombine.low %v2609_v57, %v2625_v55  ;;  %v2643_v61 = vcombine.high %v2609_v57, %v2625_v55  ;;  %v2974_v55 = vld [vmem:[#allocation22 + $0x60] sm:$0xff]  ;;  %v2975_v56 = vld [vmem:[#allocation22 + $0x68] sm:$0xff] }
 0x935   : > { %v6136_v54 = vpack.c.bf16 %v2973_v52, %v2972_v51  ;;  %v6140_v57 = vpack.c.bf16 %v2975_v56, %v2974_v55  ;;  %v5247_v56 = vld [vmem:[#allocation31] ss:$0 sm:$0xff] }
 0x936   : > { %v2634_v2 = vrot.slane %v2626_v58, %v8601_v53  ;;  %v2641_v3 = vrot.slane %v2627_v59, %v8601_v53  ;;  %v2650_v4 = vrot.slane %v2642_v60, %v8601_v53  ;;  %v2657_v5 = vrot.slane %v2643_v61, %v8601_v53  ;;  %v2976_v58 = vld [vmem:[#allocation22 + $0x70] sm:$0xff]  ;;  %v2977_v59 = vld [vmem:[#allocation22 + $0x78] sm:$0xff] }
 0x937   : > { %v6144_v60 = vpack.c.bf16 %v2977_v59, %v2976_v58  ;;  %v8630_v61 = vld [vmem:[%s8421_s27 + $0x8] sm:$0xf]  ;;  %v5248_v58 = vld [vmem:[#allocation32] ss:$0 sm:$0xff]  ;;  %v3062_v59 = vld [vmem:[#allocation25 + $0x10] sm:$0xff] }
 0x938   : > { %v2662_v7 = vcombine.low %v2634_v2, %v2641_v3  ;;  %v5244_v8 = vcombine.high %v2634_v2, %v2641_v3  ;;  %v2678_v9 = vcombine.low %v2650_v4, %v2657_v5  ;;  %v5245_v10 = vcombine.high %v2650_v4, %v2657_v5  ;;  %v2871_v2 = vld [vmem:[#allocation19 + $0x10] sm:$0xff]  ;;  %v2872_v4 = vld [vmem:[#allocation19 + $0x18] sm:$0xff] }
 0x939   : > { %v6093_v3 = vpack.c.bf16 %v2870_v63, %v2869_v62  ;;  %v6096_v5 = vpack.c.bf16 %v2872_v4, %v2871_v2  ;;  %v3065_v4 = vld [vmem:[#allocation25 + $0x28] sm:$0xff] }
 0x93a   : > { %v2669_v11 = vrot.slane %v2662_v7, %v8598_v47  ;;  %v2677_v12 = vrot.slane %v5244_v8, %v8598_v47  ;;  %v2685_v13 = vrot.slane %v2678_v9, %v8598_v47  ;;  %v2693_v14 = vrot.slane %v5245_v10, %v8598_v47 }
 0x93b   : > { %6094 = vmatpush3.bf16.msra.mxu1 %v6093_v3  ;;  %v3064_v3 = vld [vmem:[#allocation25 + $0x20] sm:$0xff] }
 0x93c   : > { %v2695_v18 = vcombine.high %v2669_v11, %v2677_v12  ;;  %v2711_v19 = vcombine.high %v2685_v13, %v2693_v14  ;;  %v2694_v20 = vcombine.low %v2669_v11, %v2677_v12  ;;  %v2710_v21 = vcombine.low %v2685_v13, %v2693_v14  ;;  %6095 = vmatprep.subr.bf16.mxu1 %v7603_v0  ;;  %v2873_v11 = vld [vmem:[#allocation19 + $0x20] sm:$0xff]  ;;  %v2874_v12 = vld [vmem:[#allocation19 + $0x28] sm:$0xff]  ;;  %v2875_v14 = vld [vmem:[#allocation19 + $0x30] sm:$0xff] }
 0x93d   : > { %v6099_v13 = vpack.c.bf16 %v2874_v12, %v2873_v11  ;;  %v6102_v16 = vpack.c.bf16 %v2876_v15, %v2875_v14  ;;  %v3070_v12 = vld [vmem:[#allocation25 + $0x50] sm:$0xff]  ;;  %v3072_v15 = vld [vmem:[#allocation25 + $0x60] sm:$0xff] }
 0x93e   : > { %v2709_v22 = vrot.slane %v2695_v18, %v8601_v53  ;;  %v2725_v23 = vrot.slane %v2711_v19, %v8601_v53  ;;  %v2702_v24 = vrot.slane %v2694_v20, %v8601_v53  ;;  %v2718_v25 = vrot.slane %v2710_v21, %v8601_v53  ;;  %v2878_v18 = vld [vmem:[#allocation19 + $0x48] sm:$0xff]  ;;  %v2879_v20 = vld [vmem:[#allocation19 + $0x50] sm:$0xff]  ;;  %v2880_v21 = vld [vmem:[#allocation19 + $0x58] sm:$0xff] }
 0x93f   : > { %6097 = vmatpush3.bf16.msra.mxu1 %v6096_v5  ;;  %v6156_v5 = vpack.c.bf16 %v3065_v4, %v3064_v3 }
 0x940   : > { %v2728_v26 = vcombine.low %v2709_v22, %v2725_v23  ;;  %v2727_v27 = vcombine.high %v2702_v24, %v2718_v25  ;;  %v2726_v28 = vcombine.low %v2702_v24, %v2718_v25  ;;  %v2729_v29 = vcombine.high %v2709_v22, %v2725_v23  ;;  %6098 = vmatprep.subr.bf16.mxu1 %v7603_v0  ;;  %v5250_v22 = vld [vmem:[#allocation23] ss:$0 sm:$0xff] }
 0x941   : > { %v6108_v23 = vpack.c.bf16 %v2880_v21, %v2879_v20 }
 0x942   : > { %2735 = vrot.lane.b32.xlu1 %v2728_v26, %s7608_s2  ;;  %2731 = vrot.lane.b32.xlu0 %v2727_v27, %s7606_s6  ;;  %v2881_v27 = vld [vmem:[#allocation19 + $0x60] sm:$0xff] }
 0x943   : > { %6100 = vmatpush3.bf16.msra.mxu1 %v6099_v13  ;;  %v3071_v13 = vld [vmem:[#allocation25 + $0x58] sm:$0xff] }
 0x944   : > { %6101 = vmatprep.subr.bf16.mxu1 %v7603_v0  ;;  %v6168_v14 = vpack.c.bf16 %v3071_v13, %v3070_v12 }
 0x946   : > { %2739 = vrot.lane.b32.xlu1 %v2729_v29, %s7607_s4 }
 0x947   : > { %6103 = vmatpush3.bf16.msra.mxu1 %v6102_v16  ;;  %v3073_v16 = vld [vmem:[#allocation25 + $0x68] sm:$0xff] }
 0x948   : > { %6104 = vmatprep.subr.bf16.mxu1 %v7603_v0 }
 0x9b4   : > { %v2736_v30 = vpop.permute.xlu1 %2735  ;;  %v2732_v31 = vpop.permute.xlu0 %2731 }
 0x9b5   : > { %v2742_v32 = vsel %vm1604_vm1, %v2726_v28, %v2732_v31  ;;  %v2882_v28 = vld [vmem:[#allocation19 + $0x68] sm:$0xff] }
 0x9b6   : > { %v2744_v36 = vsel %vm2743_vm3, %v2742_v32, %v2736_v30  ;;  %v6111_v30 = vpack.c.bf16 %v2882_v28, %v2881_v27  ;;  %v2883_v32 = vld [vmem:[#allocation19 + $0x70] sm:$0xff] }
 0x9b7   : > { %v6114_v34 = vpack.c.bf16 %v2884_v33, %v2883_v32  ;;  %v5249_v32 = vld [vmem:[#allocation20] ss:$0 sm:$0xff] }
 0x9b8   : > { %v2740_v35 = vpop.permute.xlu1 %2739 }
 0x9b9   : > { %v2746_v39 = vsel %vm2745_vm4, %v2744_v36, %v2740_v35  ;;  %v3060_v35 = vld [vmem:[#allocation25] sm:$0xff]  ;;  %v3061_v36 = vld [vmem:[#allocation25 + $0x8] sm:$0xff] }
 0x9ba   : > { %5754 = vmatmul.mubr.f32.vlgmr.msra.gmra.mrb[8].mxu0 %v2746_v39 }
 0x9bb   : > { %6119 = vmatpush3.bf16.msra.mxu0 %v6116_v17  ;;  %5823 = vmatprep.mubr.f32.mxu0 %v8625_v38  ;;  %v2877_v17 = vld [vmem:[#allocation19 + $0x40] sm:$0xff] }
 0x9bc   : > { %6121 = vmatprep.subr.bf16.mxu0 %v6120_v37  ;;  %v6105_v19 = vpack.c.bf16 %v2878_v18, %v2877_v17  ;;  %v3074_v17 = vld [vmem:[#allocation25 + $0x70] sm:$0xff]  ;;  %v3075_v18 = vld [vmem:[#allocation25 + $0x78] sm:$0xff] }
 0x9be   : > { %6106 = vmatpush3.bf16.msra.mxu1 %v6105_v19  ;;  %v6176_v19 = vpack.c.bf16 %v3075_v18, %v3074_v17 }
 0x9bf   : > { %6123 = vmatpush3.bf16.msra.mxu0 %v6120_v37  ;;  %6107 = vmatprep.subr.bf16.mxu1 %v7603_v0  ;;  %v6148_v37 = vpack.c.bf16 %v3061_v36, %v3060_v35 }
 0x9c0   : > { %6125 = vmatprep.subr.bf16.mxu0 %v6124_v42 }
 0x9c2   : > { %6109 = vmatpush3.bf16.msra.mxu1 %v6108_v23 }
 0x9c3   : > { %6127 = vmatpush3.bf16.msra.mxu0 %v6124_v42  ;;  %6110 = vmatprep.subr.bf16.mxu1 %v7603_v0 }
 0x9c4   : > { %6129 = vmatprep.subr.bf16.mxu0 %v6128_v46 }
 0x9c6   : > { %6112 = vmatpush3.bf16.msra.mxu1 %v6111_v30 }
 0x9c7   : > { %6131 = vmatpush3.bf16.msra.mxu0 %v6128_v46  ;;  %6113 = vmatprep.subr.bf16.mxu1 %v7603_v0 }
 0x9c8   : > { %6133 = vmatprep.subr.bf16.mxu0 %v6132_v50 }
 0x9ca   : > { %6115 = vmatpush3.bf16.msra.mxu1 %v6114_v34 }
 0x9cb   : > { %6135 = vmatpush3.bf16.msra.mxu0 %v6132_v50  ;;  %6149 = vmatprep.subr.bf16.mxu1 %v6148_v37 }
 0x9cc   : > { %6137 = vmatprep.subr.bf16.mxu0 %v6136_v54 }
 0x9cf   : > { %6139 = vmatpush3.bf16.msra.mxu0 %v6136_v54 }
 0x9d0   : > { %6141 = vmatprep.subr.bf16.mxu0 %v6140_v57 }
 0x9d3   : > { %6143 = vmatpush3.bf16.msra.mxu0 %v6140_v57 }
 0x9d4   : > { %6145 = vmatprep.subr.bf16.mxu0 %v6144_v60 }
 0x9d7   : > { %6147 = vmatpush3.bf16.msra.mxu0 %v6144_v60  ;;  %v3063_v60 = vld [vmem:[#allocation25 + $0x18] sm:$0xff] }
 0x9d8   : > { %6192 = vmatprep.subr.bf16.mxu0 %v7603_v0  ;;  %v6152_v2 = vpack.c.bf16 %v3063_v60, %v3062_v59 }
 0x9da   : > { %5824 = vmatmul.mubr.f32.vlgmr.msra.gmra.mrb[10].mxu0 %v8630_v61 }
 0x9db   : > { %5891 = vmatprep.mubr.msk.f32.mxu0 %vm7604_vm0, %v7605_v1 }
 0xa8d   : > { %v2836_v7 = vpop.f32.mrb[8].mxu0 }
 0xa8e   : > { %v8638_v8 = vadd.f32 %v5246_v6, %v2836_v7  ;;  %v5755_v9 = vpop.f32.mrb[9].mxu0  ;;  %v3066_v6 = vld [vmem:[#allocation25 + $0x30] sm:$0xff]  ;;  %v3067_v7 = vld [vmem:[#allocation25 + $0x38] sm:$0xff] }
 0xa8f   : > { %v3068_v9 = vld [vmem:[#allocation25 + $0x40] sm:$0xff] }
 0xa90   : > { %2842 = vadd.xlane.f32.xlu1 %v8638_v8  ;;  %v2844_v10 = vmul.f32 %v8638_v8, %v8638_v8 }
 0xa92   : > { %2845 = vadd.xlane.f32.xlu0 %v2844_v10  ;;  %v3069_v10 = vld [vmem:[#allocation25 + $0x48] sm:$0xff] }
 0xa93   : > { %v6164_v11 = vpack.c.bf16 %v3069_v10, %v3068_v9 }
 0xaad   : > { %v5825_v24 = vpop.f32.mrb[10].mxu0 }
 0xaae   : > { %v3057_v25 = vadd.f32 %v5825_v24, %v5250_v22  ;;  %v3051_v26 = vpop.f32.mrb[11].mxu0 }
 0xaaf   : > { %v3052_v29 = vadd.f32 %v5250_v22, %v3051_v26 }
 0xab1   : > { %v6618_v31 = vpack.i.bf16 %v3057_v25, %v3052_v29 }
 0xab3   : > { %6619 = vrot.lane.b32.xlu0 %v6618_v31, %s7607_s4  ;;  %6624 = vrot.lane.b32.xlu1 %v6618_v31, %s7608_s2 }
 0xab7   : > { %6629 = vrot.lane.b32.xlu1 %v6618_v31, %s7606_s6 }
 0xb1d   : > { %v2843_v39 = vpop.xlane.xlu1 %2842 }
 0xb1e   : > { %v2847_v40 = vmul.f32 0.0078125, %v2843_v39 }
 0xb1f   : > { %v2846_v41 = vpop.xlane.xlu0 %2845 }
 0xb20   : > { %v2849_v42 = vmul.f32 %v2847_v40, %v2847_v40  ;;  %v2848_v43 = vmul.f32 0.0078125, %v2846_v41  ;;  %v2851_v54 = vsub.f32 %v8638_v8, %v2847_v40  ;;  %v6160_v8 = vpack.c.bf16 %v3067_v7, %v3066_v6 }
 0xb22   : > { %v2850_v45 = vsub.f32 %v2848_v43, %v2849_v42 }
 0xb24   : > { %v2852_v46 = vadd.f32 1e-05, %v2850_v45 }
 0xb25   : > { %v6620_v48 = vpop.permute.xlu0 %6619  ;;  %v6625_v40 = vpop.permute.xlu1 %6624 }
 0xb26   : > { %6697 = vrsqrt.f32 %v2852_v46  ;;  %v6622_v49 = vunpack.i.h.bf16 %v6620_v48  ;;  %v6621_v50 = vunpack.i.l.bf16 %v6620_v48  ;;  %v6626_v42 = vunpack.i.l.bf16 %v6625_v40 }
 0xb27   : > { %v6627_v45 = vunpack.i.h.bf16 %v6625_v40 }
 0xb28   : > { %v6633_v51 = vpack.i.bf16 %v6621_v50, %v3052_v29  ;;  %v6635_v52 = vpack.i.bf16 %v6622_v49, %v3057_v25 }
 0xb29   : > { %v6630_v41 = vpop.permute.xlu1 %6629 }
 0xb2a   : > { %6634 = vxpose.xlu0.b32.start [1/2] (short) (narrow) %v6633_v51, 32  ;;  %v6631_v43 = vunpack.i.l.bf16 %v6630_v41  ;;  %v6632_v46 = vunpack.i.h.bf16 %v6630_v41 }
 0xb2c   : > { %v6657_v48 = vpack.i.bf16 %v6631_v43, %v6626_v42  ;;  %v6659_v49 = vpack.i.bf16 %v6632_v46, %v6627_v45 }
 0xb2e   : > { %6636 = vxpose.xlu0.b32.end [2/2] (short) (narrow) %v6635_v52, 32 }
 0xb30   : > { %v6698_v55 = vpop.eup %6697 }
 0xb31   : > { %v2854_v57 = vmul.f32 %v6698_v55, %v2851_v54 }
 0xb33   : > { %v2861_v62 = vmul.f32 %v5247_v56, %v2854_v57 }
 0xb35   : > { %v2868_v63 = vadd.f32 %v5248_v58, %v2861_v62 }
 0xb37   : > { %5789 = vmatmul.mubr.f32.vlgmr.msra.gmra.mrb[22].mxu1 %v2868_v63 }
 0xb38   : > { %6151 = vmatpush3.bf16.msra.mxu1 %v6148_v37  ;;  %5858 = vmatprep.mubr.f32.mxu1 %v8625_v38  ;;  %v6172_v38 = vpack.c.bf16 %v3073_v16, %v3072_v15 }
 0xb39   : > { %6153 = vmatprep.subr.bf16.mxu1 %v6152_v2 }
 0xb3c   : > { %6155 = vmatpush3.bf16.msra.mxu1 %v6152_v2 }
 0xb3d   : > { %6157 = vmatprep.subr.bf16.mxu1 %v6156_v5 }
 0xb40   : > { %6159 = vmatpush3.bf16.msra.mxu1 %v6156_v5 }
 0xb41   : > { %6161 = vmatprep.subr.bf16.mxu1 %v6160_v8 }
 0xb44   : > { %6163 = vmatpush3.bf16.msra.mxu1 %v6160_v8 }
 0xb45   : > { %6165 = vmatprep.subr.bf16.mxu1 %v6164_v11 }
 0xb48   : > { %6167 = vmatpush3.bf16.msra.mxu1 %v6164_v11 }
 0xb49   : > { %6169 = vmatprep.subr.bf16.mxu1 %v6168_v14 }
 0xb4c   : > { %6171 = vmatpush3.bf16.msra.mxu1 %v6168_v14 }
 0xb4d   : > { %6173 = vmatprep.subr.bf16.mxu1 %v6172_v38 }
 0xb50   : > { %6175 = vmatpush3.bf16.msra.mxu1 %v6172_v38  ;;  %v5251_v38 = vld [vmem:[#allocation26] ss:$0 sm:$0xff] }
 0xb51   : > { %6177 = vmatprep.subr.bf16.mxu1 %v6176_v19 }
 0xb54   : > { %6179 = vmatpush3.bf16.msra.mxu1 %v6176_v19 }
 0xb55   : > { %6180 = vmatprep.subr.bf16.mxu1 %v7603_v0 }
 0xb57   : > { %5859 = vmatmul.mubr.f32.vlgmr.msra.gmra.mrb[24].mxu1 %v8630_v61 }
 0xb58   : > { %5869 = vmatprep.mubr.msk.f32.mxu1 %vm7604_vm0, %v7605_v1 }
 0xbaa   : > { %v6637_v20 = vpop.trf.xlu0 }
 0xbab   : > { %v6638_v21 = vunpack.i.l.bf16 %v6637_v20  ;;  %v6641_v61 = vunpack.i.h.bf16 %v6637_v20 }
 0xbae   : > { %v6642_v22 = vpop.trf.xlu0 }
 0xbaf   : > { %v6643_v23 = vunpack.i.l.bf16 %v6642_v22  ;;  %v6646_v30 = vunpack.i.h.bf16 %v6642_v22 }
 0xbb1   : > { %v6181_v24 = vpack.c.bf16 %v6643_v23, %v6638_v21  ;;  %v6187_v31 = vpack.c.bf16 %v6646_v30, %v6641_v61 }
 0xbb2   : > { %v6647_v25 = vpop.trf.xlu0 }
 0xbb3   : > { %6182 = vmatpush3.bf16.msra.mxu1 %v6181_v24  ;;  %v6648_v26 = vunpack.i.l.bf16 %v6647_v25  ;;  %v6651_v33 = vunpack.i.h.bf16 %v6647_v25 }
 0xbb4   : > { %6183 = vmatprep.subr.bf16.mxu1 %v7603_v0 }
 0xbb6   : > { %v6652_v27 = vpop.trf.xlu0 }
 0xbb7   : > { %v6653_v28 = vunpack.i.l.bf16 %v6652_v27  ;;  %v6656_v34 = vunpack.i.h.bf16 %v6652_v27 }
 0xbb9   : > { %v6184_v29 = vpack.c.bf16 %v6653_v28, %v6648_v26  ;;  %v6190_v39 = vpack.c.bf16 %v6656_v34, %v6651_v33 }
 0xbbb   : > { %6185 = vmatpush3.bf16.msra.mxu1 %v6184_v29 }
 0xbbc   : > { %6186 = vmatprep.subr.bf16.mxu1 %v7603_v0 }
 0xc0a   : > { %v2958_v35 = vpop.f32.mrb[22].mxu1 }
 0xc0b   : > { %v2959_v36 = vadd.f32 %v5249_v32, %v2958_v35  ;;  %v5790_v37 = vpop.f32.mrb[23].mxu1 }
 0xc0d   : > { %3159 = vrot.lane.b32.xlu1 %v2959_v36, %s7607_s4  ;;  %5870 = vmatmul.mubr.msk.f32.vlgmr.msra.gmra.mrb[26].mxu1 %vm1604_vm1, %v2959_v36 }
 0xc0e   : > { %6188 = vmatpush3.bf16.msra.mxu1 %v6187_v31  ;;  %5880 = vmatprep.mubr.msk.f32.mxu1 %vm7604_vm0, %v7605_v1 }
 0xc0f   : > { %6189 = vmatprep.subr.bf16.mxu1 %v7603_v0 }
 0xc11   : > { %3161 = vrot.lane.b32.xlu1 %v2959_v36, %s7608_s2 }
 0xc12   : > { %6191 = vmatpush3.bf16.msra.mxu1 %v6190_v39 }
 0xc13   : > { %6198 = vmatprep.subr.bf16.mxu1 %v7603_v0 }
 0xc15   : > { %3163 = vrot.lane.b32.xlu1 %v2959_v36, %s7606_s6 }
 0xc2a   : > { %v5860_v50 = vpop.f32.mrb[24].mxu1 }
 0xc2b   : > { %v3149_v51 = vpop.f32.mrb[25].mxu1  ;;  %v3155_v17 = vadd.f32 %v5860_v50, %v5251_v38 }
 0xc2c   : > { %v3150_v18 = vadd.f32 %v5251_v38, %v3149_v51 }
 0xc3e   : > { %6658 = vxpose.xlu1.b32.start [1/2] (short) (narrow) %v6657_v48, 32 }
 0xc42   : > { %6660 = vxpose.xlu1.b32.end [2/2] (short) (narrow) %v6659_v49, 32 }
 0xc7f   : > { %v3160_v52 = vpop.permute.xlu1 %3159 }
 0xc80   : > { %5881 = vmatmul.mubr.msk.f32.vlgmr.msra.gmra.mrb[28].mxu1 %vm1604_vm1, %v3160_v52 }
 0xc81   : > { %5902 = vmatprep.mubr.msk.f32.mxu1 %vm7604_vm0, %v7605_v1 }
 0xc83   : > { %v3162_v54 = vpop.permute.xlu1 %3161 }
 0xc87   : > { %v3164_v55 = vpop.permute.xlu1 %3163 }
 0xcbe   : > { %v6661_v56 = vpop.trf.xlu1 }
 0xcbf   : > { %v6665_v57 = vunpack.i.h.bf16 %v6661_v56  ;;  %v6662_v58 = vunpack.i.l.bf16 %v6661_v56 }
 0xcc2   : > { %v6666_v59 = vpop.trf.xlu1 }
 0xcc3   : > { %v6670_v60 = vunpack.i.h.bf16 %v6666_v59  ;;  %v6667_v62 = vunpack.i.l.bf16 %v6666_v59 }
 0xcc5   : > { %v6193_v63 = vpack.c.bf16 %v6667_v62, %v6662_v58  ;;  %v6199_v2 = vpack.c.bf16 %v6670_v60, %v6665_v57 }
 0xcc6   : > { %v6671_v3 = vpop.trf.xlu1 }
 0xcc7   : > { %6194 = vmatpush3.bf16.msra.mxu0 %v6193_v63  ;;  %6200 = vmatpush3.bf16.msra.mxu1 %v6199_v2  ;;  %v6675_v4 = vunpack.i.h.bf16 %v6671_v3  ;;  %v6672_v5 = vunpack.i.l.bf16 %v6671_v3 }
 0xcc8   : > { %6195 = vmatprep.subr.bf16.mxu0 %v7603_v0  ;;  %6201 = vmatprep.subr.bf16.mxu1 %v7603_v0 }
 0xcca   : > { %v6676_v6 = vpop.trf.xlu1 }
 0xccb   : > { %v6680_v7 = vunpack.i.h.bf16 %v6676_v6  ;;  %v6677_v8 = vunpack.i.l.bf16 %v6676_v6 }
 0xccd   : > { %v6196_v9 = vpack.c.bf16 %v6677_v8, %v6672_v5  ;;  %v6202_v10 = vpack.c.bf16 %v6680_v7, %v6675_v4 }
 0xccf   : > { %6197 = vmatpush3.bf16.msra.mxu0 %v6196_v9  ;;  %6203 = vmatpush3.bf16.msra.mxu1 %v6202_v10 }
 0xcd2   : > { %5892 = vmatmul.mubr.msk.f32.vlgmr.msra.gmra.mrb[12].mxu0 %vm1604_vm1, %v3162_v54  ;;  %5903 = vmatmul.mubr.msk.f32.vlgmr.msra.gmra.mrb[30].mxu1 %vm1604_vm1, %v3164_v55 }
 0xce0   : > { %v3401_v11 = vpop.f32.mrb[26].mxu1 }
 0xce1   : > { %v5871_v12 = vpop.f32.mrb[27].mxu1  ;;  %v3622_v13 = vsel %vm3621_vm5, %v3401_v11, -inf }
 0xce2   : > { %3623 = vmax.xlane.f32.xlu0 %v3622_v13 }
 0xd53   : > { %v3473_v14 = vpop.f32.mrb[28].mxu1 }
 0xd54   : > { %v5882_v15 = vpop.f32.mrb[29].mxu1  ;;  %v3625_v16 = vsel %vm3621_vm5, %v3473_v14, -inf }
 0xd55   : > { %3626 = vmax.xlane.f32.xlu1 %v3625_v16 }
 0xd66   : > { %3189 = vrot.lane.b32.xlu1 %v3155_v17, %s7607_s4 }
 0xd6a   : > { %3199 = vrot.lane.b32.xlu1 %v3150_v18, %s7606_s6 }
 0xd6e   : > { %3201 = vrot.lane.b32.xlu1 %v3155_v17, %s7606_s6 }
 0xd6f   : > { %v3624_v61 = vpop.xlane.xlu0 %3623 }
 0xd70   : > { %v3634_v30 = vsub.f32 %v3401_v11, %v3624_v61 }
 0xd72   : > { %v3638_v31 = vmul.f32 1.442695, %v3634_v30 }
 0xda5   : > { %v3545_v19 = vpop.f32.mrb[12].mxu0  ;;  %v3617_v20 = vpop.f32.mrb[30].mxu1 }
 0xda6   : > { %v5893_v21 = vpop.f32.mrb[13].mxu0  ;;  %v5904_v22 = vpop.f32.mrb[31].mxu1  ;;  %v3628_v23 = vsel %vm3621_vm5, %v3545_v19, -inf  ;;  %v3631_v24 = vsel %vm3621_vm5, %v3617_v20, -inf }
 0xda7   : > { %3629 = vmax.xlane.f32.xlu0 %v3628_v23 }
 0xdab   : > { %3632 = vmax.xlane.f32.xlu0 %v3631_v24 }
 0xdd8   : > { %3666 = vxpose.xlu0.b32.start [1/2] (short) (narrow) %v3150_v18, 32 }
 0xddc   : > { %3667 = vxpose.xlu0.b32.end [2/2] (short) (narrow) %v3155_v17, 32 }
 0xde2   : > { %v3627_v25 = vpop.xlane.xlu1 %3626 }
 0xde3   : > { %v3635_v26 = vsub.f32 %v3473_v14, %v3627_v25 }
 0xde5   : > { %v3640_v27 = vmul.f32 1.442695, %v3635_v26 }
 0xde6   : > { %v3190_v49 = vpop.permute.xlu1 %3189 }
 0xde7   : > { %6699 = vpow2.f32 %v3640_v27 }
 0xde8   : > { %6701 = vpow2.f32 %v3638_v31 }
 0xdea   : > { %v3200_v51 = vpop.permute.xlu1 %3199 }
 0xdee   : > { %v3202_v54 = vpop.permute.xlu1 %3201 }
 0xdf1   : > { %v6700_v28 = vpop.eup %6699 }
 0xdf2   : > { %v3649_v29 = vsel %vm3621_vm5, %v6700_v28, 0.0  ;;  %v6702_v32 = vpop.eup %6701 }
 0xdf3   : > { %3650 = vadd.xlane.f32.xlu1 %v3649_v29  ;;  %v3646_v33 = vsel %vm3621_vm5, %v6702_v32, 0.0 }
 0xe0d   : > { %3187 = vrot.lane.b32.xlu0 %v3150_v18, %s7607_s4 }
 0xe11   : > { %3193 = vrot.lane.b32.xlu0 %v3150_v18, %s7608_s2 }
 0xe15   : > { %3195 = vrot.lane.b32.xlu0 %v3155_v17, %s7608_s2 }
 0xe34   : > { %v3630_v34 = vpop.xlane.xlu0 %3629  ;;  %3647 = vadd.xlane.f32.xlu0 %v3646_v33 }
 0xe35   : > { %v3636_v35 = vsub.f32 %v3545_v19, %v3630_v34  ;;  %v4473_v34 = vld [vmem:[#allocation28] sm:$0xff] }
 0xe37   : > { %v3642_v36 = vmul.f32 1.442695, %v3636_v35  ;;  %v4474_v35 = vld [vmem:[#allocation28 + $0x8] sm:$0xff] }
 0xe38   : > { %v3633_v37 = vpop.xlane.xlu0 %3632 }
 0xe39   : > { %6703 = vpow2.f32 %v3642_v36  ;;  %v3637_v39 = vsub.f32 %v3617_v20, %v3633_v37  ;;  %v4475_v36 = vld [vmem:[#allocation28 + $0x10] sm:$0xff]  ;;  %v6205_v37 = vpack.c.bf16 %v4474_v35, %v4473_v34 }
 0xe3b   : > { %v3644_v40 = vmul.f32 1.442695, %v3637_v39  ;;  %v4476_v39 = vld [vmem:[#allocation28 + $0x18] sm:$0xff] }
 0xe3d   : > { %6705 = vpow2.f32 %v3644_v40  ;;  %v6208_v40 = vpack.c.bf16 %v4476_v39, %v4475_v36  ;;  %v4570_v36 = vld [vmem:[#allocation37 + $0x20] sm:$0xff] }
 0xe43   : > { %v6704_v41 = vpop.eup %6703 }
 0xe44   : > { %v3652_v42 = vsel %vm3621_vm5, %v6704_v41, 0.0 }
 0xe45   : > { %3653 = vadd.xlane.f32.xlu0 %v3652_v42  ;;  %v4478_v42 = vld [vmem:[#allocation28 + $0x28] sm:$0xff] }
 0xe47   : > { %v6706_v43 = vpop.eup %6705 }
 0xe48   : > { %v3655_v45 = vsel %vm3621_vm5, %v6706_v43, 0.0 }
 0xe49   : > { %3656 = vadd.xlane.f32.xlu1 %v3655_v45  ;;  %v4479_v45 = vld [vmem:[#allocation28 + $0x30] sm:$0xff] }
 0xe58   : > { %v3682_v46 = vpop.trf.xlu0 }
 0xe59   : > { %5907 = vmatprep.mubr.msk.f32.mxu0 %vm3621_vm5, %v3682_v46  ;;  %v4480_v46 = vld [vmem:[#allocation28 + $0x38] sm:$0xff] }
 0xe5c   : > { %v3683_v48 = vpop.trf.xlu0 }
 0xe60   : > { %v3684_v50 = vpop.trf.xlu0 }
 0xe64   : > { %v3685_v52 = vpop.trf.xlu0 }
 0xe7f   : > { %v3188_v55 = vpop.permute.xlu0 %3187 }
 0xe80   : > { %v3651_v56 = vpop.xlane.xlu1 %3650  ;;  %3698 = vxpose.xlu1.b32.start [1/2] (short) (narrow) %v3188_v55, 32 }
 0xe81   : > { %6707 = vrcp.f32 %v3651_v56  ;;  %v4485_v56 = vld [vmem:[#allocation28 + $0x60] sm:$0xff] }
 0xe83   : > { %v3194_v57 = vpop.permute.xlu0 %3193 }
 0xe84   : > { %3699 = vxpose.xlu1.b32.end [2/2] (short) (narrow) %v3190_v49, 32  ;;  %3730 = vxpose.xlu0.b32.start [1/2] (short) (narrow) %v3194_v57, 32  ;;  %v4481_v49 = vld [vmem:[#allocation28 + $0x40] sm:$0xff]  ;;  %v4486_v57 = vld [vmem:[#allocation28 + $0x68] sm:$0xff] }
 0xe87   : > { %v3196_v58 = vpop.permute.xlu0 %3195 }
 0xe88   : > { %3731 = vxpose.xlu0.b32.end [2/2] (short) (narrow) %v3196_v58, 32  ;;  %v6223_v58 = vpack.c.bf16 %v4486_v57, %v4485_v56  ;;  %v4579_v56 = vld [vmem:[#allocation37 + $0x68] sm:$0xff]  ;;  %v4581_v57 = vld [vmem:[#allocation37 + $0x78] sm:$0xff] }
 0xe8b   : > { %v6708_v59 = vpop.eup %6707 }
 0xe8c   : > { %v3663_v60 = vmul.f32 %v6708_v59, %v6700_v28 }
 0xe8e   : > { %5913 = vmatprep.subr.msk.mxu1 %vm3621_vm5, %v3663_v60 }
 0xe8f   : > { %5914 = vmatpush3.xpose.msk.msra.mxu1 %vm3621_vm5, %v3663_v60 }
 0xe91   : > { %3762 = vxpose.xlu0.b32.start [1/2] (short) (narrow) %v3200_v51, 32 }
 0xe95   : > { %3763 = vxpose.xlu0.b32.end [2/2] (short) (narrow) %v3202_v54, 32  ;;  %v4484_v54 = vld [vmem:[#allocation28 + $0x58] sm:$0xff] }
 0xec1   : > { %v3648_v62 = vpop.xlane.xlu0 %3647 }
 0xec2   : > { %6709 = vrcp.f32 %v3648_v62 }
 0xecc   : > { %v6710_v63 = vpop.eup %6709 }
 0xecd   : > { %v3662_v2 = vmul.f32 %v6710_v63, %v6702_v32 }
 0xecf   : > { %5905 = vmatprep.subr.msk.mxu0 %vm3621_vm5, %v3662_v2 }
 0xed0   : > { %5906 = vmatpush3.xpose.msk.msra.mxu0 %vm3621_vm5, %v3662_v2 }
 0xed2   : > { %v3654_v3 = vpop.xlane.xlu0 %3653 }
 0xed3   : > { %6711 = vrcp.f32 %v3654_v3  ;;  %5908 = vmatmul.mubr.msk.f32.vlgmr.msra.gmra.mrb[14].mxu0 %vm3621_vm5, %v3683_v48  ;;  %v6214_v48 = vpack.c.bf16 %v4480_v46, %v4479_v45 }
 0xed4   : > { %5910 = vmatprep.mubr.msk.f32.mxu0 %vm3621_vm5, %v3684_v50  ;;  %v4482_v50 = vld [vmem:[#allocation28 + $0x48] sm:$0xff] }
 0xed5   : > { %v6217_v51 = vpack.c.bf16 %v4482_v50, %v4481_v49 }
 0xed6   : > { %v3657_v4 = vpop.xlane.xlu1 %3656 }
 0xed7   : > { %6713 = vrcp.f32 %v3657_v4  ;;  %5911 = vmatmul.mubr.msk.f32.gmra.mrb[16].mxu0 %vm3621_vm5, %v3685_v52  ;;  %v4483_v52 = vld [vmem:[#allocation28 + $0x50] sm:$0xff] }
 0xed8   : > { %v6220_v55 = vpack.c.bf16 %v4484_v54, %v4483_v52  ;;  %v4574_v54 = vld [vmem:[#allocation37 + $0x40] sm:$0xff] }
 0xedd   : > { %v6712_v5 = vpop.eup %6711 }
 0xede   : > { %v3664_v6 = vmul.f32 %v6712_v5, %v6704_v41  ;;  %v4477_v41 = vld [vmem:[#allocation28 + $0x20] sm:$0xff] }
 0xee0   : > { %5921 = vmatprep.subr.msk.mxu0 %vm3621_vm5, %v3664_v6 }
 0xee1   : > { %v6714_v7 = vpop.eup %6713  ;;  %5922 = vmatpush3.xpose.msk.msra.mxu0 %vm3621_vm5, %v3664_v6 }
 0xee2   : > { %v3665_v8 = vmul.f32 %v6714_v7, %v6706_v43  ;;  %6204 = vmatprep.subr.bf16.mxu0 %v7603_v0  ;;  %v6211_v43 = vpack.c.bf16 %v4478_v42, %v4477_v41  ;;  %v4575_v41 = vld [vmem:[#allocation37 + $0x48] sm:$0xff]  ;;  %v4577_v42 = vld [vmem:[#allocation37 + $0x58] sm:$0xff] }
 0xee3   : > { %v6236_v52 = vpack.c.bf16 %v4577_v42, %v4575_v41  ;;  %v4704_v41 = vld [vmem:[#allocation40 + $0xa8] sm:$0xff] }
 0xee4   : > { %5929 = vmatprep.subr.msk.mxu1 %vm3621_vm5, %v3665_v8 }
 0xf00   : > { %v3714_v9 = vpop.trf.xlu1 }
 0xf01   : > { %5915 = vmatprep.mubr.msk.f32.mxu1 %vm3621_vm5, %v3714_v9 }
 0xf04   : > { %v3715_v10 = vpop.trf.xlu1  ;;  %v3746_v11 = vpop.trf.xlu0 }
 0xf05   : > { %5916 = vmatmul.mubr.msk.f32.vlgmr.msra.gmra.mrb[32].mxu1 %vm3621_vm5, %v3715_v10  ;;  %5923 = vmatprep.mubr.msk.f32.mxu0 %vm3621_vm5, %v3746_v11 }
 0xf06   : > { %5930 = vmatpush3.xpose.msk.msra.mxu1 %vm3621_vm5, %v3665_v8 }
 0xf08   : > { %v3716_v12 = vpop.trf.xlu1  ;;  %v3747_v13 = vpop.trf.xlu0 }
 0xf09   : > { %5924 = vmatmul.mubr.msk.f32.vlgmr.msra.gmra.mrb[18].mxu0 %vm3621_vm5, %v3747_v13  ;;  %5918 = vmatprep.mubr.msk.f32.mxu1 %vm3621_vm5, %v3716_v12  ;;  %v4487_v13 = vld [vmem:[#allocation28 + $0x70] sm:$0xff] }
 0xf0a   : > { %6206 = vmatpush3.bf16.msra.mxu0 %v6205_v37  ;;  %v4572_v37 = vld [vmem:[#allocation37 + $0x30] sm:$0xff] }
 0xf0b   : > { %6207 = vmatprep.subr.bf16.mxu0 %v7603_v0 }
 0xf0c   : > { %v3717_v14 = vpop.trf.xlu1  ;;  %v3748_v15 = vpop.trf.xlu0 }
 0xf0d   : > { %5919 = vmatmul.mubr.msk.f32.gmra.mrb[34].mxu1 %vm3621_vm5, %v3717_v14  ;;  %5926 = vmatprep.mubr.msk.f32.mxu0 %vm3621_vm5, %v3748_v15  ;;  %v4488_v14 = vld [vmem:[#allocation28 + $0x78] sm:$0xff] }
 0xf0e   : > { %6209 = vmatpush3.bf16.msra.mxu0 %v6208_v40 }
 0xf0f   : > { %6210 = vmatprep.subr.bf16.mxu0 %v7603_v0 }
 0xf10   : > { %v3749_v16 = vpop.trf.xlu0 }
 0xf11   : > { %5927 = vmatmul.mubr.msk.f32.gmra.mrb[20].mxu0 %vm3621_vm5, %v3749_v16 }
 0xf12   : > { %5969 = vmatprep.mubr.msk.f32.mxu0 %vm7604_vm0, %v7605_v1  ;;  %6212 = vmatpush3.bf16.msra.mxu0 %v6211_v43 }
 0xf13   : > { %6213 = vmatprep.subr.bf16.mxu0 %v7603_v0 }
 0xf14   : > { %v3778_v38 = vpop.trf.xlu0 }
 0xf15   : > { %5931 = vmatprep.mubr.msk.f32.mxu1 %vm3621_vm5, %v3778_v38 }
 0xf16   : > { %6215 = vmatpush3.bf16.msra.mxu0 %v6214_v48  ;;  %v6234_v48 = vpack.c.bf16 %v4572_v37, %v4570_v36  ;;  %v4685_v37 = vld [vmem:[#allocation40 + $0x10] sm:$0xff] }
 0xf17   : > { %6216 = vmatprep.subr.bf16.mxu0 %v7603_v0 }
 0xf18   : > { %v3779_v17 = vpop.trf.xlu0 }
 0xf19   : > { %5932 = vmatmul.mubr.msk.f32.vlgmr.msra.gmra.mrb[36].mxu1 %vm3621_vm5, %v3779_v17 }
 0xf1a   : > { %6218 = vmatpush3.bf16.msra.mxu0 %v6217_v51 }
 0xf1b   : > { %6219 = vmatprep.subr.bf16.mxu0 %v7603_v0 }
 0xf1c   : > { %v3780_v18 = vpop.trf.xlu0 }
 0xf1d   : > { %5934 = vmatprep.mubr.msk.f32.mxu1 %vm3621_vm5, %v3780_v18  ;;  %v6226_v18 = vpack.c.bf16 %v4488_v14, %v4487_v13  ;;  %v4593_v13 = vld [vmem:[#allocation37 + $0xd8] sm:$0xff] }
 0xf1e   : > { %6221 = vmatpush3.bf16.msra.mxu0 %v6220_v55  ;;  %v4576_v55 = vld [vmem:[#allocation37 + $0x50] sm:$0xff] }
 0xf1f   : > { %6222 = vmatprep.subr.bf16.mxu0 %v7603_v0 }
 0xf20   : > { %v3781_v19 = vpop.trf.xlu0 }
 0xf21   : > { %5935 = vmatmul.mubr.msk.f32.gmra.mrb[38].mxu1 %vm3621_vm5, %v3781_v19 }
 0xf22   : > { %4674 = vmatprep.mubr.f32.mxu1 %v7605_v1  ;;  %6224 = vmatpush3.bf16.msra.mxu0 %v6223_v58  ;;  %v6238_v58 = vpack.c.bf16 %v4576_v55, %v4574_v54  ;;  %v4707_v54 = vld [vmem:[#allocation40 + $0xc0] sm:$0xff]  ;;  %v4708_v55 = vld [vmem:[#allocation40 + $0xc8] sm:$0xff] }
 0xf23   : > { %6225 = vmatprep.subr.bf16.mxu0 %v7603_v0 }
 0xf26   : > { %6227 = vmatpush3.bf16.msra.mxu0 %v6226_v18  ;;  %v4597_v18 = vld [vmem:[#allocation37 + $0xf8] sm:$0xff] }
 0xfa6   : > { %v5909_v20 = vpop.f32.mrb[14].mxu0 }
 0xfa7   : > { %v3875_v21 = vpop.f32.mrb[15].mxu0 }
 0xfa8   : > { %4194 = vxpose.xlu1.b32.start [1/4] (short) (narrow) %v3875_v21, 8 }
 0xfaa   : > { %v5912_v22 = vpop.f32.mrb[16].mxu0 }
 0xfab   : > { %v3885_v23 = vpop.f32.mrb[17].mxu0 }
 0xfac   : > { %4195 = vxpose.xlu1.b32.cont [2/4] (short) (narrow) %v5909_v20, 8 }
 0xfb0   : > { %4196 = vxpose.xlu1.b32.cont [3/4] (short) (narrow) %v3885_v23, 8 }
 0xfb4   : > { %4197 = vxpose.xlu1.b32.end [4/4] (short) (narrow) %v5912_v22, 8 }
 0xfd8   : > { %v5917_v24 = vpop.f32.mrb[32].mxu1 }
 0xfd9   : > { %v3975_v25 = vpop.f32.mrb[33].mxu1 }
 0xfda   : > { %4226 = vxpose.xlu0.b32.start [1/4] (short) (narrow) %v3975_v25, 8 }
 0xfdc   : > { %v5925_v26 = vpop.f32.mrb[18].mxu0 }
 0xfdd   : > { %v4075_v27 = vpop.f32.mrb[19].mxu0 }
 0xfde   : > { %4258 = vxpose.xlu1.b32.start [1/4] (short) (narrow) %v4075_v27, 8  ;;  %4227 = vxpose.xlu0.b32.cont [2/4] (short) (narrow) %v5917_v24, 8  ;;  %v4567_v27 = vld [vmem:[#allocation37 + $0x8] sm:$0xff] }
 0xfe0   : > { %v5920_v28 = vpop.f32.mrb[34].mxu1 }
 0xfe1   : > { %v3985_v29 = vpop.f32.mrb[35].mxu1 }
 0xfe2   : > { %4259 = vxpose.xlu1.b32.cont [2/4] (short) (narrow) %v5925_v26, 8  ;;  %4228 = vxpose.xlu0.b32.cont [3/4] (short) (narrow) %v3985_v29, 8  ;;  %v4566_v29 = vld [vmem:[#allocation37] sm:$0xff] }
 0xfe4   : > { %v5928_v1 = vpop.f32.mrb[20].mxu0 }
 0xfe5   : > { %v4085_v61 = vpop.f32.mrb[21].mxu0 }
 0xfe6   : > { %4260 = vxpose.xlu1.b32.cont [3/4] (short) (narrow) %v4085_v61, 8  ;;  %4229 = vxpose.xlu0.b32.end [4/4] (short) (narrow) %v5920_v28, 8  ;;  %v4569_v28 = vld [vmem:[#allocation37 + $0x18] sm:$0xff]  ;;  %v4568_v61 = vld [vmem:[#allocation37 + $0x10] sm:$0xff] }
 0xfe7   : > { %v6230_v39 = vpack.c.bf16 %v4568_v61, %v4566_v29  ;;  %v4700_v61 = vld [vmem:[#allocation40 + $0x88] sm:$0xff] }
 0xfea   : > { %4261 = vxpose.xlu1.b32.end [4/4] (short) (narrow) %v5928_v1, 8  ;;  %v6228_v1 = vpack.c.bf16 %v4569_v28, %v4567_v27  ;;  %v4594_v27 = vld [vmem:[#allocation37 + $0xe0] sm:$0xff]  ;;  %v4596_v28 = vld [vmem:[#allocation37 + $0xf0] sm:$0xff] }
 0xfeb   : > { %v6258_v29 = vpack.c.bf16 %v4596_v28, %v4594_v27 }
 0xfec   : > { %v5933_v30 = vpop.f32.mrb[36].mxu1  ;;  %6229 = vmatprep.subr.bf16.mxu1 %v6228_v1  ;;  %v4699_v1 = vld [vmem:[#allocation40 + $0x80] sm:$0xff] }
 0xfed   : > { %v4175_v31 = vpop.f32.mrb[37].mxu1  ;;  %6231 = vmatpush1.bf16.msra.mxu1 %v6230_v39  ;;  %v4686_v39 = vld [vmem:[#allocation40 + $0x18] sm:$0xff] }
 0xfee   : > { %4290 = vxpose.xlu0.b32.start [1/4] (short) (narrow) %v4175_v31, 8  ;;  %v4573_v31 = vld [vmem:[#allocation37 + $0x38] sm:$0xff]  ;;  %v6266_v42 = vpack.c.bf16 %v4686_v39, %v4685_v37 }
 0xff2   : > { %4291 = vxpose.xlu0.b32.cont [2/4] (short) (narrow) %v5933_v30, 8  ;;  %v4571_v30 = vld [vmem:[#allocation37 + $0x28] sm:$0xff] }
 0xff3   : > { %v6232_v40 = vpack.c.bf16 %v4573_v31, %v4571_v30  ;;  %v4683_v30 = vld [vmem:[#allocation40] sm:$0xff]  ;;  %v6260_v31 = vpack.c.bf16 %v4700_v61, %v4699_v1 }
 0xff4   : > { %v5936_v32 = vpop.f32.mrb[38].mxu1  ;;  %v5279_v61 = vld [vmem:[#allocation41] ss:$0 sm:$0xff] }
 0xff5   : > { %v4185_v33 = vpop.f32.mrb[39].mxu1  ;;  %6233 = vmatprep.subr.bf16.mxu1 %v6232_v40  ;;  %v4703_v40 = vld [vmem:[#allocation40 + $0xa0] sm:$0xff]  ;;  %6261 = vmatprep.subr.bf16.mxu0 %v6260_v31 }
 0xff6   : > { %4292 = vxpose.xlu0.b32.cont [3/4] (short) (narrow) %v4185_v33, 8  ;;  %6235 = vmatpush1.bf16.msra.mxu1 %v6234_v48  ;;  %v4706_v48 = vld [vmem:[#allocation40 + $0xb8] sm:$0xff] }
 0xff7   : > { %6237 = vmatprep.subr.bf16.mxu1 %v6236_v52  ;;  %v4690_v52 = vld [vmem:[#allocation40 + $0x38] sm:$0xff] }
 0xffa   : > { %4293 = vxpose.xlu0.b32.end [4/4] (short) (narrow) %v5936_v32, 8  ;;  %6239 = vmatpush1.bf16.msra.mxu1 %v6238_v58  ;;  %v4691_v58 = vld [vmem:[#allocation40 + $0x40] sm:$0xff] }
0x1028   : > { %v4210_v59 = vpop.trf.xlu1 }
0x105a   : > { %v4242_v60 = vpop.trf.xlu0 }
0x105e   : > { %v4274_v62 = vpop.trf.xlu1 }
0x105f   : > { %v4322_v63 = vcombine.low %v4210_v59, %v4274_v62  ;;  %v4323_v2 = vcombine.high %v4210_v59, %v4274_v62  ;;  %v4580_v62 = vld [vmem:[#allocation37 + $0x70] sm:$0xff] }
0x1061   : > { %v4330_v6 = vrot.slane %v4322_v63, %v8598_v47  ;;  %v4337_v7 = vrot.slane %v4323_v2, %v8598_v47  ;;  %v4583_v63 = vld [vmem:[#allocation37 + $0x88] sm:$0xff]  ;;  %v4585_v2 = vld [vmem:[#allocation37 + $0x98] sm:$0xff] }
0x106e   : > { %v4306_v3 = vpop.trf.xlu0 }
0x106f   : > { %v4338_v4 = vcombine.low %v4242_v60, %v4306_v3  ;;  %v4339_v5 = vcombine.high %v4242_v60, %v4306_v3  ;;  %v4578_v60 = vld [vmem:[#allocation37 + $0x60] sm:$0xff] }
0x1070   : > { %v6242_v3 = vpack.c.bf16 %v4580_v62, %v4578_v60  ;;  %v4710_v60 = vld [vmem:[#allocation40 + $0xd8] sm:$0xff] }
0x1071   : > { %v4346_v8 = vrot.slane %v4338_v4, %v8598_v47  ;;  %v4353_v9 = vrot.slane %v4339_v5, %v8598_v47  ;;  %v6244_v4 = vpack.c.bf16 %v4585_v2, %v4583_v63  ;;  %v4582_v5 = vld [vmem:[#allocation37 + $0x80] sm:$0xff]  ;;  %v4693_v2 = vld [vmem:[#allocation40 + $0x50] sm:$0xff] }
0x1073   : > { %v4354_v10 = vcombine.low %v4330_v6, %v4346_v8  ;;  %v4355_v11 = vcombine.high %v4330_v6, %v4346_v8  ;;  %v4370_v12 = vcombine.low %v4337_v7, %v4353_v9  ;;  %v4371_v0 = vcombine.high %v4337_v7, %v4353_v9  ;;  %v4584_v6 = vld [vmem:[#allocation37 + $0x90] sm:$0xff]  ;;  %v4587_v7 = vld [vmem:[#allocation37 + $0xa8] sm:$0xff]  ;;  %v4589_v8 = vld [vmem:[#allocation37 + $0xb8] sm:$0xff] }
0x1074   : > { %v6246_v9 = vpack.c.bf16 %v4584_v6, %v4582_v5  ;;  %v4712_v5 = vld [vmem:[#allocation40 + $0xe8] sm:$0xff] }
0x1075   : > { %v4362_v15 = vrot.slane %v4354_v10, %v8601_v53  ;;  %v4369_v16 = vrot.slane %v4355_v11, %v8601_v53  ;;  %v4378_v38 = vrot.slane %v4370_v12, %v8601_v53  ;;  %v4385_v17 = vrot.slane %v4371_v0, %v8601_v53  ;;  %v4586_v11 = vld [vmem:[#allocation37 + $0xa0] sm:$0xff]  ;;  %v4588_v12 = vld [vmem:[#allocation37 + $0xb0] sm:$0xff]  ;;  %v4591_v0 = vld [vmem:[#allocation37 + $0xc8] sm:$0xff] }
0x1076   : > { %v6248_v10 = vpack.c.bf16 %v4589_v8, %v4587_v7  ;;  %v6250_v14 = vpack.c.bf16 %v4588_v12, %v4586_v11  ;;  %v5278_v8 = vld [vmem:[#allocation29] ss:$0 sm:$0xff]  ;;  %v4695_v12 = vld [vmem:[#allocation40 + $0x60] sm:$0xff] }
0x1077   : > { %v4390_v19 = vcombine.low %v4362_v15, %v4369_v16  ;;  %v5276_v20 = vcombine.high %v4362_v15, %v4369_v16  ;;  %v4406_v21 = vcombine.low %v4378_v38, %v4385_v17  ;;  %v5277_v22 = vcombine.high %v4378_v38, %v4385_v17  ;;  %v4590_v16 = vld [vmem:[#allocation37 + $0xc0] sm:$0xff]  ;;  %v4592_v38 = vld [vmem:[#allocation37 + $0xd0] sm:$0xff]  ;;  %v4595_v17 = vld [vmem:[#allocation37 + $0xe8] sm:$0xff] }
0x1078   : > { %v6252_v15 = vpack.c.bf16 %v4593_v13, %v4591_v0  ;;  %v4696_v0 = vld [vmem:[#allocation40 + $0x68] sm:$0xff] }
0x1079   : > { %v4397_v23 = vrot.slane %v4390_v19, %v8598_v47  ;;  %v4405_v24 = vrot.slane %v5276_v20, %v8598_v47  ;;  %v4413_v25 = vrot.slane %v4406_v21, %v8598_v47  ;;  %v4421_v26 = vrot.slane %v5277_v22, %v8598_v47 }
0x107a   : > { %v6254_v19 = vpack.c.bf16 %v4592_v38, %v4590_v16  ;;  %v6256_v20 = vpack.c.bf16 %v4597_v18, %v4595_v17  ;;  %v6286_v13 = vpack.c.bf16 %v4696_v0, %v4695_v12  ;;  %v4697_v38 = vld [vmem:[#allocation40 + $0x70] sm:$0xff]  ;;  %v4698_v17 = vld [vmem:[#allocation40 + $0x78] sm:$0xff] }
0x107b   : > { %v4423_v32 = vcombine.high %v4397_v23, %v4405_v24  ;;  %v4439_v33 = vcombine.high %v4413_v25, %v4421_v26  ;;  %v4422_v34 = vcombine.low %v4397_v23, %v4405_v24  ;;  %v4438_v35 = vcombine.low %v4413_v25, %v4421_v26 }
0x107c   : > { %v6290_v18 = vpack.c.bf16 %v4698_v17, %v4697_v38 }
0x107d   : > { %v4437_v47 = vrot.slane %v4423_v32, %v8601_v53  ;;  %v4453_v43 = vrot.slane %v4439_v33, %v8601_v53  ;;  %v4430_v45 = vrot.slane %v4422_v34, %v8601_v53  ;;  %v4446_v46 = vrot.slane %v4438_v35, %v8601_v53  ;;  %v4684_v32 = vld [vmem:[#allocation40 + $0x8] sm:$0xff]  ;;  %v4701_v33 = vld [vmem:[#allocation40 + $0x90] sm:$0xff]  ;;  %v4702_v34 = vld [vmem:[#allocation40 + $0x98] sm:$0xff] }
0x107e   : > { %v6240_v53 = vpack.c.bf16 %v4581_v57, %v4579_v56  ;;  %v6262_v35 = vpack.c.bf16 %v4684_v32, %v4683_v30  ;;  %v6264_v36 = vpack.c.bf16 %v4702_v34, %v4701_v33  ;;  %v6276_v57 = vpack.c.bf16 %v4708_v55, %v4707_v54 }
0x107f   : > { %v4456_v49 = vcombine.low %v4437_v47, %v4453_v43  ;;  %v4455_v50 = vcombine.high %v4430_v45, %v4446_v46  ;;  %v4454_v51 = vcombine.low %v4430_v45, %v4446_v46  ;;  %v4457_v59 = vcombine.high %v4437_v47, %v4453_v43  ;;  %v4687_v43 = vld [vmem:[#allocation40 + $0x20] sm:$0xff]  ;;  %v4688_v45 = vld [vmem:[#allocation40 + $0x28] sm:$0xff]  ;;  %v4705_v46 = vld [vmem:[#allocation40 + $0xb0] sm:$0xff] }
0x1080   : > { %6241 = vmatprep.subr.bf16.mxu1 %v6240_v53  ;;  %v6268_v47 = vpack.c.bf16 %v4704_v41, %v4703_v40  ;;  %v4709_v53 = vld [vmem:[#allocation40 + $0xd0] sm:$0xff] }
0x1081   : > { %4463 = vrot.lane.b32.xlu0 %v4456_v49, %s7608_s2  ;;  %4459 = vrot.lane.b32.xlu1 %v4455_v50, %s7606_s6  ;;  %v6270_v49 = vpack.c.bf16 %v4688_v45, %v4687_v43  ;;  %v6272_v50 = vpack.c.bf16 %v4706_v48, %v4705_v46  ;;  %v6280_v63 = vpack.c.bf16 %v4710_v60, %v4709_v53  ;;  %v5281_v45 = vld [vmem:[#allocation35] ss:$0 sm:$0xff] }
0x1082   : > { %6243 = vmatpush1.bf16.msra.mxu1 %v6242_v3  ;;  %v4694_v3 = vld [vmem:[#allocation40 + $0x58] sm:$0xff] }
0x1083   : > { %6245 = vmatprep.subr.bf16.mxu1 %v6244_v4  ;;  %v4711_v4 = vld [vmem:[#allocation40 + $0xe0] sm:$0xff]  ;;  %v6282_v6 = vpack.c.bf16 %v4694_v3, %v4693_v2 }
0x1084   : > { %v6284_v7 = vpack.c.bf16 %v4712_v5, %v4711_v4 }
0x1085   : > { %4467 = vrot.lane.b32.xlu1 %v4457_v59, %s7607_s4  ;;  %v4692_v59 = vld [vmem:[#allocation40 + $0x48] sm:$0xff] }
0x1086   : > { %6247 = vmatpush1.bf16.msra.mxu1 %v6246_v9  ;;  %v6278_v62 = vpack.c.bf16 %v4692_v59, %v4691_v58 }
0x1087   : > { %6249 = vmatprep.subr.bf16.mxu1 %v6248_v10 }
0x108a   : > { %6251 = vmatpush1.bf16.msra.mxu1 %v6250_v14  ;;  %v4713_v14 = vld [vmem:[#allocation40 + $0xf0] sm:$0xff] }
0x108b   : > { %6253 = vmatprep.subr.bf16.mxu1 %v6252_v15  ;;  %v4714_v15 = vld [vmem:[#allocation40 + $0xf8] sm:$0xff] }
0x108c   : > { %v6288_v16 = vpack.c.bf16 %v4714_v15, %v4713_v14 }
0x108e   : > { %6255 = vmatpush1.bf16.msra.mxu1 %v6254_v19  ;;  %v4602_v19 = vsub.s32 0, %v8595_v44 }
0x108f   : > { %6257 = vmatprep.subr.bf16.mxu1 %v6256_v20  ;;  %v4598_v20 = vld [vmem:[#allocation38] sm:$0x3] }
0x1092   : > { %6259 = vmatpush1.bf16.msra.mxu1 %v6258_v29 }
0x10f3   : > { %v4460_v21 = vpop.permute.xlu1 %4459  ;;  %v4464_v22 = vpop.permute.xlu0 %4463 }
0x10f4   : > { %v4470_v23 = vsel %vm1604_vm1, %v4454_v51, %v4460_v21  ;;  %v4689_v51 = vld [vmem:[#allocation40 + $0x30] sm:$0xff]  ;;  %v4606_v21 = vsub.s32 1, %v8595_v44 }
0x10f5   : > { %v4471_v25 = vsel %vm2743_vm3, %v4470_v23, %v4464_v22  ;;  %v6274_v56 = vpack.c.bf16 %v4690_v52, %v4689_v51  ;;  %v4603_v22 = vrot.slane %v4598_v20, %v4602_v19 }
0x10f6   : > { %v4607_v23 = vrot.slane %v4598_v20, %v4606_v21 }
0x10f7   : > { %v4468_v24 = vpop.permute.xlu1 %4467 }
0x10f8   : > { %v4472_v26 = vsel %vm2745_vm4, %v4471_v25, %v4468_v24 }
0x10f9   : > { %5970 = vmatmul.mubr.f32.vlgmr.msra.gmra.mrb[22].mxu0 %v4472_v26 }
0x10fa   : > { %6263 = vmatpush3.bf16.msra.mxu0 %v6262_v35 }
0x10fb   : > { %6265 = vmatprep.subr.bf16.mxu0 %v6264_v36 }
0x10fe   : > { %6267 = vmatpush3.bf16.msra.mxu0 %v6266_v42 }
0x10ff   : > { %6269 = vmatprep.subr.bf16.mxu0 %v6268_v47  ;;  %v5280_v47 = vld [vmem:[#allocation34] ss:$0 sm:$0xff] }
0x1102   : > { %6271 = vmatpush3.bf16.msra.mxu0 %v6270_v49 }
0x1103   : > { %6273 = vmatprep.subr.bf16.mxu0 %v6272_v50 }
0x1106   : > { %6275 = vmatpush3.bf16.msra.mxu0 %v6274_v56 }
0x1107   : > { %6277 = vmatprep.subr.bf16.mxu0 %v6276_v57 }
0x110a   : > { %6279 = vmatpush3.bf16.msra.mxu0 %v6278_v62 }
0x110b   : > { %6281 = vmatprep.subr.bf16.mxu0 %v6280_v63 }
0x110e   : > { %6283 = vmatpush3.bf16.msra.mxu0 %v6282_v6 }
0x110f   : > { %6285 = vmatprep.subr.bf16.mxu0 %v6284_v7 }
0x1112   : > { %6287 = vmatpush3.bf16.msra.mxu0 %v6286_v13 }
0x1113   : > { %6289 = vmatprep.subr.bf16.mxu0 %v6288_v16 }
0x1116   : > { %6291 = vmatpush3.bf16.msra.mxu0 %v6290_v18 }
0x11cc   : > { %v4562_v9 = vpop.f32.mrb[22].mxu0 }
0x11cd   : > { %v4563_v10 = vadd.f32 %v5278_v8, %v4562_v9  ;;  %v5971_v11 = vpop.f32.mrb[23].mxu0 }
0x11cf   : > { %4675 = vmatmul.mubr.f32.vlgmr.msra.gmra.mrb[40].mxu1 %v4563_v10 }
0x12a2   : > { %v4676_v24 = vpop.f32.mrb[40].mxu1 }
0x12a3   : > { %v4677_v25 = vadd.f32 %v4676_v24, %v4603_v22  ;;  %v4678_v26 = vpop.f32.mrb[41].mxu1 }
0x12a4   : > { %v4679_v27 = vadd.f32 %v4678_v26, %v4607_v23 }
0x12a5   : > { %v4681_v29 = vmax.f32 %v4677_v25, 0.0 }
0x12a6   : > { %v4682_v28 = vmax.f32 %v4679_v27, 0.0 }
0x12a8   : > { %4786 = vmatprep.mubr.f32.mxu0 %v4682_v28 }
0x12a9   : > { %4787 = vmatmul.mubr.f32.vlgmr.msra.gmra.mrb[24].mxu0 %v4681_v29 }
0x137c   : > { %v5537_v1 = vpop.f32.mrb[24].mxu0 }
0x137d   : > { %v5538_v30 = vpop.f32.mrb[25].mxu0 }
0x137e   : > { %v5539_v31 = vadd.f32 %v5538_v30, %v5537_v1 }
0x1380   : > { %v4789_v32 = vadd.f32 %v5539_v31, %v5279_v61 }
0x1382   : > { %4794 = vadd.xlane.f32.xlu1 %v4789_v32  ;;  %v4796_v33 = vmul.f32 %v4789_v32, %v4789_v32 }
0x1384   : > { %4797 = vadd.xlane.f32.xlu0 %v4796_v33 }
0x140f   : > { %v4795_v44 = vpop.xlane.xlu1 %4794 }
0x1410   : > { %v4799_v34 = vmul.f32 0.0078125, %v4795_v44 }
0x1411   : > { %v4798_v35 = vpop.xlane.xlu0 %4797 }
0x1412   : > { %v4801_v36 = vmul.f32 %v4799_v34, %v4799_v34  ;;  %v4800_v37 = vmul.f32 0.0078125, %v4798_v35  ;;  %v4803_v41 = vsub.f32 %v4789_v32, %v4799_v34 }
0x1414   : > { %v4802_v39 = vsub.f32 %v4800_v37, %v4801_v36 }
0x1416   : > { %v4804_v40 = vadd.f32 1e-05, %v4802_v39 }
0x1418   : > { %6715 = vrsqrt.f32 %v4804_v40 }
0x1422   : > { %v6716_v42 = vpop.eup %6715 }
0x1423   : > { %v4806_v43 = vmul.f32 %v6716_v42, %v4803_v41 }
0x1425   : > { %v4813_v46 = vmul.f32 %v5280_v47, %v4806_v43 }
0x1427   : > { %v4820_v48 = vadd.f32 %v5281_v45, %v4813_v46 }
0x1429   : > { %4821 = vst [vmem:[%s1166_s14] sm:$0xff] %v4820_v48 }
0x142a   : > { %7462 = shalt.err (!%p7459_p3)
}
0x142b   : > { %s7463_s17 = scalar_lea.hbm %s8753_s12, 128  ;;  %s7467_s27 = scalar_lea.hbm %s8967_s19, 256 }
0x142c   : > { %p7464_p6 = scmp.ne.s32.totalorder %s8753_s12, %s7463_s17  ;;  %p7468_p10 = scmp.lt.u32.totalorder %s8753_s12, %s8967_s19 }
0x142d   : > { %p7469_p5 = scmp.lt.u32.totalorder %s7467_s27, %s7463_s17  ;;  %p7471_p9 = scmp.lt.u32.totalorder %s7463_s17, %s8753_s12 }
0x142e   : > { %p7465_p2 = pnand %p7464_p6, %p8968_p8 }
0x142f   : > { %p7470_p7 = por %p7469_p5, %p7468_p10 }
0x1430   : > { %p7466_p4 = pneg %p7465_p2 }
0x1431   : > { %p7472_p11 = por %p7471_p9, %p7470_p7 }
0x1433   : > { %p7473_p0 = pnand %p7472_p11, %p7466_p4 }
0x1435   : > { %7476 = shalt.err (!%p7473_p0)
}
0x1436   : > { %6392 = dma.vmem_to_hbm [thread:$0]  (%p8968_p8), %s8755_s5, 128, %s8753_s12, %s4823_s1  }
0x1437 PF: > { %s8969_s2 = sld [smem:[#allocation60_spill]]  ;;  %s8970_s22 = sld [smem:[#allocation63_spill]] }
0x1438   : > { %p8971_p12 = scmp.ne.s32.totalorder %s8932_s8, 0 }
0x143d   : > { %s4848_s14 = sand.u32 1, %s8969_s2   ;;  %p8972_p13 = scmp.ge.s32.totalorder %s8970_s22, 2 }
0x143e   : > { %s4849_s9 = scalar_lea.sflag [#allocation4], %s4848_s14 }
0x143f   : > { %p6475_p1 = pnand %p8972_p13, %p8971_p12 }
0x1441   : > { %7554 = dma.done.wait (!%p6475_p1), %s4849_s9, 128  }
0x1442   : > { %7556 = vsyncadd (!%p6475_p1), %s4849_s9, 4294967168  ;;  %s8973_s27 = sld [smem:[#allocation61_spill]]  ;;  %s8974_s3 = sld [smem:[#allocation62_spill]] }
0x1443   : > { %p54_p3 = scmp.ge.s32.totalorder %s8284_s28, 4  }
0x1445   :  { %56 = sbr.rel (!%p54_p3) target bundleno = 44 (0x2c), region = 278 }
0x144c   :  { %4854 = vsyncpa [#allocation3], 1 }
0x144d   :  { %4856 = vsyncpa [#allocation3 + $0x1], 1 }
0x144e   :  { %4857 = vsyncpa [#allocation6], 1 }
0x144f   :  { %4859 = vsyncpa [#allocation6 + $0x1], 1 }
0x1450   :  { %4860 = vsyncpa [#allocation9], 1 }
0x1451   :  { %4861 = vsyncpa [#allocation12], 1 }
0x1452   :  { %4862 = vsyncpa [#allocation15], 1 }
0x1453   :  { %4863 = vsyncpa [#allocation18], 1 }
0x1454   :  { %4864 = vsyncpa [#allocation21], 1 }
0x1455   :  { %4865 = vsyncpa [#allocation24], 1 }
0x1456   :  { %4866 = vsyncpa [#allocation27], 1 }
0x1457   :  { %4867 = vsyncpa [#allocation30], 1 }
0x1458   :  { %4868 = vsyncpa [#allocation33], 1 }
0x1459   :  { %4869 = vsyncpa [#allocation36], 1 }
0x145a   :  { %4870 = vsyncpa [#allocation39], 1 }
0x145b   :  { %4871 = vsyncpa [#allocation42], 1 }
0x145c   :  { %4872 = vsyncpa [#allocation4], 1 }
0x145d   :  { %4874 = vsyncpa [#allocation4 + $0x1], 1 }

</bundles_post_ra>
